<compile_context>
chip_gen: v7x
topology: tpu7x:2x2x1
jax: 0.10.0
libtpu: 0.0.40
codegen_flags: <defaults>
</compile_context>

<pallas_src>
import functools

import jax
import jax.numpy as jnp
from jax.experimental import pallas as pl
from jax.experimental.pallas import tpu as pltpu

IN_DIM = 32 * 32 * 3      # 3072
HID = 512
OUT_DIM = 2
OUT_PAD = 128             # lane-dense padded logits width


def mlp_kernel(x_ref, w1_ref, b1_ref, w2_ref, b2_ref, w3_ref, b3_ref,
               w4_ref, b4_ref, o_ref):
    # In-kernel f32 -> bf16 cast (VPU work hidden under the MXU matmuls).
    x = x_ref[...].astype(jnp.bfloat16)
    # Layer 1: bf16 x bf16 -> f32 accumulation on the MXU, bias/ReLU in f32.
    h = jnp.dot(x, w1_ref[...],
                preferred_element_type=jnp.float32) + b1_ref[...]
    h = jnp.maximum(h, 0.0)
    # Layer 2
    h = jnp.dot(h.astype(jnp.bfloat16), w2_ref[...],
                preferred_element_type=jnp.float32) + b2_ref[...]
    h = jnp.maximum(h, 0.0)
    # Layer 3
    h = jnp.dot(h.astype(jnp.bfloat16), w3_ref[...],
                preferred_element_type=jnp.float32) + b3_ref[...]
    h = jnp.maximum(h, 0.0)
    # Layer 4 (padded to 128 output lanes -> unmasked lane-dense store)
    o_ref[...] = (jnp.dot(h.astype(jnp.bfloat16), w4_ref[...],
                          preferred_element_type=jnp.float32)
                  + b4_ref[...]).astype(o_ref.dtype)


def _round_up(x, m):
    return ((x + m - 1) // m) * m


def _pick_tile_and_vmem():
    """Per-generation defaults: (batch tile, vmem_limit_bytes)."""
    try:
        kind = jax.devices()[0].device_kind.lower()
    except Exception:  # pragma: no cover
        kind = ""
    if "v7" in kind or "7x" in kind:
        # v7x: 64 MiB VMEM/TC -> 2 x (1024 x 3072 f32) = 24 MiB x-buffers.
        return 1024, 48 * 1024 * 1024
    if "v5" in kind or "v6" in kind:
        # v5e / v6e: 128 MiB VMEM; larger tile amortizes per-step overhead.
        return 2048, 100 * 1024 * 1024
    return 1024, 48 * 1024 * 1024  # conservative fallback


def _const_spec(shp):
    """VMEM-resident spec: constant index_map, single buffer (no re-fetch)."""
    idx = lambda *_: (0,) * len(shp)
    try:
        return pl.BlockSpec(shp, idx, pipeline_mode=pl.Buffered(1))
    except (TypeError, AttributeError):
        # Older jax without pipeline_mode: fall back to default buffering.
        return pl.BlockSpec(shp, idx)


@functools.partial(jax.jit, static_argnames=("tm", "vmem_limit_bytes"))
def cnn_forward(x_nchw, params, *, tm=None, vmem_limit_bytes=None):
    """x_nchw: (N, 3, 32, 32) float32. Returns logits (N, 2) float32."""
    n = x_nchw.shape[0]
    x_flat = x_nchw.reshape(n, -1)  # (N, 3072), torch.flatten ordering

    if tm is None or vmem_limit_bytes is None:
        d_tm, d_vmem = _pick_tile_and_vmem()
        tm = d_tm if tm is None else tm
        vmem_limit_bytes = d_vmem if vmem_limit_bytes is None else vmem_limit_bytes

    w1, b1, w2, b2, w3, b3, w4, b4 = params
    # Pad layer-4 weight/bias to 128 output columns (lane-dense output).
    w4p = jnp.zeros((HID, OUT_PAD), jnp.bfloat16).at[:, :OUT_DIM].set(w4)
    b4p = jnp.zeros((1, OUT_PAD), jnp.float32).at[:, :OUT_DIM].set(b4)

    # Batch tile: multiple of 16 rows (bf16 sublane packing / full MXU rows).
    n16 = _round_up(n, 16)
    tm_eff = min(tm, n16)
    # Guarantee >= 2 grid steps for mid/large batches so the "parallel" axis
    # can shard across the two TensorCores of a v7x chip (free on v5e/v6e).
    if n >= 256 and n16 <= tm_eff:
        tm_eff = _round_up(pl.cdiv(n, 2), 16)
    grid_m = pl.cdiv(n, tm_eff)

    x_in = x_flat
    n_io = n
    if grid_m == 1 and tm_eff != n:
        # Single-block small batch: cheap tiny pad so the block matches the
        # array exactly (avoids relying on boundary handling for this path).
        n_io = tm_eff
        x_in = jnp.pad(x_flat, ((0, n_io - n), (0, 0)))
    # For grid_m >= 2 with ragged n, the last block is handled by Pallas
    # boundary masking: OOB reads feed rows whose outputs are masked /
    # discarded by the [:n] slice below.  Keep that invariant if editing.

    in_specs = [
        pl.BlockSpec((tm_eff, IN_DIM), lambda i: (i, 0)),   # x tile (f32)
        _const_spec((IN_DIM, HID)), _const_spec((1, HID)),  # w1, b1
        _const_spec((HID, HID)), _const_spec((1, HID)),     # w2, b2
        _const_spec((HID, HID)), _const_spec((1, HID)),     # w3, b3
        _const_spec((HID, OUT_PAD)), _const_spec((1, OUT_PAD)),  # w4p, b4p
    ]
    out_spec = pl.BlockSpec((tm_eff, OUT_PAD), lambda i: (i, 0))

    weight_bytes = (IN_DIM * HID + 2 * HID * HID + HID * OUT_PAD) * 2 \
        + (3 * HID + OUT_PAD) * 4
    flops = 2 * n * (IN_DIM * HID + 2 * HID * HID + HID * OUT_PAD)
    bytes_accessed = weight_bytes + n * IN_DIM * 4 + n * OUT_PAD * 4

    logits_pad = pl.pallas_call(
        mlp_kernel,
        out_shape=jax.ShapeDtypeStruct((n_io, OUT_PAD), jnp.float32),
        grid=(grid_m,),
        in_specs=in_specs,
        out_specs=out_spec,
        compiler_params=pltpu.CompilerParams(
            dimension_semantics=("parallel",),
            vmem_limit_bytes=vmem_limit_bytes),
        cost_estimate=pl.CostEstimate(
            flops=flops, transcendentals=0, bytes_accessed=bytes_accessed),
    )(x_in, w1, b1, w2, b2, w3, b3, w4p, b4p)

    return logits_pad[:n, :OUT_DIM]


def init_params(key):
    """Deterministic synthetic init (shapes match the PyTorch module).

    Weights stored bf16 (MXU operands), biases stored f32 (VPU path).
    """
    dims = [(IN_DIM, HID), (HID, HID), (HID, HID), (HID, OUT_DIM)]
    params = []
    for i, (din, dout) in enumerate(dims):
        kw, kb = jax.random.split(jax.random.fold_in(key, i))
        bound = 1.0 / (din ** 0.5)  # same scale family as torch.nn.Linear
        w = jax.random.uniform(kw, (din, dout), jnp.float32, -bound, bound)
        b = jax.random.uniform(kb, (1, dout), jnp.float32, -bound, bound)
        params += [w.astype(jnp.bfloat16), b]
    return tuple(params)


def reference_forward(x_nchw, params):
    """Pure-JAX f32 reference on the (bf16-quantized) stored weights."""
    x = x_nchw.reshape(x_nchw.shape[0], -1)
    w1, b1, w2, b2, w3, b3, w4, b4 = [p.astype(jnp.float32) for p in params]
    h = jnp.maximum(x @ w1 + b1, 0.0)
    h = jnp.maximum(h @ w2 + b2, 0.0)
    h = jnp.maximum(h @ w3 + b3, 0.0)
    return h @ w4 + b4


if __name__ == "__main__":
    key = jax.random.PRNGKey(0)
    kx, kp = jax.random.split(key)

    # Module expects 32x32x3 images (flatten -> 3072 features); small batch.
    x = jax.random.normal(kx, (2, 3, 32, 32), jnp.float32)
    params = init_params(kp)

    out = cnn_forward(x, params)
    out = jax.block_until_ready(out)

    ref = reference_forward(x, params)
    assert out.shape == (2, 2)
    # bf16 MXU operands (f32 accumulation) -> compare with loose tolerance.
    assert jnp.allclose(out, ref, atol=2e-2, rtol=2e-2), (
        f"max abs err {jnp.max(jnp.abs(out - ref))}")

    print("KERNEL_OK")
</pallas_src>

<mosaic_0001>
module attributes {stable_mosaic.version = 11 : i64} {
  func.func @mlp_kernel(%arg0: i32, %arg1: memref<16x3072xf32, #tpu.memory_space<vmem>>, %arg2: memref<3072x512xbf16, #tpu.memory_space<vmem>>, %arg3: memref<1x512xf32, #tpu.memory_space<vmem>>, %arg4: memref<512x512xbf16, #tpu.memory_space<vmem>>, %arg5: memref<1x512xf32, #tpu.memory_space<vmem>>, %arg6: memref<512x512xbf16, #tpu.memory_space<vmem>>, %arg7: memref<1x512xf32, #tpu.memory_space<vmem>>, %arg8: memref<512x128xbf16, #tpu.memory_space<vmem>>, %arg9: memref<1x128xf32, #tpu.memory_space<vmem>>, %arg10: memref<16x128xf32, #tpu.memory_space<vmem>>) attributes {dimension_semantics = [#tpu.dimension_semantics<parallel>], iteration_bounds = array<i64: 1>, scalar_prefetch = 0 : i64, scratch_operands = 0 : i64, tpu.core_type = #tpu.core_type<tc>, window_params = [{transform_indices = @transform_0, window_bounds = array<i64: 16, 3072>}, {pipeline_mode = #tpu.pipeline_mode<synchronous>, transform_indices = @transform_1, window_bounds = array<i64: 3072, 512>}, {pipeline_mode = #tpu.pipeline_mode<synchronous>, transform_indices = @transform_2, window_bounds = array<i64: 1, 512>}, {pipeline_mode = #tpu.pipeline_mode<synchronous>, transform_indices = @transform_3, window_bounds = array<i64: 512, 512>}, {pipeline_mode = #tpu.pipeline_mode<synchronous>, transform_indices = @transform_4, window_bounds = array<i64: 1, 512>}, {pipeline_mode = #tpu.pipeline_mode<synchronous>, transform_indices = @transform_5, window_bounds = array<i64: 512, 512>}, {pipeline_mode = #tpu.pipeline_mode<synchronous>, transform_indices = @transform_6, window_bounds = array<i64: 1, 512>}, {pipeline_mode = #tpu.pipeline_mode<synchronous>, transform_indices = @transform_7, window_bounds = array<i64: 512, 128>}, {pipeline_mode = #tpu.pipeline_mode<synchronous>, transform_indices = @transform_8, window_bounds = array<i64: 1, 128>}, {transform_indices = @transform_9, window_bounds = array<i64: 16, 128>}]} {
    %c0 = arith.constant 0 : index
    %c0_0 = arith.constant 0 : index
    %0 = vector.load %arg1[%c0, %c0_0] : memref<16x3072xf32, #tpu.memory_space<vmem>>, vector<16x3072xf32>
    %1 = arith.truncf %0 : vector<16x3072xf32> to vector<16x3072xbf16>
    %c0_1 = arith.constant 0 : index
    %c0_2 = arith.constant 0 : index
    %2 = vector.load %arg2[%c0_1, %c0_2] : memref<3072x512xbf16, #tpu.memory_space<vmem>>, vector<3072x512xbf16>
    %cst = arith.constant dense<0.000000e+00> : vector<16x512xf32>
    %3 = tpu.matmul %1, %2, %cst {dimension_numbers = #tpu.dot_dimension_numbers<[1], [0], [0], [1], [0, 0, 1, 1], [], []>} : vector<16x3072xbf16>, vector<3072x512xbf16>, vector<16x512xf32> -> vector<16x512xf32>
    %c0_3 = arith.constant 0 : index
    %c0_4 = arith.constant 0 : index
    %4 = vector.load %arg3[%c0_3, %c0_4] : memref<1x512xf32, #tpu.memory_space<vmem>>, vector<1x512xf32>
    %5 = vector.broadcast %4 : vector<1x512xf32> to vector<16x512xf32>
    %6 = arith.addf %3, %5 : vector<16x512xf32>
    %cst_5 = arith.constant 0.000000e+00 : f32
    %7 = vector.broadcast %cst_5 : f32 to vector<16x512xf32>
    %8 = arith.maximumf %6, %7 : vector<16x512xf32>
    %9 = arith.truncf %8 : vector<16x512xf32> to vector<16x512xbf16>
    %c0_6 = arith.constant 0 : index
    %c0_7 = arith.constant 0 : index
    %10 = vector.load %arg4[%c0_6, %c0_7] : memref<512x512xbf16, #tpu.memory_space<vmem>>, vector<512x512xbf16>
    %cst_8 = arith.constant dense<0.000000e+00> : vector<16x512xf32>
    %11 = tpu.matmul %9, %10, %cst_8 {dimension_numbers = #tpu.dot_dimension_numbers<[1], [0], [0], [1], [0, 0, 1, 1], [], []>} : vector<16x512xbf16>, vector<512x512xbf16>, vector<16x512xf32> -> vector<16x512xf32>
    %c0_9 = arith.constant 0 : index
    %c0_10 = arith.constant 0 : index
    %12 = vector.load %arg5[%c0_9, %c0_10] : memref<1x512xf32, #tpu.memory_space<vmem>>, vector<1x512xf32>
    %13 = vector.broadcast %12 : vector<1x512xf32> to vector<16x512xf32>
    %14 = arith.addf %11, %13 : vector<16x512xf32>
    %cst_11 = arith.constant 0.000000e+00 : f32
    %15 = vector.broadcast %cst_11 : f32 to vector<16x512xf32>
    %16 = arith.maximumf %14, %15 : vector<16x512xf32>
    %17 = arith.truncf %16 : vector<16x512xf32> to vector<16x512xbf16>
    %c0_12 = arith.constant 0 : index
    %c0_13 = arith.constant 0 : index
    %18 = vector.load %arg6[%c0_12, %c0_13] : memref<512x512xbf16, #tpu.memory_space<vmem>>, vector<512x512xbf16>
    %cst_14 = arith.constant dense<0.000000e+00> : vector<16x512xf32>
    %19 = tpu.matmul %17, %18, %cst_14 {dimension_numbers = #tpu.dot_dimension_numbers<[1], [0], [0], [1], [0, 0, 1, 1], [], []>} : vector<16x512xbf16>, vector<512x512xbf16>, vector<16x512xf32> -> vector<16x512xf32>
    %c0_15 = arith.constant 0 : index
    %c0_16 = arith.constant 0 : index
    %20 = vector.load %arg7[%c0_15, %c0_16] : memref<1x512xf32, #tpu.memory_space<vmem>>, vector<1x512xf32>
    %21 = vector.broadcast %20 : vector<1x512xf32> to vector<16x512xf32>
    %22 = arith.addf %19, %21 : vector<16x512xf32>
    %cst_17 = arith.constant 0.000000e+00 : f32
    %23 = vector.broadcast %cst_17 : f32 to vector<16x512xf32>
    %24 = arith.maximumf %22, %23 : vector<16x512xf32>
    %25 = arith.truncf %24 : vector<16x512xf32> to vector<16x512xbf16>
    %c0_18 = arith.constant 0 : index
    %c0_19 = arith.constant 0 : index
    %26 = vector.load %arg8[%c0_18, %c0_19] : memref<512x128xbf16, #tpu.memory_space<vmem>>, vector<512x128xbf16>
    %cst_20 = arith.constant dense<0.000000e+00> : vector<16x128xf32>
    %27 = tpu.matmul %25, %26, %cst_20 {dimension_numbers = #tpu.dot_dimension_numbers<[1], [0], [0], [1], [0, 0, 1, 1], [], []>} : vector<16x512xbf16>, vector<512x128xbf16>, vector<16x128xf32> -> vector<16x128xf32>
    %c0_21 = arith.constant 0 : index
    %c0_22 = arith.constant 0 : index
    %28 = vector.load %arg9[%c0_21, %c0_22] : memref<1x128xf32, #tpu.memory_space<vmem>>, vector<1x128xf32>
    %29 = vector.broadcast %28 : vector<1x128xf32> to vector<16x128xf32>
    %30 = arith.addf %27, %29 : vector<16x128xf32>
    %c0_23 = arith.constant 0 : index
    %c0_24 = arith.constant 0 : index
    %31 = vector.load %arg10[%c0_23, %c0_24] : memref<16x128xf32, #tpu.memory_space<vmem>>, vector<16x128xf32>
    tpu.vector_store %arg10[%c0_23, %c0_24], %30 {strides = array<i32>} : memref<16x128xf32, #tpu.memory_space<vmem>>, vector<16x128xf32>,
    return
  }
  func.func @transform_0(%arg0: i32) -> (i32, i32) {
    %c0_i32 = arith.constant 0 : i32
    %c0_i32_0 = arith.constant 0 : i32
    return %arg0, %c0_i32 : i32, i32
  }
  func.func @transform_1(%arg0: i32) -> (i32, i32) {
    %c0_i32 = arith.constant 0 : i32
    %c0_i32_0 = arith.constant 0 : i32
    %c0_i32_1 = arith.constant 0 : i32
    return %c0_i32, %c0_i32_0 : i32, i32
  }
  func.func @transform_2(%arg0: i32) -> (i32, i32) {
    %c0_i32 = arith.constant 0 : i32
    %c0_i32_0 = arith.constant 0 : i32
    %c0_i32_1 = arith.constant 0 : i32
    return %c0_i32, %c0_i32_0 : i32, i32
  }
  func.func @transform_3(%arg0: i32) -> (i32, i32) {
    %c0_i32 = arith.constant 0 : i32
    %c0_i32_0 = arith.constant 0 : i32
    %c0_i32_1 = arith.constant 0 : i32
    return %c0_i32, %c0_i32_0 : i32, i32
  }
  func.func @transform_4(%arg0: i32) -> (i32, i32) {
    %c0_i32 = arith.constant 0 : i32
    %c0_i32_0 = arith.constant 0 : i32
    %c0_i32_1 = arith.constant 0 : i32
    return %c0_i32, %c0_i32_0 : i32, i32
  }
  func.func @transform_5(%arg0: i32) -> (i32, i32) {
    %c0_i32 = arith.constant 0 : i32
    %c0_i32_0 = arith.constant 0 : i32
    %c0_i32_1 = arith.constant 0 : i32
    return %c0_i32, %c0_i32_0 : i32, i32
  }
  func.func @transform_6(%arg0: i32) -> (i32, i32) {
    %c0_i32 = arith.constant 0 : i32
    %c0_i32_0 = arith.constant 0 : i32
    %c0_i32_1 = arith.constant 0 : i32
    return %c0_i32, %c0_i32_0 : i32, i32
  }
  func.func @transform_7(%arg0: i32) -> (i32, i32) {
    %c0_i32 = arith.constant 0 : i32
    %c0_i32_0 = arith.constant 0 : i32
    %c0_i32_1 = arith.constant 0 : i32
    return %c0_i32, %c0_i32_0 : i32, i32
  }
  func.func @transform_8(%arg0: i32) -> (i32, i32) {
    %c0_i32 = arith.constant 0 : i32
    %c0_i32_0 = arith.constant 0 : i32
    %c0_i32_1 = arith.constant 0 : i32
    return %c0_i32, %c0_i32_0 : i32, i32
  }
  func.func @transform_9(%arg0: i32) -> (i32, i32) {
    %c0_i32 = arith.constant 0 : i32
    %c0_i32_0 = arith.constant 0 : i32
    return %arg0, %c0_i32 : i32, i32
  }
}

</mosaic_0001>

<bundles_post_ra>
// kernel: cnn_forward.1
= control target key start
LH: loop header
LB: loop body
LE: loop exit
PB: predicated region body
PF: predicated region fallthrough
CT: control target
= control target key end

     0   :  { %14 = vsyncpa [#allocation3], 0  ;;  %s11519_s0 = inlined_call_operand.vmem [shape: f32[16,3072], index: 0, kind: input, shape index: {}]   ;;  %s11520_s1 = inlined_call_operand.hbm [shape: bf16[3072,512], index: 1, kind: input, shape index: {}]   ;;  %s11521_s2 = inlined_call_operand.hbm [shape: f32[1,512], index: 2, kind: input, shape index: {}]   ;;  %s11522_s3 = inlined_call_operand.hbm [shape: bf16[512,512], index: 3, kind: input, shape index: {}]   ;;  %s11523_s4 = inlined_call_operand.hbm [shape: f32[1,512], index: 4, kind: input, shape index: {}]   ;;  %s11524_s5 = inlined_call_operand.hbm [shape: bf16[512,512], index: 5, kind: input, shape index: {}]   ;;  %s11525_s6 = inlined_call_operand.hbm [shape: f32[1,512], index: 6, kind: input, shape index: {}]   ;;  %s11526_s7 = inlined_call_operand.vmem [shape: bf16[512,128], index: 7, kind: input, shape index: {}]   ;;  %s11527_s8 = inlined_call_operand.vmem [shape: f32[1,128], index: 8, kind: input, shape index: {}]   ;;  %s11528_s9 = inlined_call_operand.vmem [shape: f32[16,128], index: 9, kind: output, shape index: {}]  }
   0x1   :  { %15 = vsyncpa [#allocation5], 0 }
   0x2   :  { %16 = vsyncpa [#allocation8], 0 }
   0x3   :  { %17 = vsyncpa [#allocation11], 0  ;;  %s11103_s30 = smov [#allocation4]   ;;  %s11104_s11 = smov [#allocation7]  }
   0x4   :  { %s38_s10 = sshll.u32 %s11103_s30, 4  ;;  %s60_s12 = sshll.u32 %s11104_s11, 4  ;;  %s39_s10 = int_to_ptr.vmem [resolvable:$true] %s38_s10  ;;  %s61_s12 = int_to_ptr.vmem [resolvable:$true] %s60_s12 }
   0x5   :  { %s10963_s15 = scalar_lea.hbm %s11521_s2, 64 }
   0x6   :  { %p10964_p0 = scmp.ne.s32.totalorder %s11521_s2, %s10963_s15  ;;  %p10967_p1 = scmp.lt.u32.totalorder %s10963_s15, %s11521_s2 }
   0x8   :  { %p10969_p2 = pnand %p10967_p1, %p10964_p0 }
   0xa   :  { %10972 = shalt.err (!%p10969_p2)
}
   0xb   :  { %s10973_s20 = scalar_lea.vmem %s39_s10, 64  ;;  %p10978_p4 = scmp.lt.s32.totalorder %s39_s10, %s39_s10 }
   0xc   :  { %p10974_p3 = scmp.ne.s32.totalorder %s39_s10, %s10973_s20  ;;  %p10979_p5 = scmp.lt.s32.totalorder %s10973_s20, %s10973_s20 }
   0xe   :  { %p10980_p6 = por %p10979_p5, %p10978_p4 }
  0x10   :  { %p10981_p7 = pnand %p10980_p6, %p10974_p3 }
  0x12   :  { %10984 = shalt.err (!%p10981_p7)
}
  0x13   :  { %41 = dma.hbm_to_vmem [thread:$0]  %s11521_s2, 64, %s39_s10, [#allocation5]  }
  0x14   :  { %s10985_s25 = scalar_lea.hbm %s11523_s4, 64 }
  0x15   :  { %p10986_p8 = scmp.ne.s32.totalorder %s11523_s4, %s10985_s25  ;;  %p10989_p9 = scmp.lt.u32.totalorder %s10985_s25, %s11523_s4 }
  0x17   :  { %p10991_p10 = pnand %p10989_p9, %p10986_p8 }
  0x19   :  { %10994 = shalt.err (!%p10991_p10)
}
  0x1a   :  { %s10995_s30 = scalar_lea.vmem %s61_s12, 64  ;;  %p11000_p12 = scmp.lt.s32.totalorder %s61_s12, %s61_s12 }
  0x1b   :  { %p10996_p11 = scmp.ne.s32.totalorder %s61_s12, %s10995_s30  ;;  %p11001_p13 = scmp.lt.s32.totalorder %s10995_s30, %s10995_s30 }
  0x1d   :  { %p11002_p0 = por %p11001_p13, %p11000_p12 }
  0x1f   :  { %p11003_p1 = pnand %p11002_p0, %p10996_p11 }
  0x21   :  { %11006 = shalt.err (!%p11003_p1)
}
  0x22   :  { %63 = dma.hbm_to_vmem [thread:$0]  %s11523_s4, 64, %s61_s12, [#allocation8]  }
  0x23   :  { %s11105_s11 = smov [#allocation2]   ;;  %s11007_s16 = scalar_lea.hbm %s11520_s1, 98304 }
  0x24   :  { %s25_s13 = sshll.u32 %s11105_s11, 4  ;;  %p11008_p2 = scmp.ne.s32.totalorder %s11520_s1, %s11007_s16  ;;  %s26_s13 = int_to_ptr.vmem [resolvable:$true] %s25_s13 }
  0x25   :  { %p11011_p3 = scmp.lt.u32.totalorder %s11007_s16, %s11520_s1 }
  0x27   :  { %p11013_p4 = pnand %p11011_p3, %p11008_p2 }
  0x29   :  { %11016 = shalt.err (!%p11013_p4)
}
  0x2a   :  { %s11017_s21 = scalar_lea.vmem %s26_s13, 98304  ;;  %p11022_p6 = scmp.lt.s32.totalorder %s26_s13, %s26_s13 }
  0x2b   :  { %p11018_p5 = scmp.ne.s32.totalorder %s26_s13, %s11017_s21  ;;  %p11023_p7 = scmp.lt.s32.totalorder %s11017_s21, %s11017_s21 }
  0x2d   :  { %p11024_p8 = por %p11023_p7, %p11022_p6 }
  0x2f   :  { %p11025_p9 = pnand %p11024_p8, %p11018_p5 }
  0x31   :  { %11028 = shalt.err (!%p11025_p9)
}
  0x32   :  { %s11106_s4 = smov 256   ;;  %s11107_s12 = smov 16  }
  0x33   :  { %31 = dma.hbm_to_vmem [thread:$0]  %s11520_s1, 98304, %s26_s13, [#allocation3], %s11106_s4, %s11106_s4, %s11107_s12  }
  0x34   :  { %s11108_s24 = smov [#allocation6]   ;;  %s11109_s26 = smov [#allocation9]  }
  0x35   :  { %s47_s25 = sshll.u32 %s11108_s24, 4  ;;  %s69_s27 = sshll.u32 %s11109_s26, 4  ;;  %s48_s25 = int_to_ptr.vmem [resolvable:$true] %s47_s25  ;;  %s70_s27 = int_to_ptr.vmem [resolvable:$true] %s69_s27 }
  0x36   :  { %s11029_s30 = scalar_lea.hbm %s11522_s3, 16384 }
  0x37   :  { %p11030_p10 = scmp.ne.s32.totalorder %s11522_s3, %s11029_s30  ;;  %p11033_p11 = scmp.lt.u32.totalorder %s11029_s30, %s11522_s3 }
  0x39   :  { %p11035_p12 = pnand %p11033_p11, %p11030_p10 }
  0x3b   :  { %11038 = shalt.err (!%p11035_p12)
}
  0x3c   :  { %s11039_s1 = scalar_lea.vmem %s48_s25, 16384  ;;  %p11044_p0 = scmp.lt.s32.totalorder %s48_s25, %s48_s25 }
  0x3d   :  { %p11040_p13 = scmp.ne.s32.totalorder %s48_s25, %s11039_s1  ;;  %p11045_p1 = scmp.lt.s32.totalorder %s11039_s1, %s11039_s1 }
  0x3f   :  { %p11046_p2 = por %p11045_p1, %p11044_p0 }
  0x41   :  { %p11047_p3 = pnand %p11046_p2, %p11040_p13 }
  0x43   :  { %11050 = shalt.err (!%p11047_p3)
}
  0x44   :  { %53 = dma.hbm_to_vmem [thread:$0]  %s11522_s3, 16384, %s48_s25, [#allocation5], %s11106_s4, %s11106_s4, %s11107_s12  }
  0x45   :  { %s11051_s18 = scalar_lea.hbm %s11524_s5, 16384 }
  0x46   :  { %p11052_p4 = scmp.ne.s32.totalorder %s11524_s5, %s11051_s18  ;;  %p11055_p5 = scmp.lt.u32.totalorder %s11051_s18, %s11524_s5 }
  0x48   :  { %p11057_p6 = pnand %p11055_p5, %p11052_p4 }
  0x4a   :  { %11060 = shalt.err (!%p11057_p6)
}
  0x4b   :  { %s11061_s23 = scalar_lea.vmem %s70_s27, 16384  ;;  %p11066_p8 = scmp.lt.s32.totalorder %s70_s27, %s70_s27 }
  0x4c   :  { %p11062_p7 = scmp.ne.s32.totalorder %s70_s27, %s11061_s23  ;;  %p11067_p9 = scmp.lt.s32.totalorder %s11061_s23, %s11061_s23 }
  0x4e   :  { %p11068_p10 = por %p11067_p9, %p11066_p8 }
  0x50   :  { %p11069_p11 = pnand %p11068_p10, %p11062_p7 }
  0x52   :  { %11072 = shalt.err (!%p11069_p11)
}
  0x53   :  { %75 = dma.hbm_to_vmem [thread:$0]  %s11524_s5, 16384, %s70_s27, [#allocation8], %s11106_s4, %s11106_s4, %s11107_s12  }
  0x54   :  { %s11110_s25 = smov [#allocation10]   ;;  %s11073_s30 = scalar_lea.hbm %s11525_s6, 64 }
  0x55   :  { %s82_s26 = sshll.u32 %s11110_s25, 4  ;;  %p11074_p12 = scmp.ne.s32.totalorder %s11525_s6, %s11073_s30  ;;  %s83_s26 = int_to_ptr.vmem [resolvable:$true] %s82_s26 }
  0x56   :  { %p11077_p13 = scmp.lt.u32.totalorder %s11073_s30, %s11525_s6 }
  0x58   :  { %p11079_p0 = pnand %p11077_p13, %p11074_p12 }
  0x5a   :  { %11082 = shalt.err (!%p11079_p0)
}
  0x5b   :  { %s11083_s1 = scalar_lea.vmem %s83_s26, 64  ;;  %p11088_p2 = scmp.lt.s32.totalorder %s83_s26, %s83_s26 }
  0x5c   :  { %p11084_p1 = scmp.ne.s32.totalorder %s83_s26, %s11083_s1  ;;  %p11089_p3 = scmp.lt.s32.totalorder %s11083_s1, %s11083_s1 }
  0x5e   :  { %p11090_p4 = por %p11089_p3, %p11088_p2 }
  0x60   :  { %p11091_p5 = pnand %p11090_p4, %p11084_p1 }
  0x62   :  { %11094 = shalt.err (!%p11091_p5)
}
  0x63   :  { %85 = dma.hbm_to_vmem [thread:$0]  %s11525_s6, 64, %s83_s26, [#allocation11]  }
  0x64   :  { %11095 = dma.done.wait [#allocation3], 98304  }
  0x65   :  { %11096 = vsyncadd [#allocation3], 4294868992 }
  0x66   :  { %11097 = dma.done.wait [#allocation5], 16448  }
  0x67   :  { %11098 = vsyncadd [#allocation5], 4294950848 }
  0x68   :  { %11099 = dma.done.wait [#allocation8], 16448  }
  0x69   :  { %11100 = vsyncadd [#allocation8], 4294950848 }
  0x6a   :  { %11101 = dma.done.wait [#allocation11], 64  }
  0x6b   :  { %11102 = vsyncadd [#allocation11], 4294967232  ;;  %v9395_v0 = vld [vmem:[#allocation2 + $0x4] ss:$16 sps:$4 sm:$0xff]   ;;  %v9397_v1 = vld [vmem:[#allocation2 + $0xc] ss:$16 sps:$4 sm:$0xff]  }
  0x6c   :  { %4811 = vmatprep.subr.bf16.mxu0 %v9395_v0  ;;  %v9399_v2 = vld [vmem:[#allocation2] ss:$16 sps:$4 sm:$0xff]   ;;  %v9400_v3 = vld [vmem:[#allocation2 + $0x8] ss:$16 sps:$4 sm:$0xff]   ;;  %5327 = vmatprep.subr.bf16.mxu1 %v9397_v1  ;;  %v9401_v4 = vld [vmem:[#allocation2 + $0x24] ss:$16 sps:$4 sm:$0xff]  }
  0x6d   :  { %4812 = vmatpush1.bf16.msra.mxu0 %v9399_v2  ;;  %5328 = vmatpush1.bf16.msra.mxu1 %v9400_v3  ;;  %v9403_v5 = vld [vmem:[#allocation2 + $0x2c] ss:$16 sps:$4 sm:$0xff]   ;;  %v9405_v6 = vld [vmem:[#allocation2 + $0x20] ss:$16 sps:$4 sm:$0xff]   ;;  %v9406_v7 = vld [vmem:[#allocation2 + $0x28] ss:$16 sps:$4 sm:$0xff]  }
  0x6e   :  { %4813 = vmatprep.subr.bf16.mxu0 %v9401_v4  ;;  %5329 = vmatprep.subr.bf16.mxu1 %v9403_v5  ;;  %v9407_v8 = vld [vmem:[#allocation2 + $0x44] ss:$16 sps:$4 sm:$0xff]   ;;  %v9409_v9 = vld [vmem:[#allocation2 + $0x4c] ss:$16 sps:$4 sm:$0xff]   ;;  %v9411_v10 = vld [vmem:[#allocation2 + $0x40] ss:$16 sps:$4 sm:$0xff]  }
  0x6f   :  { %v9412_v11 = vld [vmem:[#allocation2 + $0x48] ss:$16 sps:$4 sm:$0xff]   ;;  %v9413_v12 = vld [vmem:[#allocation2 + $0x64] ss:$16 sps:$4 sm:$0xff]   ;;  %v9415_v13 = vld [vmem:[#allocation2 + $0x6c] ss:$16 sps:$4 sm:$0xff]  }
  0x70   :  { %v9417_v14 = vld [vmem:[#allocation2 + $0x60] ss:$16 sps:$4 sm:$0xff]   ;;  %v9418_v15 = vld [vmem:[#allocation2 + $0x68] ss:$16 sps:$4 sm:$0xff]   ;;  %v9419_v16 = vld [vmem:[#allocation2 + $0x84] ss:$16 sps:$4 sm:$0xff]  }
  0x71   :  { %4814 = vmatpush1.bf16.msra.mxu0 %v9405_v6  ;;  %5330 = vmatpush1.bf16.msra.mxu1 %v9406_v7  ;;  %v9421_v17 = vld [vmem:[#allocation2 + $0x8c] ss:$16 sps:$4 sm:$0xff]   ;;  %v9423_v18 = vld [vmem:[#allocation2 + $0x80] ss:$16 sps:$4 sm:$0xff]   ;;  %v9424_v19 = vld [vmem:[#allocation2 + $0x88] ss:$16 sps:$4 sm:$0xff]  }
  0x72   :  { %4815 = vmatprep.subr.bf16.mxu0 %v9407_v8  ;;  %5331 = vmatprep.subr.bf16.mxu1 %v9409_v9  ;;  %v9425_v20 = vld [vmem:[#allocation2 + $0xa4] ss:$16 sps:$4 sm:$0xff]   ;;  %v9427_v21 = vld [vmem:[#allocation2 + $0xac] ss:$16 sps:$4 sm:$0xff]   ;;  %v9429_v22 = vld [vmem:[#allocation2 + $0xa0] ss:$16 sps:$4 sm:$0xff]  }
  0x73   :  { %v9430_v23 = vld [vmem:[#allocation2 + $0xa8] ss:$16 sps:$4 sm:$0xff]   ;;  %v9431_v24 = vld [vmem:[#allocation2 + $0xc4] ss:$16 sps:$4 sm:$0xff]   ;;  %v9433_v25 = vld [vmem:[#allocation2 + $0xcc] ss:$16 sps:$4 sm:$0xff]  }
  0x74   :  { %v9435_v26 = vld [vmem:[#allocation2 + $0xc0] ss:$16 sps:$4 sm:$0xff]   ;;  %v9436_v27 = vld [vmem:[#allocation2 + $0xc8] ss:$16 sps:$4 sm:$0xff]   ;;  %v9437_v28 = vld [vmem:[#allocation2 + $0xe4] ss:$16 sps:$4 sm:$0xff]  }
  0x75   :  { %4816 = vmatpush1.bf16.msra.mxu0 %v9411_v10  ;;  %5332 = vmatpush1.bf16.msra.mxu1 %v9412_v11  ;;  %v9439_v29 = vld [vmem:[#allocation2 + $0xec] ss:$16 sps:$4 sm:$0xff]   ;;  %v9441_v30 = vld [vmem:[#allocation2 + $0xe0] ss:$16 sps:$4 sm:$0xff]   ;;  %v9442_v31 = vld [vmem:[#allocation2 + $0xe8] ss:$16 sps:$4 sm:$0xff]  }
  0x76   :  { %4817 = vmatprep.subr.bf16.mxu0 %v9413_v12  ;;  %5333 = vmatprep.subr.bf16.mxu1 %v9415_v13  ;;  %v9443_v32 = vld [vmem:[#allocation2 + $0x104] ss:$16 sps:$4 sm:$0xff]   ;;  %v9445_v33 = vld [vmem:[#allocation2 + $0x10c] ss:$16 sps:$4 sm:$0xff]   ;;  %v9447_v34 = vld [vmem:[#allocation2 + $0x100] ss:$16 sps:$4 sm:$0xff]  }
  0x77   :  { %v9448_v35 = vld [vmem:[#allocation2 + $0x108] ss:$16 sps:$4 sm:$0xff]   ;;  %v9449_v36 = vld [vmem:[#allocation2 + $0x124] ss:$16 sps:$4 sm:$0xff]   ;;  %v9451_v37 = vld [vmem:[#allocation2 + $0x12c] ss:$16 sps:$4 sm:$0xff]  }
  0x78   :  { %v9453_v38 = vld [vmem:[#allocation2 + $0x120] ss:$16 sps:$4 sm:$0xff]   ;;  %v9454_v39 = vld [vmem:[#allocation2 + $0x128] ss:$16 sps:$4 sm:$0xff]   ;;  %v9455_v40 = vld [vmem:[#allocation2 + $0x144] ss:$16 sps:$4 sm:$0xff]  }
  0x79   :  { %4818 = vmatpush1.bf16.msra.mxu0 %v9417_v14  ;;  %5334 = vmatpush1.bf16.msra.mxu1 %v9418_v15  ;;  %v9457_v41 = vld [vmem:[#allocation2 + $0x14c] ss:$16 sps:$4 sm:$0xff]   ;;  %v9459_v42 = vld [vmem:[#allocation2 + $0x140] ss:$16 sps:$4 sm:$0xff]   ;;  %v9460_v43 = vld [vmem:[#allocation2 + $0x148] ss:$16 sps:$4 sm:$0xff]  }
  0x7a   :  { %4819 = vmatprep.subr.bf16.mxu0 %v9419_v16  ;;  %5335 = vmatprep.subr.bf16.mxu1 %v9421_v17  ;;  %v9461_v44 = vld [vmem:[#allocation2 + $0x164] ss:$16 sps:$4 sm:$0xff]   ;;  %v9463_v45 = vld [vmem:[#allocation2 + $0x16c] ss:$16 sps:$4 sm:$0xff]   ;;  %v9465_v48 = vld [vmem:[#allocation2 + $0x160] ss:$16 sps:$4 sm:$0xff]  }
  0x7b   :  { %v110_v46 = vld [vmem:[%s11519_s0 + $0x8] sm:$0xff]  ;;  %v9467_v51 = vld [vmem:[#allocation2 + $0x184] ss:$16 sps:$4 sm:$0xff]   ;;  %v9471_v53 = vld [vmem:[#allocation2 + $0x180] ss:$16 sps:$4 sm:$0xff]  }
  0x7c   :  { %v134_v47 = vld [vmem:[%s11519_s0 + $0xc8] sm:$0xff]  ;;  %v9473_v55 = vld [vmem:[#allocation2 + $0x1a4] ss:$16 sps:$4 sm:$0xff]   ;;  %v9477_v57 = vld [vmem:[#allocation2 + $0x1a0] ss:$16 sps:$4 sm:$0xff]  }
  0x7d   :  { %4820 = vmatpush1.bf16.msra.mxu0 %v9423_v18  ;;  %5336 = vmatpush1.bf16.msra.mxu1 %v9424_v19  ;;  %v9466_v49 = vld [vmem:[#allocation2 + $0x168] ss:$16 sps:$4 sm:$0xff]   ;;  %v158_v50 = vpack.c.bf16 %v134_v47, %v110_v46  ;;  %v9469_v52 = vld [vmem:[#allocation2 + $0x18c] ss:$16 sps:$4 sm:$0xff]   ;;  %v9479_v59 = vld [vmem:[#allocation2 + $0x1c4] ss:$16 sps:$4 sm:$0xff]  }
  0x7e   :  { %4821 = vmatprep.subr.bf16.mxu0 %v9425_v20  ;;  %5337 = vmatprep.subr.bf16.mxu1 %v9427_v21  ;;  %v9472_v54 = vld [vmem:[#allocation2 + $0x188] ss:$16 sps:$4 sm:$0xff]   ;;  %v9475_v56 = vld [vmem:[#allocation2 + $0x1ac] ss:$16 sps:$4 sm:$0xff]   ;;  %v9483_v61 = vld [vmem:[#allocation2 + $0x1c0] ss:$16 sps:$4 sm:$0xff]  }
  0x7f   :  { %4843 = vmatprep.mubr.bf16.mxu0 %v158_v50  ;;  %5359 = vmatprep.mubr.bf16.mxu1 %v158_v50  ;;  %v9478_v58 = vld [vmem:[#allocation2 + $0x1a8] ss:$16 sps:$4 sm:$0xff]   ;;  %v9481_v60 = vld [vmem:[#allocation2 + $0x1cc] ss:$16 sps:$4 sm:$0xff]   ;;  %v9485_v63 = vld [vmem:[#allocation2 + $0x1e4] ss:$16 sps:$4 sm:$0xff]  }
  0x80   :  { %v9484_v62 = vld [vmem:[#allocation2 + $0x1c8] ss:$16 sps:$4 sm:$0xff]   ;;  %v9487_v0 = vld [vmem:[#allocation2 + $0x1ec] ss:$16 sps:$4 sm:$0xff]   ;;  %v9489_v1 = vld [vmem:[#allocation2 + $0x1e0] ss:$16 sps:$4 sm:$0xff]  }
  0x81   :  { %4822 = vmatpush1.bf16.msra.mxu0 %v9429_v22  ;;  %5338 = vmatpush1.bf16.msra.mxu1 %v9430_v23  ;;  %v9490_v2 = vld [vmem:[#allocation2 + $0x1e8] ss:$16 sps:$4 sm:$0xff]   ;;  %v9493_v3 = vld [vmem:[#allocation2 + $0x204] ss:$16 sps:$4 sm:$0xff]   ;;  %v9496_v6 = vld [vmem:[#allocation2 + $0x20c] ss:$16 sps:$4 sm:$0xff]  }
  0x82   :  { %4823 = vmatprep.subr.bf16.mxu0 %v9431_v24  ;;  %5339 = vmatprep.subr.bf16.mxu1 %v9433_v25  ;;  %v109_v4 = vld [vmem:[%s11519_s0] sm:$0xff]  ;;  %v9494_v8 = vld [vmem:[#allocation2 + $0x208] ss:$16 sps:$4 sm:$0xff]   ;;  %v9502_v11 = vld [vmem:[#allocation2 + $0x22c] ss:$16 sps:$4 sm:$0xff]  }
  0x83   :  { %v133_v5 = vld [vmem:[%s11519_s0 + $0xc0] sm:$0xff]  ;;  %v9500_v13 = vld [vmem:[#allocation2 + $0x228] ss:$16 sps:$4 sm:$0xff]   ;;  %v9508_v15 = vld [vmem:[#allocation2 + $0x24c] ss:$16 sps:$4 sm:$0xff]  }
  0x84   :  { %v9491_v7 = vld [vmem:[#allocation2 + $0x200] ss:$16 sps:$4 sm:$0xff]   ;;  %v157_v9 = vpack.c.bf16 %v133_v5, %v109_v4  ;;  %v9499_v10 = vld [vmem:[#allocation2 + $0x224] ss:$16 sps:$4 sm:$0xff]   ;;  %v9506_v17 = vld [vmem:[#allocation2 + $0x248] ss:$16 sps:$4 sm:$0xff]  }
  0x85   :  { %4824 = vmatpush1.bf16.msra.mxu0 %v9435_v26  ;;  %5340 = vmatpush1.bf16.msra.mxu1 %v9436_v27  ;;  %v9497_v12 = vld [vmem:[#allocation2 + $0x220] ss:$16 sps:$4 sm:$0xff]   ;;  %v9505_v14 = vld [vmem:[#allocation2 + $0x244] ss:$16 sps:$4 sm:$0xff]   ;;  %v9514_v19 = vld [vmem:[#allocation2 + $0x26c] ss:$16 sps:$4 sm:$0xff]  }
  0x86   :  { %4825 = vmatprep.subr.bf16.mxu0 %v9437_v28  ;;  %5341 = vmatprep.subr.bf16.mxu1 %v9439_v29  ;;  %v9503_v16 = vld [vmem:[#allocation2 + $0x240] ss:$16 sps:$4 sm:$0xff]   ;;  %v9511_v18 = vld [vmem:[#allocation2 + $0x264] ss:$16 sps:$4 sm:$0xff]   ;;  %v9512_v21 = vld [vmem:[#allocation2 + $0x268] ss:$16 sps:$4 sm:$0xff]  }
  0x87   :  { %v9509_v20 = vld [vmem:[#allocation2 + $0x260] ss:$16 sps:$4 sm:$0xff]   ;;  %v9517_v22 = vld [vmem:[#allocation2 + $0x284] ss:$16 sps:$4 sm:$0xff]   ;;  %v9520_v23 = vld [vmem:[#allocation2 + $0x28c] ss:$16 sps:$4 sm:$0xff]  }
  0x88   :  { %v9515_v24 = vld [vmem:[#allocation2 + $0x280] ss:$16 sps:$4 sm:$0xff]   ;;  %v9518_v25 = vld [vmem:[#allocation2 + $0x288] ss:$16 sps:$4 sm:$0xff]   ;;  %v9523_v26 = vld [vmem:[#allocation2 + $0x2a4] ss:$16 sps:$4 sm:$0xff]  }
  0x89   :  { %4826 = vmatpush1.bf16.msra.mxu0 %v9441_v30  ;;  %5342 = vmatpush1.bf16.msra.mxu1 %v9442_v31  ;;  %v9526_v27 = vld [vmem:[#allocation2 + $0x2ac] ss:$16 sps:$4 sm:$0xff]   ;;  %v9521_v28 = vld [vmem:[#allocation2 + $0x2a0] ss:$16 sps:$4 sm:$0xff]   ;;  %v9524_v29 = vld [vmem:[#allocation2 + $0x2a8] ss:$16 sps:$4 sm:$0xff]  }
  0x8a   :  { %4827 = vmatprep.subr.bf16.mxu0 %v9443_v32  ;;  %5343 = vmatprep.subr.bf16.mxu1 %v9445_v33  ;;  %v9529_v30 = vld [vmem:[#allocation2 + $0x2c4] ss:$16 sps:$4 sm:$0xff]   ;;  %v9532_v31 = vld [vmem:[#allocation2 + $0x2cc] ss:$16 sps:$4 sm:$0xff]   ;;  %v9545_v47 = vld [vmem:[#allocation2 + $0x320] ss:$16 sps:$4 sm:$0xff]  }
  0x8b   :  { %v112_v32 = vld [vmem:[%s11519_s0 + $0x18] sm:$0xff]  ;;  %v9583_v5 = vld [vmem:[#allocation2 + $0x3e4] ss:$16 sps:$4 sm:$0xff]  }
  0x8c   :  { %v136_v33 = vld [vmem:[%s11519_s0 + $0xd8] sm:$0xff] }
  0x8d   :  { %4828 = vmatpush1.bf16.msra.mxu0 %v9447_v34  ;;  %5344 = vmatpush1.bf16.msra.mxu1 %v9448_v35  ;;  %v9527_v34 = vld [vmem:[#allocation2 + $0x2c0] ss:$16 sps:$4 sm:$0xff]   ;;  %v9530_v35 = vld [vmem:[#allocation2 + $0x2c8] ss:$16 sps:$4 sm:$0xff]   ;;  %v9550_v46 = vld [vmem:[#allocation2 + $0x32c] ss:$16 sps:$4 sm:$0xff]  }
  0x8e   :  { %4829 = vmatprep.subr.bf16.mxu0 %v9449_v36  ;;  %5345 = vmatprep.subr.bf16.mxu1 %v9451_v37  ;;  %v160_v36 = vpack.c.bf16 %v136_v33, %v112_v32  ;;  %v9535_v37 = vld [vmem:[#allocation2 + $0x2e4] ss:$16 sps:$4 sm:$0xff]   ;;  %v9556_v50 = vld [vmem:[#allocation2 + $0x34c] ss:$16 sps:$4 sm:$0xff]   ;;  %v9578_v4 = vld [vmem:[#allocation2 + $0x3c8] ss:$16 sps:$4 sm:$0xff]  }
  0x8f   :  { %v9616_v32 = vld [vmem:[#allocation2 + $0x48c] ss:$16 sps:$4 sm:$0xff]   ;;  %v9611_v33 = vld [vmem:[#allocation2 + $0x480] ss:$16 sps:$4 sm:$0xff]  }
  0x91   :  { %4830 = vmatpush1.bf16.msra.mxu0 %v9453_v38  ;;  %5346 = vmatpush1.bf16.msra.mxu1 %v9454_v39  ;;  %v9538_v38 = vld [vmem:[#allocation2 + $0x2ec] ss:$16 sps:$4 sm:$0xff]   ;;  %v9533_v39 = vld [vmem:[#allocation2 + $0x2e0] ss:$16 sps:$4 sm:$0xff]  }
  0x92   :  { %4831 = vmatprep.subr.bf16.mxu0 %v9455_v40  ;;  %5347 = vmatprep.subr.bf16.mxu1 %v9457_v41  ;;  %v9536_v40 = vld [vmem:[#allocation2 + $0x2e8] ss:$16 sps:$4 sm:$0xff]   ;;  %v9541_v41 = vld [vmem:[#allocation2 + $0x304] ss:$16 sps:$4 sm:$0xff]  }
  0x95   :  { %4832 = vmatpush1.bf16.msra.mxu0 %v9459_v42  ;;  %5348 = vmatpush1.bf16.msra.mxu1 %v9460_v43  ;;  %v9544_v42 = vld [vmem:[#allocation2 + $0x30c] ss:$16 sps:$4 sm:$0xff]   ;;  %v9539_v43 = vld [vmem:[#allocation2 + $0x300] ss:$16 sps:$4 sm:$0xff]  }
  0x96   :  { %4833 = vmatprep.subr.bf16.mxu0 %v9461_v44  ;;  %5349 = vmatprep.subr.bf16.mxu1 %v9463_v45  ;;  %v9542_v44 = vld [vmem:[#allocation2 + $0x308] ss:$16 sps:$4 sm:$0xff]   ;;  %v9547_v45 = vld [vmem:[#allocation2 + $0x324] ss:$16 sps:$4 sm:$0xff]  }
  0x99   :  { %4834 = vmatpush1.bf16.msra.mxu0 %v9465_v48  ;;  %5350 = vmatpush1.bf16.msra.mxu1 %v9466_v49  ;;  %v9548_v48 = vld [vmem:[#allocation2 + $0x328] ss:$16 sps:$4 sm:$0xff]   ;;  %v9553_v49 = vld [vmem:[#allocation2 + $0x344] ss:$16 sps:$4 sm:$0xff]  }
  0x9a   :  { %4835 = vmatprep.subr.bf16.mxu0 %v9467_v51  ;;  %5351 = vmatprep.subr.bf16.mxu1 %v9469_v52  ;;  %v9551_v51 = vld [vmem:[#allocation2 + $0x340] ss:$16 sps:$4 sm:$0xff]   ;;  %v9554_v52 = vld [vmem:[#allocation2 + $0x348] ss:$16 sps:$4 sm:$0xff]  }
  0x9d   :  { %4836 = vmatpush1.bf16.msra.mxu0 %v9471_v53  ;;  %5352 = vmatpush1.bf16.msra.mxu1 %v9472_v54  ;;  %v9559_v53 = vld [vmem:[#allocation2 + $0x364] ss:$16 sps:$4 sm:$0xff]   ;;  %v9562_v54 = vld [vmem:[#allocation2 + $0x36c] ss:$16 sps:$4 sm:$0xff]  }
  0x9e   :  { %4837 = vmatprep.subr.bf16.mxu0 %v9473_v55  ;;  %5353 = vmatprep.subr.bf16.mxu1 %v9475_v56  ;;  %v9557_v55 = vld [vmem:[#allocation2 + $0x360] ss:$16 sps:$4 sm:$0xff]   ;;  %v9560_v56 = vld [vmem:[#allocation2 + $0x368] ss:$16 sps:$4 sm:$0xff]  }
  0xa1   :  { %4838 = vmatpush1.bf16.msra.mxu0 %v9477_v57  ;;  %5354 = vmatpush1.bf16.msra.mxu1 %v9478_v58  ;;  %v9565_v57 = vld [vmem:[#allocation2 + $0x384] ss:$16 sps:$4 sm:$0xff]   ;;  %v9568_v58 = vld [vmem:[#allocation2 + $0x38c] ss:$16 sps:$4 sm:$0xff]  }
  0xa2   :  { %4839 = vmatprep.subr.bf16.mxu0 %v9479_v59  ;;  %5355 = vmatprep.subr.bf16.mxu1 %v9481_v60  ;;  %v9563_v59 = vld [vmem:[#allocation2 + $0x380] ss:$16 sps:$4 sm:$0xff]   ;;  %v9566_v60 = vld [vmem:[#allocation2 + $0x388] ss:$16 sps:$4 sm:$0xff]  }
  0xa5   :  { %4840 = vmatpush1.bf16.msra.mxu0 %v9483_v61  ;;  %5356 = vmatpush1.bf16.msra.mxu1 %v9484_v62  ;;  %v9571_v61 = vld [vmem:[#allocation2 + $0x3a4] ss:$16 sps:$4 sm:$0xff]   ;;  %v9574_v62 = vld [vmem:[#allocation2 + $0x3ac] ss:$16 sps:$4 sm:$0xff]  }
  0xa6   :  { %4841 = vmatprep.subr.bf16.mxu0 %v9485_v63  ;;  %5357 = vmatprep.subr.bf16.mxu1 %v9487_v0  ;;  %v9569_v63 = vld [vmem:[#allocation2 + $0x3a0] ss:$16 sps:$4 sm:$0xff]   ;;  %v9572_v0 = vld [vmem:[#allocation2 + $0x3a8] ss:$16 sps:$4 sm:$0xff]  }
  0xa9   :  { %4842 = vmatpush1.bf16.msra.mxu0 %v9489_v1  ;;  %5358 = vmatpush1.bf16.msra.mxu1 %v9490_v2  ;;  %v9577_v1 = vld [vmem:[#allocation2 + $0x3c4] ss:$16 sps:$4 sm:$0xff]   ;;  %v9580_v2 = vld [vmem:[#allocation2 + $0x3cc] ss:$16 sps:$4 sm:$0xff]  }
  0xaa   :  { %4854 = vmatprep.subr.bf16.mxu0 %v9493_v3  ;;  %5370 = vmatprep.subr.bf16.mxu1 %v9496_v6  ;;  %v9575_v3 = vld [vmem:[#allocation2 + $0x3c0] ss:$16 sps:$4 sm:$0xff]   ;;  %v9586_v6 = vld [vmem:[#allocation2 + $0x3ec] ss:$16 sps:$4 sm:$0xff]  }
  0xac   :  { %4844 = vmatmul.mubr.bf16.vlgmr.msra.gmra.mrb[0].mxu0 %v157_v9  ;;  %5360 = vmatmul.mubr.bf16.vlgmr.msra.gmra.mrb[0].mxu1 %v157_v9  ;;  %v9589_v9 = vld [vmem:[#allocation2 + $0x404] ss:$16 sps:$4 sm:$0xff]  }
  0xad   :  { %4855 = vmatpush1.bf16.msra.mxu0 %v9491_v7  ;;  %5371 = vmatpush1.bf16.msra.mxu1 %v9494_v8  ;;  %v9581_v7 = vld [vmem:[#allocation2 + $0x3e0] ss:$16 sps:$4 sm:$0xff]   ;;  %v9584_v8 = vld [vmem:[#allocation2 + $0x3e8] ss:$16 sps:$4 sm:$0xff]  }
  0xae   :  { %4856 = vmatprep.subr.bf16.mxu0 %v9499_v10  ;;  %5372 = vmatprep.subr.bf16.mxu1 %v9502_v11  ;;  %v111_v10 = vld [vmem:[%s11519_s0 + $0x10] sm:$0xff] }
  0xaf   :  { %4886 = vmatprep.mubr.bf16.mxu0 %v160_v36  ;;  %5402 = vmatprep.mubr.bf16.mxu1 %v160_v36  ;;  %v135_v11 = vld [vmem:[%s11519_s0 + $0xd0] sm:$0xff]  ;;  %v9622_v36 = vld [vmem:[#allocation2 + $0x4ac] ss:$16 sps:$4 sm:$0xff]  }
  0xb1   :  { %4857 = vmatpush1.bf16.msra.mxu0 %v9497_v12  ;;  %5373 = vmatpush1.bf16.msra.mxu1 %v9500_v13  ;;  %v9592_v12 = vld [vmem:[#allocation2 + $0x40c] ss:$16 sps:$4 sm:$0xff]   ;;  %v9587_v13 = vld [vmem:[#allocation2 + $0x400] ss:$16 sps:$4 sm:$0xff]  }
  0xb2   :  { %4858 = vmatprep.subr.bf16.mxu0 %v9505_v14  ;;  %5374 = vmatprep.subr.bf16.mxu1 %v9508_v15  ;;  %v9590_v14 = vld [vmem:[#allocation2 + $0x408] ss:$16 sps:$4 sm:$0xff]   ;;  %v159_v15 = vpack.c.bf16 %v135_v11, %v111_v10  ;;  %v9679_v11 = vld [vmem:[#allocation2 + $0x5e4] ss:$16 sps:$4 sm:$0xff]  }
  0xb3   :  { %v9674_v10 = vld [vmem:[#allocation2 + $0x5c8] ss:$16 sps:$4 sm:$0xff]  }
  0xb5   :  { %4859 = vmatpush1.bf16.msra.mxu0 %v9503_v16  ;;  %5375 = vmatpush1.bf16.msra.mxu1 %v9506_v17  ;;  %v9595_v16 = vld [vmem:[#allocation2 + $0x424] ss:$16 sps:$4 sm:$0xff]   ;;  %v9598_v17 = vld [vmem:[#allocation2 + $0x42c] ss:$16 sps:$4 sm:$0xff]  }
  0xb6   :  { %4860 = vmatprep.subr.bf16.mxu0 %v9511_v18  ;;  %5376 = vmatprep.subr.bf16.mxu1 %v9514_v19  ;;  %v114_v18 = vld [vmem:[%s11519_s0 + $0x28] sm:$0xff] }
  0xb7   :  { %v138_v19 = vld [vmem:[%s11519_s0 + $0xe8] sm:$0xff] }
  0xb9   :  { %4861 = vmatpush1.bf16.msra.mxu0 %v9509_v20  ;;  %5377 = vmatpush1.bf16.msra.mxu1 %v9512_v21  ;;  %v9593_v20 = vld [vmem:[#allocation2 + $0x420] ss:$16 sps:$4 sm:$0xff]   ;;  %v9596_v21 = vld [vmem:[#allocation2 + $0x428] ss:$16 sps:$4 sm:$0xff]  }
  0xba   :  { %4862 = vmatprep.subr.bf16.mxu0 %v9517_v22  ;;  %5378 = vmatprep.subr.bf16.mxu1 %v9520_v23  ;;  %v162_v22 = vpack.c.bf16 %v138_v19, %v114_v18  ;;  %v9601_v23 = vld [vmem:[#allocation2 + $0x444] ss:$16 sps:$4 sm:$0xff]   ;;  %v9688_v18 = vld [vmem:[#allocation2 + $0x60c] ss:$16 sps:$4 sm:$0xff]   ;;  %v9683_v19 = vld [vmem:[#allocation2 + $0x600] ss:$16 sps:$4 sm:$0xff]  }
  0xbd   :  { %4863 = vmatpush1.bf16.msra.mxu0 %v9515_v24  ;;  %5379 = vmatpush1.bf16.msra.mxu1 %v9518_v25  ;;  %v9604_v24 = vld [vmem:[#allocation2 + $0x44c] ss:$16 sps:$4 sm:$0xff]   ;;  %v9599_v25 = vld [vmem:[#allocation2 + $0x440] ss:$16 sps:$4 sm:$0xff]  }
  0xbe   :  { %4864 = vmatprep.subr.bf16.mxu0 %v9523_v26  ;;  %5380 = vmatprep.subr.bf16.mxu1 %v9526_v27  ;;  %v9602_v26 = vld [vmem:[#allocation2 + $0x448] ss:$16 sps:$4 sm:$0xff]   ;;  %v9607_v27 = vld [vmem:[#allocation2 + $0x464] ss:$16 sps:$4 sm:$0xff]  }
  0xc1   :  { %4865 = vmatpush1.bf16.msra.mxu0 %v9521_v28  ;;  %5381 = vmatpush1.bf16.msra.mxu1 %v9524_v29  ;;  %v9610_v28 = vld [vmem:[#allocation2 + $0x46c] ss:$16 sps:$4 sm:$0xff]   ;;  %v9605_v29 = vld [vmem:[#allocation2 + $0x460] ss:$16 sps:$4 sm:$0xff]  }
  0xc2   :  { %4866 = vmatprep.subr.bf16.mxu0 %v9529_v30  ;;  %5382 = vmatprep.subr.bf16.mxu1 %v9532_v31  ;;  %v9608_v30 = vld [vmem:[#allocation2 + $0x468] ss:$16 sps:$4 sm:$0xff]   ;;  %v9613_v31 = vld [vmem:[#allocation2 + $0x484] ss:$16 sps:$4 sm:$0xff]  }
  0xc5   :  { %4867 = vmatpush1.bf16.msra.mxu0 %v9527_v34  ;;  %5383 = vmatpush1.bf16.msra.mxu1 %v9530_v35  ;;  %v9614_v34 = vld [vmem:[#allocation2 + $0x488] ss:$16 sps:$4 sm:$0xff]   ;;  %v9619_v35 = vld [vmem:[#allocation2 + $0x4a4] ss:$16 sps:$4 sm:$0xff]  }
  0xc6   :  { %4868 = vmatprep.subr.bf16.mxu0 %v9535_v37  ;;  %5384 = vmatprep.subr.bf16.mxu1 %v9538_v38  ;;  %v9617_v37 = vld [vmem:[#allocation2 + $0x4a0] ss:$16 sps:$4 sm:$0xff]   ;;  %v9620_v38 = vld [vmem:[#allocation2 + $0x4a8] ss:$16 sps:$4 sm:$0xff]  }
  0xc9   :  { %4869 = vmatpush1.bf16.msra.mxu0 %v9533_v39  ;;  %5385 = vmatpush1.bf16.msra.mxu1 %v9536_v40  ;;  %v9625_v39 = vld [vmem:[#allocation2 + $0x4c4] ss:$16 sps:$4 sm:$0xff]   ;;  %v9628_v40 = vld [vmem:[#allocation2 + $0x4cc] ss:$16 sps:$4 sm:$0xff]  }
  0xca   :  { %4870 = vmatprep.subr.bf16.mxu0 %v9541_v41  ;;  %5386 = vmatprep.subr.bf16.mxu1 %v9544_v42  ;;  %v9623_v41 = vld [vmem:[#allocation2 + $0x4c0] ss:$16 sps:$4 sm:$0xff]   ;;  %v9626_v42 = vld [vmem:[#allocation2 + $0x4c8] ss:$16 sps:$4 sm:$0xff]  }
  0xcd   :  { %4871 = vmatpush1.bf16.msra.mxu0 %v9539_v43  ;;  %5387 = vmatpush1.bf16.msra.mxu1 %v9542_v44  ;;  %v9631_v43 = vld [vmem:[#allocation2 + $0x4e4] ss:$16 sps:$4 sm:$0xff]   ;;  %v9634_v44 = vld [vmem:[#allocation2 + $0x4ec] ss:$16 sps:$4 sm:$0xff]  }
  0xce   :  { %4872 = vmatprep.subr.bf16.mxu0 %v9547_v45  ;;  %5388 = vmatprep.subr.bf16.mxu1 %v9550_v46  ;;  %v9629_v45 = vld [vmem:[#allocation2 + $0x4e0] ss:$16 sps:$4 sm:$0xff]   ;;  %v9632_v46 = vld [vmem:[#allocation2 + $0x4e8] ss:$16 sps:$4 sm:$0xff]  }
  0xd1   :  { %4873 = vmatpush1.bf16.msra.mxu0 %v9545_v47  ;;  %5389 = vmatpush1.bf16.msra.mxu1 %v9548_v48  ;;  %v9637_v47 = vld [vmem:[#allocation2 + $0x504] ss:$16 sps:$4 sm:$0xff]   ;;  %v9640_v48 = vld [vmem:[#allocation2 + $0x50c] ss:$16 sps:$4 sm:$0xff]  }
  0xd2   :  { %4874 = vmatprep.subr.bf16.mxu0 %v9553_v49  ;;  %5390 = vmatprep.subr.bf16.mxu1 %v9556_v50  ;;  %v9635_v49 = vld [vmem:[#allocation2 + $0x500] ss:$16 sps:$4 sm:$0xff]   ;;  %v9638_v50 = vld [vmem:[#allocation2 + $0x508] ss:$16 sps:$4 sm:$0xff]  }
  0xd5   :  { %4875 = vmatpush1.bf16.msra.mxu0 %v9551_v51  ;;  %5391 = vmatpush1.bf16.msra.mxu1 %v9554_v52  ;;  %v9643_v51 = vld [vmem:[#allocation2 + $0x524] ss:$16 sps:$4 sm:$0xff]   ;;  %v9646_v52 = vld [vmem:[#allocation2 + $0x52c] ss:$16 sps:$4 sm:$0xff]  }
  0xd6   :  { %4876 = vmatprep.subr.bf16.mxu0 %v9559_v53  ;;  %5392 = vmatprep.subr.bf16.mxu1 %v9562_v54  ;;  %v9641_v53 = vld [vmem:[#allocation2 + $0x520] ss:$16 sps:$4 sm:$0xff]   ;;  %v9644_v54 = vld [vmem:[#allocation2 + $0x528] ss:$16 sps:$4 sm:$0xff]  }
  0xd9   :  { %4877 = vmatpush1.bf16.msra.mxu0 %v9557_v55  ;;  %5393 = vmatpush1.bf16.msra.mxu1 %v9560_v56  ;;  %v9649_v55 = vld [vmem:[#allocation2 + $0x544] ss:$16 sps:$4 sm:$0xff]   ;;  %v9652_v56 = vld [vmem:[#allocation2 + $0x54c] ss:$16 sps:$4 sm:$0xff]  }
  0xda   :  { %4878 = vmatprep.subr.bf16.mxu0 %v9565_v57  ;;  %5394 = vmatprep.subr.bf16.mxu1 %v9568_v58  ;;  %v9647_v57 = vld [vmem:[#allocation2 + $0x540] ss:$16 sps:$4 sm:$0xff]   ;;  %v9650_v58 = vld [vmem:[#allocation2 + $0x548] ss:$16 sps:$4 sm:$0xff]  }
  0xdd   :  { %4879 = vmatpush1.bf16.msra.mxu0 %v9563_v59  ;;  %5395 = vmatpush1.bf16.msra.mxu1 %v9566_v60  ;;  %v9655_v59 = vld [vmem:[#allocation2 + $0x564] ss:$16 sps:$4 sm:$0xff]   ;;  %v9658_v60 = vld [vmem:[#allocation2 + $0x56c] ss:$16 sps:$4 sm:$0xff]  }
  0xde   :  { %4880 = vmatprep.subr.bf16.mxu0 %v9571_v61  ;;  %5396 = vmatprep.subr.bf16.mxu1 %v9574_v62  ;;  %v9653_v61 = vld [vmem:[#allocation2 + $0x560] ss:$16 sps:$4 sm:$0xff]   ;;  %v9656_v62 = vld [vmem:[#allocation2 + $0x568] ss:$16 sps:$4 sm:$0xff]  }
  0xe1   :  { %4881 = vmatpush1.bf16.msra.mxu0 %v9569_v63  ;;  %5397 = vmatpush1.bf16.msra.mxu1 %v9572_v0  ;;  %v9661_v63 = vld [vmem:[#allocation2 + $0x584] ss:$16 sps:$4 sm:$0xff]   ;;  %v9664_v0 = vld [vmem:[#allocation2 + $0x58c] ss:$16 sps:$4 sm:$0xff]  }
  0xe2   :  { %4882 = vmatprep.subr.bf16.mxu0 %v9577_v1  ;;  %5398 = vmatprep.subr.bf16.mxu1 %v9580_v2  ;;  %v9659_v1 = vld [vmem:[#allocation2 + $0x580] ss:$16 sps:$4 sm:$0xff]   ;;  %v9662_v2 = vld [vmem:[#allocation2 + $0x588] ss:$16 sps:$4 sm:$0xff]  }
  0xe5   :  { %4883 = vmatpush1.bf16.msra.mxu0 %v9575_v3  ;;  %5399 = vmatpush1.bf16.msra.mxu1 %v9578_v4  ;;  %v9667_v3 = vld [vmem:[#allocation2 + $0x5a4] ss:$16 sps:$4 sm:$0xff]   ;;  %v9670_v4 = vld [vmem:[#allocation2 + $0x5ac] ss:$16 sps:$4 sm:$0xff]  }
  0xe6   :  { %4884 = vmatprep.subr.bf16.mxu0 %v9583_v5  ;;  %5400 = vmatprep.subr.bf16.mxu1 %v9586_v6  ;;  %v9665_v5 = vld [vmem:[#allocation2 + $0x5a0] ss:$16 sps:$4 sm:$0xff]   ;;  %v9668_v6 = vld [vmem:[#allocation2 + $0x5a8] ss:$16 sps:$4 sm:$0xff]  }
  0xe9   :  { %4885 = vmatpush1.bf16.msra.mxu0 %v9581_v7  ;;  %5401 = vmatpush1.bf16.msra.mxu1 %v9584_v8  ;;  %v9673_v7 = vld [vmem:[#allocation2 + $0x5c4] ss:$16 sps:$4 sm:$0xff]   ;;  %v9676_v8 = vld [vmem:[#allocation2 + $0x5cc] ss:$16 sps:$4 sm:$0xff]  }
  0xea   :  { %4897 = vmatprep.subr.bf16.mxu0 %v9589_v9  ;;  %5413 = vmatprep.subr.bf16.mxu1 %v9592_v12  ;;  %v9671_v9 = vld [vmem:[#allocation2 + $0x5c0] ss:$16 sps:$4 sm:$0xff]   ;;  %v9682_v12 = vld [vmem:[#allocation2 + $0x5ec] ss:$16 sps:$4 sm:$0xff]  }
  0xec   :  { %4887 = vmatmul.mubr.bf16.vlgmr.msra.gmra.mrb[0].mxu0 %v159_v15  ;;  %5403 = vmatmul.mubr.bf16.vlgmr.msra.gmra.mrb[0].mxu1 %v159_v15  ;;  %v9685_v15 = vld [vmem:[#allocation2 + $0x604] ss:$16 sps:$4 sm:$0xff]  }
  0xed   :  { %4898 = vmatpush1.bf16.msra.mxu0 %v9587_v13  ;;  %5414 = vmatpush1.bf16.msra.mxu1 %v9590_v14  ;;  %v9677_v13 = vld [vmem:[#allocation2 + $0x5e0] ss:$16 sps:$4 sm:$0xff]   ;;  %v9680_v14 = vld [vmem:[#allocation2 + $0x5e8] ss:$16 sps:$4 sm:$0xff]  }
  0xee   :  { %4899 = vmatprep.subr.bf16.mxu0 %v9595_v16  ;;  %5415 = vmatprep.subr.bf16.mxu1 %v9598_v17  ;;  %v113_v16 = vld [vmem:[%s11519_s0 + $0x20] sm:$0xff] }
  0xef   :  { %4929 = vmatprep.mubr.bf16.mxu0 %v162_v22  ;;  %5445 = vmatprep.mubr.bf16.mxu1 %v162_v22  ;;  %v137_v17 = vld [vmem:[%s11519_s0 + $0xe0] sm:$0xff]  ;;  %v116_v22 = vld [vmem:[%s11519_s0 + $0x38] sm:$0xff] }
  0xf1   :  { %4900 = vmatpush1.bf16.msra.mxu0 %v9593_v20  ;;  %5416 = vmatpush1.bf16.msra.mxu1 %v9596_v21  ;;  %v9686_v20 = vld [vmem:[#allocation2 + $0x608] ss:$16 sps:$4 sm:$0xff]   ;;  %v161_v21 = vpack.c.bf16 %v137_v17, %v113_v16  ;;  %v9775_v17 = vld [vmem:[#allocation2 + $0x7e4] ss:$16 sps:$4 sm:$0xff]  }
  0xf2   :  { %4901 = vmatprep.subr.bf16.mxu0 %v9601_v23  ;;  %5417 = vmatprep.subr.bf16.mxu1 %v9604_v24  ;;  %v140_v23 = vld [vmem:[%s11519_s0 + $0xf8] sm:$0xff]  ;;  %v9691_v24 = vld [vmem:[#allocation2 + $0x624] ss:$16 sps:$4 sm:$0xff]  }
  0xf3   :  { %v9770_v16 = vld [vmem:[#allocation2 + $0x7c8] ss:$16 sps:$4 sm:$0xff]  }
  0xf5   :  { %4902 = vmatpush1.bf16.msra.mxu0 %v9599_v25  ;;  %5418 = vmatpush1.bf16.msra.mxu1 %v9602_v26  ;;  %v9694_v25 = vld [vmem:[#allocation2 + $0x62c] ss:$16 sps:$4 sm:$0xff]   ;;  %v164_v26 = vpack.c.bf16 %v140_v23, %v116_v22  ;;  %v115_v22 = vld [vmem:[%s11519_s0 + $0x30] sm:$0xff] }
  0xf6   :  { %4903 = vmatprep.subr.bf16.mxu0 %v9607_v27  ;;  %5419 = vmatprep.subr.bf16.mxu1 %v9610_v28  ;;  %v9689_v27 = vld [vmem:[#allocation2 + $0x620] ss:$16 sps:$4 sm:$0xff]   ;;  %v9692_v28 = vld [vmem:[#allocation2 + $0x628] ss:$16 sps:$4 sm:$0xff]  }
  0xf7   :  { %v139_v23 = vld [vmem:[%s11519_s0 + $0xf0] sm:$0xff] }
  0xf9   :  { %4904 = vmatpush1.bf16.msra.mxu0 %v9605_v29  ;;  %5420 = vmatpush1.bf16.msra.mxu1 %v9608_v30  ;;  %v9697_v29 = vld [vmem:[#allocation2 + $0x644] ss:$16 sps:$4 sm:$0xff]   ;;  %v9700_v30 = vld [vmem:[#allocation2 + $0x64c] ss:$16 sps:$4 sm:$0xff]  }
  0xfa   :  { %4905 = vmatprep.subr.bf16.mxu0 %v9613_v31  ;;  %5421 = vmatprep.subr.bf16.mxu1 %v9616_v32  ;;  %v9695_v31 = vld [vmem:[#allocation2 + $0x640] ss:$16 sps:$4 sm:$0xff]   ;;  %v9698_v32 = vld [vmem:[#allocation2 + $0x648] ss:$16 sps:$4 sm:$0xff]  }
  0xfd   :  { %4906 = vmatpush1.bf16.msra.mxu0 %v9611_v33  ;;  %5422 = vmatpush1.bf16.msra.mxu1 %v9614_v34  ;;  %v9703_v33 = vld [vmem:[#allocation2 + $0x664] ss:$16 sps:$4 sm:$0xff]   ;;  %v9706_v34 = vld [vmem:[#allocation2 + $0x66c] ss:$16 sps:$4 sm:$0xff]  }
  0xfe   :  { %4907 = vmatprep.subr.bf16.mxu0 %v9619_v35  ;;  %5423 = vmatprep.subr.bf16.mxu1 %v9622_v36  ;;  %v9701_v35 = vld [vmem:[#allocation2 + $0x660] ss:$16 sps:$4 sm:$0xff]   ;;  %v9704_v36 = vld [vmem:[#allocation2 + $0x668] ss:$16 sps:$4 sm:$0xff]  }
 0x101   :  { %4908 = vmatpush1.bf16.msra.mxu0 %v9617_v37  ;;  %5424 = vmatpush1.bf16.msra.mxu1 %v9620_v38  ;;  %v9709_v37 = vld [vmem:[#allocation2 + $0x684] ss:$16 sps:$4 sm:$0xff]   ;;  %v9712_v38 = vld [vmem:[#allocation2 + $0x68c] ss:$16 sps:$4 sm:$0xff]  }
 0x102   :  { %4909 = vmatprep.subr.bf16.mxu0 %v9625_v39  ;;  %5425 = vmatprep.subr.bf16.mxu1 %v9628_v40  ;;  %v9707_v39 = vld [vmem:[#allocation2 + $0x680] ss:$16 sps:$4 sm:$0xff]   ;;  %v9710_v40 = vld [vmem:[#allocation2 + $0x688] ss:$16 sps:$4 sm:$0xff]  }
 0x105   :  { %4910 = vmatpush1.bf16.msra.mxu0 %v9623_v41  ;;  %5426 = vmatpush1.bf16.msra.mxu1 %v9626_v42  ;;  %v9715_v41 = vld [vmem:[#allocation2 + $0x6a4] ss:$16 sps:$4 sm:$0xff]   ;;  %v9718_v42 = vld [vmem:[#allocation2 + $0x6ac] ss:$16 sps:$4 sm:$0xff]  }
 0x106   :  { %4911 = vmatprep.subr.bf16.mxu0 %v9631_v43  ;;  %5427 = vmatprep.subr.bf16.mxu1 %v9634_v44  ;;  %v9713_v43 = vld [vmem:[#allocation2 + $0x6a0] ss:$16 sps:$4 sm:$0xff]   ;;  %v9716_v44 = vld [vmem:[#allocation2 + $0x6a8] ss:$16 sps:$4 sm:$0xff]  }
 0x109   :  { %4912 = vmatpush1.bf16.msra.mxu0 %v9629_v45  ;;  %5428 = vmatpush1.bf16.msra.mxu1 %v9632_v46  ;;  %v9721_v45 = vld [vmem:[#allocation2 + $0x6c4] ss:$16 sps:$4 sm:$0xff]   ;;  %v9724_v46 = vld [vmem:[#allocation2 + $0x6cc] ss:$16 sps:$4 sm:$0xff]  }
 0x10a   :  { %4913 = vmatprep.subr.bf16.mxu0 %v9637_v47  ;;  %5429 = vmatprep.subr.bf16.mxu1 %v9640_v48  ;;  %v9719_v47 = vld [vmem:[#allocation2 + $0x6c0] ss:$16 sps:$4 sm:$0xff]   ;;  %v9722_v48 = vld [vmem:[#allocation2 + $0x6c8] ss:$16 sps:$4 sm:$0xff]  }
 0x10d   :  { %4914 = vmatpush1.bf16.msra.mxu0 %v9635_v49  ;;  %5430 = vmatpush1.bf16.msra.mxu1 %v9638_v50  ;;  %v9727_v49 = vld [vmem:[#allocation2 + $0x6e4] ss:$16 sps:$4 sm:$0xff]   ;;  %v9730_v50 = vld [vmem:[#allocation2 + $0x6ec] ss:$16 sps:$4 sm:$0xff]  }
 0x10e   :  { %4915 = vmatprep.subr.bf16.mxu0 %v9643_v51  ;;  %5431 = vmatprep.subr.bf16.mxu1 %v9646_v52  ;;  %v9725_v51 = vld [vmem:[#allocation2 + $0x6e0] ss:$16 sps:$4 sm:$0xff]   ;;  %v9728_v52 = vld [vmem:[#allocation2 + $0x6e8] ss:$16 sps:$4 sm:$0xff]  }
 0x111   :  { %4916 = vmatpush1.bf16.msra.mxu0 %v9641_v53  ;;  %5432 = vmatpush1.bf16.msra.mxu1 %v9644_v54  ;;  %v9733_v53 = vld [vmem:[#allocation2 + $0x704] ss:$16 sps:$4 sm:$0xff]   ;;  %v9736_v54 = vld [vmem:[#allocation2 + $0x70c] ss:$16 sps:$4 sm:$0xff]  }
 0x112   :  { %4917 = vmatprep.subr.bf16.mxu0 %v9649_v55  ;;  %5433 = vmatprep.subr.bf16.mxu1 %v9652_v56  ;;  %v9731_v55 = vld [vmem:[#allocation2 + $0x700] ss:$16 sps:$4 sm:$0xff]   ;;  %v9734_v56 = vld [vmem:[#allocation2 + $0x708] ss:$16 sps:$4 sm:$0xff]  }
 0x115   :  { %4918 = vmatpush1.bf16.msra.mxu0 %v9647_v57  ;;  %5434 = vmatpush1.bf16.msra.mxu1 %v9650_v58  ;;  %v9739_v57 = vld [vmem:[#allocation2 + $0x724] ss:$16 sps:$4 sm:$0xff]   ;;  %v9742_v58 = vld [vmem:[#allocation2 + $0x72c] ss:$16 sps:$4 sm:$0xff]  }
 0x116   :  { %4919 = vmatprep.subr.bf16.mxu0 %v9655_v59  ;;  %5435 = vmatprep.subr.bf16.mxu1 %v9658_v60  ;;  %v9737_v59 = vld [vmem:[#allocation2 + $0x720] ss:$16 sps:$4 sm:$0xff]   ;;  %v9740_v60 = vld [vmem:[#allocation2 + $0x728] ss:$16 sps:$4 sm:$0xff]  }
 0x119   :  { %4920 = vmatpush1.bf16.msra.mxu0 %v9653_v61  ;;  %5436 = vmatpush1.bf16.msra.mxu1 %v9656_v62  ;;  %v9745_v61 = vld [vmem:[#allocation2 + $0x744] ss:$16 sps:$4 sm:$0xff]   ;;  %v9748_v62 = vld [vmem:[#allocation2 + $0x74c] ss:$16 sps:$4 sm:$0xff]  }
 0x11a   :  { %4921 = vmatprep.subr.bf16.mxu0 %v9661_v63  ;;  %5437 = vmatprep.subr.bf16.mxu1 %v9664_v0  ;;  %v9743_v63 = vld [vmem:[#allocation2 + $0x740] ss:$16 sps:$4 sm:$0xff]   ;;  %v9746_v0 = vld [vmem:[#allocation2 + $0x748] ss:$16 sps:$4 sm:$0xff]  }
 0x11d   :  { %4922 = vmatpush1.bf16.msra.mxu0 %v9659_v1  ;;  %5438 = vmatpush1.bf16.msra.mxu1 %v9662_v2  ;;  %v9751_v1 = vld [vmem:[#allocation2 + $0x764] ss:$16 sps:$4 sm:$0xff]   ;;  %v9754_v2 = vld [vmem:[#allocation2 + $0x76c] ss:$16 sps:$4 sm:$0xff]  }
 0x11e   :  { %4923 = vmatprep.subr.bf16.mxu0 %v9667_v3  ;;  %5439 = vmatprep.subr.bf16.mxu1 %v9670_v4  ;;  %v9749_v3 = vld [vmem:[#allocation2 + $0x760] ss:$16 sps:$4 sm:$0xff]   ;;  %v9752_v4 = vld [vmem:[#allocation2 + $0x768] ss:$16 sps:$4 sm:$0xff]  }
 0x121   :  { %4924 = vmatpush1.bf16.msra.mxu0 %v9665_v5  ;;  %5440 = vmatpush1.bf16.msra.mxu1 %v9668_v6  ;;  %v9757_v5 = vld [vmem:[#allocation2 + $0x784] ss:$16 sps:$4 sm:$0xff]   ;;  %v9760_v6 = vld [vmem:[#allocation2 + $0x78c] ss:$16 sps:$4 sm:$0xff]  }
 0x122   :  { %4925 = vmatprep.subr.bf16.mxu0 %v9673_v7  ;;  %5441 = vmatprep.subr.bf16.mxu1 %v9676_v8  ;;  %v9755_v7 = vld [vmem:[#allocation2 + $0x780] ss:$16 sps:$4 sm:$0xff]   ;;  %v9758_v8 = vld [vmem:[#allocation2 + $0x788] ss:$16 sps:$4 sm:$0xff]  }
 0x125   :  { %4926 = vmatpush1.bf16.msra.mxu0 %v9671_v9  ;;  %5442 = vmatpush1.bf16.msra.mxu1 %v9674_v10  ;;  %v9763_v9 = vld [vmem:[#allocation2 + $0x7a4] ss:$16 sps:$4 sm:$0xff]   ;;  %v9766_v10 = vld [vmem:[#allocation2 + $0x7ac] ss:$16 sps:$4 sm:$0xff]  }
 0x126   :  { %4927 = vmatprep.subr.bf16.mxu0 %v9679_v11  ;;  %5443 = vmatprep.subr.bf16.mxu1 %v9682_v12  ;;  %v9761_v11 = vld [vmem:[#allocation2 + $0x7a0] ss:$16 sps:$4 sm:$0xff]   ;;  %v9764_v12 = vld [vmem:[#allocation2 + $0x7a8] ss:$16 sps:$4 sm:$0xff]  }
 0x129   :  { %4928 = vmatpush1.bf16.msra.mxu0 %v9677_v13  ;;  %5444 = vmatpush1.bf16.msra.mxu1 %v9680_v14  ;;  %v9769_v13 = vld [vmem:[#allocation2 + $0x7c4] ss:$16 sps:$4 sm:$0xff]   ;;  %v9772_v14 = vld [vmem:[#allocation2 + $0x7cc] ss:$16 sps:$4 sm:$0xff]  }
 0x12a   :  { %4940 = vmatprep.subr.bf16.mxu0 %v9685_v15  ;;  %5456 = vmatprep.subr.bf16.mxu1 %v9688_v18  ;;  %v9767_v15 = vld [vmem:[#allocation2 + $0x7c0] ss:$16 sps:$4 sm:$0xff]   ;;  %v9778_v18 = vld [vmem:[#allocation2 + $0x7ec] ss:$16 sps:$4 sm:$0xff]  }
 0x12c   :  { %4930 = vmatmul.mubr.bf16.vlgmr.msra.gmra.mrb[0].mxu0 %v161_v21  ;;  %5446 = vmatmul.mubr.bf16.vlgmr.msra.gmra.mrb[0].mxu1 %v161_v21  ;;  %v9781_v21 = vld [vmem:[#allocation2 + $0x804] ss:$16 sps:$4 sm:$0xff]  }
 0x12d   :  { %4941 = vmatpush1.bf16.msra.mxu0 %v9683_v19  ;;  %5457 = vmatpush1.bf16.msra.mxu1 %v9686_v20  ;;  %v9773_v19 = vld [vmem:[#allocation2 + $0x7e0] ss:$16 sps:$4 sm:$0xff]   ;;  %v9776_v20 = vld [vmem:[#allocation2 + $0x7e8] ss:$16 sps:$4 sm:$0xff]  }
 0x12e   :  { %4942 = vmatprep.subr.bf16.mxu0 %v9691_v24  ;;  %5458 = vmatprep.subr.bf16.mxu1 %v9694_v25  ;;  %v9784_v24 = vld [vmem:[#allocation2 + $0x80c] ss:$16 sps:$4 sm:$0xff]   ;;  %v9779_v25 = vld [vmem:[#allocation2 + $0x800] ss:$16 sps:$4 sm:$0xff]  }
 0x12f   :  { %4972 = vmatprep.mubr.bf16.mxu0 %v164_v26  ;;  %5488 = vmatprep.mubr.bf16.mxu1 %v164_v26  ;;  %v9782_v26 = vld [vmem:[#allocation2 + $0x808] ss:$16 sps:$4 sm:$0xff]  }
 0x131   :  { %4943 = vmatpush1.bf16.msra.mxu0 %v9689_v27  ;;  %5459 = vmatpush1.bf16.msra.mxu1 %v9692_v28  ;;  %v163_v27 = vpack.c.bf16 %v139_v23, %v115_v22  ;;  %v118_v28 = vld [vmem:[%s11519_s0 + $0x48] sm:$0xff]  ;;  %v9871_v23 = vld [vmem:[#allocation2 + $0x9e4] ss:$16 sps:$4 sm:$0xff]  }
 0x132   :  { %4944 = vmatprep.subr.bf16.mxu0 %v9697_v29  ;;  %5460 = vmatprep.subr.bf16.mxu1 %v9700_v30  ;;  %v142_v29 = vld [vmem:[%s11519_s0 + $0x108] sm:$0xff]  ;;  %v9787_v30 = vld [vmem:[#allocation2 + $0x824] ss:$16 sps:$4 sm:$0xff]  }
 0x133   :  { %v9866_v22 = vld [vmem:[#allocation2 + $0x9c8] ss:$16 sps:$4 sm:$0xff]  }
 0x135   :  { %4945 = vmatpush1.bf16.msra.mxu0 %v9695_v31  ;;  %5461 = vmatpush1.bf16.msra.mxu1 %v9698_v32  ;;  %v9790_v31 = vld [vmem:[#allocation2 + $0x82c] ss:$16 sps:$4 sm:$0xff]   ;;  %v166_v32 = vpack.c.bf16 %v142_v29, %v118_v28  ;;  %v117_v29 = vld [vmem:[%s11519_s0 + $0x40] sm:$0xff] }
 0x136   :  { %4946 = vmatprep.subr.bf16.mxu0 %v9703_v33  ;;  %5462 = vmatprep.subr.bf16.mxu1 %v9706_v34  ;;  %v9785_v33 = vld [vmem:[#allocation2 + $0x820] ss:$16 sps:$4 sm:$0xff]   ;;  %v9788_v34 = vld [vmem:[#allocation2 + $0x828] ss:$16 sps:$4 sm:$0xff]   ;;  %v9880_v28 = vld [vmem:[#allocation2 + $0xa0c] ss:$16 sps:$4 sm:$0xff]  }
 0x139   :  { %4947 = vmatpush1.bf16.msra.mxu0 %v9701_v35  ;;  %5463 = vmatpush1.bf16.msra.mxu1 %v9704_v36  ;;  %v9793_v35 = vld [vmem:[#allocation2 + $0x844] ss:$16 sps:$4 sm:$0xff]   ;;  %v9796_v36 = vld [vmem:[#allocation2 + $0x84c] ss:$16 sps:$4 sm:$0xff]  }
 0x13a   :  { %4948 = vmatprep.subr.bf16.mxu0 %v9709_v37  ;;  %5464 = vmatprep.subr.bf16.mxu1 %v9712_v38  ;;  %v9791_v37 = vld [vmem:[#allocation2 + $0x840] ss:$16 sps:$4 sm:$0xff]   ;;  %v9794_v38 = vld [vmem:[#allocation2 + $0x848] ss:$16 sps:$4 sm:$0xff]  }
 0x13d   :  { %4949 = vmatpush1.bf16.msra.mxu0 %v9707_v39  ;;  %5465 = vmatpush1.bf16.msra.mxu1 %v9710_v40  ;;  %v9799_v39 = vld [vmem:[#allocation2 + $0x864] ss:$16 sps:$4 sm:$0xff]   ;;  %v9802_v40 = vld [vmem:[#allocation2 + $0x86c] ss:$16 sps:$4 sm:$0xff]  }
 0x13e   :  { %4950 = vmatprep.subr.bf16.mxu0 %v9715_v41  ;;  %5466 = vmatprep.subr.bf16.mxu1 %v9718_v42  ;;  %v9797_v41 = vld [vmem:[#allocation2 + $0x860] ss:$16 sps:$4 sm:$0xff]   ;;  %v9800_v42 = vld [vmem:[#allocation2 + $0x868] ss:$16 sps:$4 sm:$0xff]  }
 0x141   :  { %4951 = vmatpush1.bf16.msra.mxu0 %v9713_v43  ;;  %5467 = vmatpush1.bf16.msra.mxu1 %v9716_v44  ;;  %v9805_v43 = vld [vmem:[#allocation2 + $0x884] ss:$16 sps:$4 sm:$0xff]   ;;  %v9808_v44 = vld [vmem:[#allocation2 + $0x88c] ss:$16 sps:$4 sm:$0xff]  }
 0x142   :  { %4952 = vmatprep.subr.bf16.mxu0 %v9721_v45  ;;  %5468 = vmatprep.subr.bf16.mxu1 %v9724_v46  ;;  %v9803_v45 = vld [vmem:[#allocation2 + $0x880] ss:$16 sps:$4 sm:$0xff]   ;;  %v9806_v46 = vld [vmem:[#allocation2 + $0x888] ss:$16 sps:$4 sm:$0xff]  }
 0x145   :  { %4953 = vmatpush1.bf16.msra.mxu0 %v9719_v47  ;;  %5469 = vmatpush1.bf16.msra.mxu1 %v9722_v48  ;;  %v9811_v47 = vld [vmem:[#allocation2 + $0x8a4] ss:$16 sps:$4 sm:$0xff]   ;;  %v9814_v48 = vld [vmem:[#allocation2 + $0x8ac] ss:$16 sps:$4 sm:$0xff]  }
 0x146   :  { %4954 = vmatprep.subr.bf16.mxu0 %v9727_v49  ;;  %5470 = vmatprep.subr.bf16.mxu1 %v9730_v50  ;;  %v9809_v49 = vld [vmem:[#allocation2 + $0x8a0] ss:$16 sps:$4 sm:$0xff]   ;;  %v9812_v50 = vld [vmem:[#allocation2 + $0x8a8] ss:$16 sps:$4 sm:$0xff]  }
 0x149   :  { %4955 = vmatpush1.bf16.msra.mxu0 %v9725_v51  ;;  %5471 = vmatpush1.bf16.msra.mxu1 %v9728_v52  ;;  %v9817_v51 = vld [vmem:[#allocation2 + $0x8c4] ss:$16 sps:$4 sm:$0xff]   ;;  %v9820_v52 = vld [vmem:[#allocation2 + $0x8cc] ss:$16 sps:$4 sm:$0xff]  }
 0x14a   :  { %4956 = vmatprep.subr.bf16.mxu0 %v9733_v53  ;;  %5472 = vmatprep.subr.bf16.mxu1 %v9736_v54  ;;  %v9815_v53 = vld [vmem:[#allocation2 + $0x8c0] ss:$16 sps:$4 sm:$0xff]   ;;  %v9818_v54 = vld [vmem:[#allocation2 + $0x8c8] ss:$16 sps:$4 sm:$0xff]  }
 0x14d   :  { %4957 = vmatpush1.bf16.msra.mxu0 %v9731_v55  ;;  %5473 = vmatpush1.bf16.msra.mxu1 %v9734_v56  ;;  %v9823_v55 = vld [vmem:[#allocation2 + $0x8e4] ss:$16 sps:$4 sm:$0xff]   ;;  %v9826_v56 = vld [vmem:[#allocation2 + $0x8ec] ss:$16 sps:$4 sm:$0xff]  }
 0x14e   :  { %4958 = vmatprep.subr.bf16.mxu0 %v9739_v57  ;;  %5474 = vmatprep.subr.bf16.mxu1 %v9742_v58  ;;  %v9821_v57 = vld [vmem:[#allocation2 + $0x8e0] ss:$16 sps:$4 sm:$0xff]   ;;  %v9824_v58 = vld [vmem:[#allocation2 + $0x8e8] ss:$16 sps:$4 sm:$0xff]  }
 0x151   :  { %4959 = vmatpush1.bf16.msra.mxu0 %v9737_v59  ;;  %5475 = vmatpush1.bf16.msra.mxu1 %v9740_v60  ;;  %v9829_v59 = vld [vmem:[#allocation2 + $0x904] ss:$16 sps:$4 sm:$0xff]   ;;  %v9832_v60 = vld [vmem:[#allocation2 + $0x90c] ss:$16 sps:$4 sm:$0xff]  }
 0x152   :  { %4960 = vmatprep.subr.bf16.mxu0 %v9745_v61  ;;  %5476 = vmatprep.subr.bf16.mxu1 %v9748_v62  ;;  %v9827_v61 = vld [vmem:[#allocation2 + $0x900] ss:$16 sps:$4 sm:$0xff]   ;;  %v9830_v62 = vld [vmem:[#allocation2 + $0x908] ss:$16 sps:$4 sm:$0xff]  }
 0x155   :  { %4961 = vmatpush1.bf16.msra.mxu0 %v9743_v63  ;;  %5477 = vmatpush1.bf16.msra.mxu1 %v9746_v0  ;;  %v9835_v63 = vld [vmem:[#allocation2 + $0x924] ss:$16 sps:$4 sm:$0xff]   ;;  %v9838_v0 = vld [vmem:[#allocation2 + $0x92c] ss:$16 sps:$4 sm:$0xff]  }
 0x156   :  { %4962 = vmatprep.subr.bf16.mxu0 %v9751_v1  ;;  %5478 = vmatprep.subr.bf16.mxu1 %v9754_v2  ;;  %v9833_v1 = vld [vmem:[#allocation2 + $0x920] ss:$16 sps:$4 sm:$0xff]   ;;  %v9836_v2 = vld [vmem:[#allocation2 + $0x928] ss:$16 sps:$4 sm:$0xff]  }
 0x159   :  { %4963 = vmatpush1.bf16.msra.mxu0 %v9749_v3  ;;  %5479 = vmatpush1.bf16.msra.mxu1 %v9752_v4  ;;  %v9841_v3 = vld [vmem:[#allocation2 + $0x944] ss:$16 sps:$4 sm:$0xff]   ;;  %v9844_v4 = vld [vmem:[#allocation2 + $0x94c] ss:$16 sps:$4 sm:$0xff]  }
 0x15a   :  { %4964 = vmatprep.subr.bf16.mxu0 %v9757_v5  ;;  %5480 = vmatprep.subr.bf16.mxu1 %v9760_v6  ;;  %v9839_v5 = vld [vmem:[#allocation2 + $0x940] ss:$16 sps:$4 sm:$0xff]   ;;  %v9842_v6 = vld [vmem:[#allocation2 + $0x948] ss:$16 sps:$4 sm:$0xff]  }
 0x15d   :  { %4965 = vmatpush1.bf16.msra.mxu0 %v9755_v7  ;;  %5481 = vmatpush1.bf16.msra.mxu1 %v9758_v8  ;;  %v9847_v7 = vld [vmem:[#allocation2 + $0x964] ss:$16 sps:$4 sm:$0xff]   ;;  %v9850_v8 = vld [vmem:[#allocation2 + $0x96c] ss:$16 sps:$4 sm:$0xff]  }
 0x15e   :  { %4966 = vmatprep.subr.bf16.mxu0 %v9763_v9  ;;  %5482 = vmatprep.subr.bf16.mxu1 %v9766_v10  ;;  %v9845_v9 = vld [vmem:[#allocation2 + $0x960] ss:$16 sps:$4 sm:$0xff]   ;;  %v9848_v10 = vld [vmem:[#allocation2 + $0x968] ss:$16 sps:$4 sm:$0xff]  }
 0x161   :  { %4967 = vmatpush1.bf16.msra.mxu0 %v9761_v11  ;;  %5483 = vmatpush1.bf16.msra.mxu1 %v9764_v12  ;;  %v9853_v11 = vld [vmem:[#allocation2 + $0x984] ss:$16 sps:$4 sm:$0xff]   ;;  %v9856_v12 = vld [vmem:[#allocation2 + $0x98c] ss:$16 sps:$4 sm:$0xff]  }
 0x162   :  { %4968 = vmatprep.subr.bf16.mxu0 %v9769_v13  ;;  %5484 = vmatprep.subr.bf16.mxu1 %v9772_v14  ;;  %v9851_v13 = vld [vmem:[#allocation2 + $0x980] ss:$16 sps:$4 sm:$0xff]   ;;  %v9854_v14 = vld [vmem:[#allocation2 + $0x988] ss:$16 sps:$4 sm:$0xff]  }
 0x165   :  { %4969 = vmatpush1.bf16.msra.mxu0 %v9767_v15  ;;  %5485 = vmatpush1.bf16.msra.mxu1 %v9770_v16  ;;  %v9859_v15 = vld [vmem:[#allocation2 + $0x9a4] ss:$16 sps:$4 sm:$0xff]   ;;  %v9862_v16 = vld [vmem:[#allocation2 + $0x9ac] ss:$16 sps:$4 sm:$0xff]  }
 0x166   :  { %4970 = vmatprep.subr.bf16.mxu0 %v9775_v17  ;;  %5486 = vmatprep.subr.bf16.mxu1 %v9778_v18  ;;  %v9857_v17 = vld [vmem:[#allocation2 + $0x9a0] ss:$16 sps:$4 sm:$0xff]   ;;  %v9860_v18 = vld [vmem:[#allocation2 + $0x9a8] ss:$16 sps:$4 sm:$0xff]  }
 0x169   :  { %4971 = vmatpush1.bf16.msra.mxu0 %v9773_v19  ;;  %5487 = vmatpush1.bf16.msra.mxu1 %v9776_v20  ;;  %v9865_v19 = vld [vmem:[#allocation2 + $0x9c4] ss:$16 sps:$4 sm:$0xff]   ;;  %v9868_v20 = vld [vmem:[#allocation2 + $0x9cc] ss:$16 sps:$4 sm:$0xff]  }
 0x16a   :  { %4983 = vmatprep.subr.bf16.mxu0 %v9781_v21  ;;  %5499 = vmatprep.subr.bf16.mxu1 %v9784_v24  ;;  %v9863_v21 = vld [vmem:[#allocation2 + $0x9c0] ss:$16 sps:$4 sm:$0xff]   ;;  %v9874_v24 = vld [vmem:[#allocation2 + $0x9ec] ss:$16 sps:$4 sm:$0xff]  }
 0x16c   :  { %4973 = vmatmul.mubr.bf16.vlgmr.msra.gmra.mrb[0].mxu0 %v163_v27  ;;  %5489 = vmatmul.mubr.bf16.vlgmr.msra.gmra.mrb[0].mxu1 %v163_v27  ;;  %v9877_v27 = vld [vmem:[#allocation2 + $0xa04] ss:$16 sps:$4 sm:$0xff]  }
 0x16d   :  { %4984 = vmatpush1.bf16.msra.mxu0 %v9779_v25  ;;  %5500 = vmatpush1.bf16.msra.mxu1 %v9782_v26  ;;  %v9869_v25 = vld [vmem:[#allocation2 + $0x9e0] ss:$16 sps:$4 sm:$0xff]   ;;  %v9872_v26 = vld [vmem:[#allocation2 + $0x9e8] ss:$16 sps:$4 sm:$0xff]  }
 0x16e   :  { %4985 = vmatprep.subr.bf16.mxu0 %v9787_v30  ;;  %5501 = vmatprep.subr.bf16.mxu1 %v9790_v31  ;;  %v141_v30 = vld [vmem:[%s11519_s0 + $0x100] sm:$0xff]  ;;  %v120_v31 = vld [vmem:[%s11519_s0 + $0x58] sm:$0xff] }
 0x16f   :  { %5015 = vmatprep.mubr.bf16.mxu0 %v166_v32  ;;  %5531 = vmatprep.mubr.bf16.mxu1 %v166_v32  ;;  %v144_v32 = vld [vmem:[%s11519_s0 + $0x118] sm:$0xff] }
 0x171   :  { %4986 = vmatpush1.bf16.msra.mxu0 %v9785_v33  ;;  %5502 = vmatpush1.bf16.msra.mxu1 %v9788_v34  ;;  %v165_v33 = vpack.c.bf16 %v141_v30, %v117_v29  ;;  %v9875_v34 = vld [vmem:[#allocation2 + $0xa00] ss:$16 sps:$4 sm:$0xff]   ;;  %v9967_v29 = vld [vmem:[#allocation2 + $0xbe4] ss:$16 sps:$4 sm:$0xff]   ;;  %v9970_v30 = vld [vmem:[#allocation2 + $0xbec] ss:$16 sps:$4 sm:$0xff]  }
 0x172   :  { %4987 = vmatprep.subr.bf16.mxu0 %v9793_v35  ;;  %5503 = vmatprep.subr.bf16.mxu1 %v9796_v36  ;;  %v9878_v35 = vld [vmem:[#allocation2 + $0xa08] ss:$16 sps:$4 sm:$0xff]   ;;  %v9883_v36 = vld [vmem:[#allocation2 + $0xa24] ss:$16 sps:$4 sm:$0xff]  }
 0x175   :  { %4988 = vmatpush1.bf16.msra.mxu0 %v9791_v37  ;;  %5504 = vmatpush1.bf16.msra.mxu1 %v9794_v38  ;;  %v9886_v37 = vld [vmem:[#allocation2 + $0xa2c] ss:$16 sps:$4 sm:$0xff]   ;;  %v168_v38 = vpack.c.bf16 %v144_v32, %v120_v31  ;;  %v9965_v31 = vld [vmem:[#allocation2 + $0xbe0] ss:$16 sps:$4 sm:$0xff]   ;;  %v9968_v32 = vld [vmem:[#allocation2 + $0xbe8] ss:$16 sps:$4 sm:$0xff]  }
 0x176   :  { %4989 = vmatprep.subr.bf16.mxu0 %v9799_v39  ;;  %5505 = vmatprep.subr.bf16.mxu1 %v9802_v40  ;;  %v9881_v39 = vld [vmem:[#allocation2 + $0xa20] ss:$16 sps:$4 sm:$0xff]   ;;  %v9884_v40 = vld [vmem:[#allocation2 + $0xa28] ss:$16 sps:$4 sm:$0xff]  }
 0x179   :  { %4990 = vmatpush1.bf16.msra.mxu0 %v9797_v41  ;;  %5506 = vmatpush1.bf16.msra.mxu1 %v9800_v42  ;;  %v9889_v41 = vld [vmem:[#allocation2 + $0xa44] ss:$16 sps:$4 sm:$0xff]   ;;  %v9892_v42 = vld [vmem:[#allocation2 + $0xa4c] ss:$16 sps:$4 sm:$0xff]  }
 0x17a   :  { %4991 = vmatprep.subr.bf16.mxu0 %v9805_v43  ;;  %5507 = vmatprep.subr.bf16.mxu1 %v9808_v44  ;;  %v9887_v43 = vld [vmem:[#allocation2 + $0xa40] ss:$16 sps:$4 sm:$0xff]   ;;  %v9890_v44 = vld [vmem:[#allocation2 + $0xa48] ss:$16 sps:$4 sm:$0xff]  }
 0x17d   :  { %4992 = vmatpush1.bf16.msra.mxu0 %v9803_v45  ;;  %5508 = vmatpush1.bf16.msra.mxu1 %v9806_v46  ;;  %v9895_v45 = vld [vmem:[#allocation2 + $0xa64] ss:$16 sps:$4 sm:$0xff]   ;;  %v9898_v46 = vld [vmem:[#allocation2 + $0xa6c] ss:$16 sps:$4 sm:$0xff]  }
 0x17e   :  { %4993 = vmatprep.subr.bf16.mxu0 %v9811_v47  ;;  %5509 = vmatprep.subr.bf16.mxu1 %v9814_v48  ;;  %v9893_v47 = vld [vmem:[#allocation2 + $0xa60] ss:$16 sps:$4 sm:$0xff]   ;;  %v9896_v48 = vld [vmem:[#allocation2 + $0xa68] ss:$16 sps:$4 sm:$0xff]  }
 0x181   :  { %4994 = vmatpush1.bf16.msra.mxu0 %v9809_v49  ;;  %5510 = vmatpush1.bf16.msra.mxu1 %v9812_v50  ;;  %v9901_v49 = vld [vmem:[#allocation2 + $0xa84] ss:$16 sps:$4 sm:$0xff]   ;;  %v9904_v50 = vld [vmem:[#allocation2 + $0xa8c] ss:$16 sps:$4 sm:$0xff]  }
 0x182   :  { %4995 = vmatprep.subr.bf16.mxu0 %v9817_v51  ;;  %5511 = vmatprep.subr.bf16.mxu1 %v9820_v52  ;;  %v9899_v51 = vld [vmem:[#allocation2 + $0xa80] ss:$16 sps:$4 sm:$0xff]   ;;  %v9902_v52 = vld [vmem:[#allocation2 + $0xa88] ss:$16 sps:$4 sm:$0xff]  }
 0x185   :  { %4996 = vmatpush1.bf16.msra.mxu0 %v9815_v53  ;;  %5512 = vmatpush1.bf16.msra.mxu1 %v9818_v54  ;;  %v9907_v53 = vld [vmem:[#allocation2 + $0xaa4] ss:$16 sps:$4 sm:$0xff]   ;;  %v9910_v54 = vld [vmem:[#allocation2 + $0xaac] ss:$16 sps:$4 sm:$0xff]  }
 0x186   :  { %4997 = vmatprep.subr.bf16.mxu0 %v9823_v55  ;;  %5513 = vmatprep.subr.bf16.mxu1 %v9826_v56  ;;  %v9905_v55 = vld [vmem:[#allocation2 + $0xaa0] ss:$16 sps:$4 sm:$0xff]   ;;  %v9908_v56 = vld [vmem:[#allocation2 + $0xaa8] ss:$16 sps:$4 sm:$0xff]  }
 0x189   :  { %4998 = vmatpush1.bf16.msra.mxu0 %v9821_v57  ;;  %5514 = vmatpush1.bf16.msra.mxu1 %v9824_v58  ;;  %v9913_v57 = vld [vmem:[#allocation2 + $0xac4] ss:$16 sps:$4 sm:$0xff]   ;;  %v9916_v58 = vld [vmem:[#allocation2 + $0xacc] ss:$16 sps:$4 sm:$0xff]  }
 0x18a   :  { %4999 = vmatprep.subr.bf16.mxu0 %v9829_v59  ;;  %5515 = vmatprep.subr.bf16.mxu1 %v9832_v60  ;;  %v9911_v59 = vld [vmem:[#allocation2 + $0xac0] ss:$16 sps:$4 sm:$0xff]   ;;  %v9914_v60 = vld [vmem:[#allocation2 + $0xac8] ss:$16 sps:$4 sm:$0xff]  }
 0x18d   :  { %5000 = vmatpush1.bf16.msra.mxu0 %v9827_v61  ;;  %5516 = vmatpush1.bf16.msra.mxu1 %v9830_v62  ;;  %v9919_v61 = vld [vmem:[#allocation2 + $0xae4] ss:$16 sps:$4 sm:$0xff]   ;;  %v9922_v62 = vld [vmem:[#allocation2 + $0xaec] ss:$16 sps:$4 sm:$0xff]  }
 0x18e   :  { %5001 = vmatprep.subr.bf16.mxu0 %v9835_v63  ;;  %5517 = vmatprep.subr.bf16.mxu1 %v9838_v0  ;;  %v9917_v63 = vld [vmem:[#allocation2 + $0xae0] ss:$16 sps:$4 sm:$0xff]   ;;  %v9920_v0 = vld [vmem:[#allocation2 + $0xae8] ss:$16 sps:$4 sm:$0xff]  }
 0x191   :  { %5002 = vmatpush1.bf16.msra.mxu0 %v9833_v1  ;;  %5518 = vmatpush1.bf16.msra.mxu1 %v9836_v2  ;;  %v9925_v1 = vld [vmem:[#allocation2 + $0xb04] ss:$16 sps:$4 sm:$0xff]   ;;  %v9928_v2 = vld [vmem:[#allocation2 + $0xb0c] ss:$16 sps:$4 sm:$0xff]  }
 0x192   :  { %5003 = vmatprep.subr.bf16.mxu0 %v9841_v3  ;;  %5519 = vmatprep.subr.bf16.mxu1 %v9844_v4  ;;  %v9923_v3 = vld [vmem:[#allocation2 + $0xb00] ss:$16 sps:$4 sm:$0xff]   ;;  %v9926_v4 = vld [vmem:[#allocation2 + $0xb08] ss:$16 sps:$4 sm:$0xff]  }
 0x195   :  { %5004 = vmatpush1.bf16.msra.mxu0 %v9839_v5  ;;  %5520 = vmatpush1.bf16.msra.mxu1 %v9842_v6  ;;  %v9931_v5 = vld [vmem:[#allocation2 + $0xb24] ss:$16 sps:$4 sm:$0xff]   ;;  %v9934_v6 = vld [vmem:[#allocation2 + $0xb2c] ss:$16 sps:$4 sm:$0xff]  }
 0x196   :  { %5005 = vmatprep.subr.bf16.mxu0 %v9847_v7  ;;  %5521 = vmatprep.subr.bf16.mxu1 %v9850_v8  ;;  %v9929_v7 = vld [vmem:[#allocation2 + $0xb20] ss:$16 sps:$4 sm:$0xff]   ;;  %v9932_v8 = vld [vmem:[#allocation2 + $0xb28] ss:$16 sps:$4 sm:$0xff]  }
 0x199   :  { %5006 = vmatpush1.bf16.msra.mxu0 %v9845_v9  ;;  %5522 = vmatpush1.bf16.msra.mxu1 %v9848_v10  ;;  %v9937_v9 = vld [vmem:[#allocation2 + $0xb44] ss:$16 sps:$4 sm:$0xff]   ;;  %v9940_v10 = vld [vmem:[#allocation2 + $0xb4c] ss:$16 sps:$4 sm:$0xff]  }
 0x19a   :  { %5007 = vmatprep.subr.bf16.mxu0 %v9853_v11  ;;  %5523 = vmatprep.subr.bf16.mxu1 %v9856_v12  ;;  %v9935_v11 = vld [vmem:[#allocation2 + $0xb40] ss:$16 sps:$4 sm:$0xff]   ;;  %v9938_v12 = vld [vmem:[#allocation2 + $0xb48] ss:$16 sps:$4 sm:$0xff]  }
 0x19d   :  { %5008 = vmatpush1.bf16.msra.mxu0 %v9851_v13  ;;  %5524 = vmatpush1.bf16.msra.mxu1 %v9854_v14  ;;  %v9943_v13 = vld [vmem:[#allocation2 + $0xb64] ss:$16 sps:$4 sm:$0xff]   ;;  %v9946_v14 = vld [vmem:[#allocation2 + $0xb6c] ss:$16 sps:$4 sm:$0xff]  }
 0x19e   :  { %5009 = vmatprep.subr.bf16.mxu0 %v9859_v15  ;;  %5525 = vmatprep.subr.bf16.mxu1 %v9862_v16  ;;  %v9941_v15 = vld [vmem:[#allocation2 + $0xb60] ss:$16 sps:$4 sm:$0xff]   ;;  %v9944_v16 = vld [vmem:[#allocation2 + $0xb68] ss:$16 sps:$4 sm:$0xff]  }
 0x1a1   :  { %5010 = vmatpush1.bf16.msra.mxu0 %v9857_v17  ;;  %5526 = vmatpush1.bf16.msra.mxu1 %v9860_v18  ;;  %v9949_v17 = vld [vmem:[#allocation2 + $0xb84] ss:$16 sps:$4 sm:$0xff]   ;;  %v9952_v18 = vld [vmem:[#allocation2 + $0xb8c] ss:$16 sps:$4 sm:$0xff]  }
 0x1a2   :  { %5011 = vmatprep.subr.bf16.mxu0 %v9865_v19  ;;  %5527 = vmatprep.subr.bf16.mxu1 %v9868_v20  ;;  %v9947_v19 = vld [vmem:[#allocation2 + $0xb80] ss:$16 sps:$4 sm:$0xff]   ;;  %v9950_v20 = vld [vmem:[#allocation2 + $0xb88] ss:$16 sps:$4 sm:$0xff]  }
 0x1a5   :  { %5012 = vmatpush1.bf16.msra.mxu0 %v9863_v21  ;;  %5528 = vmatpush1.bf16.msra.mxu1 %v9866_v22  ;;  %v9955_v21 = vld [vmem:[#allocation2 + $0xba4] ss:$16 sps:$4 sm:$0xff]   ;;  %v9958_v22 = vld [vmem:[#allocation2 + $0xbac] ss:$16 sps:$4 sm:$0xff]  }
 0x1a6   :  { %5013 = vmatprep.subr.bf16.mxu0 %v9871_v23  ;;  %5529 = vmatprep.subr.bf16.mxu1 %v9874_v24  ;;  %v9953_v23 = vld [vmem:[#allocation2 + $0xba0] ss:$16 sps:$4 sm:$0xff]   ;;  %v9956_v24 = vld [vmem:[#allocation2 + $0xba8] ss:$16 sps:$4 sm:$0xff]  }
 0x1a9   :  { %5014 = vmatpush1.bf16.msra.mxu0 %v9869_v25  ;;  %5530 = vmatpush1.bf16.msra.mxu1 %v9872_v26  ;;  %v9961_v25 = vld [vmem:[#allocation2 + $0xbc4] ss:$16 sps:$4 sm:$0xff]   ;;  %v9964_v26 = vld [vmem:[#allocation2 + $0xbcc] ss:$16 sps:$4 sm:$0xff]  }
 0x1aa   :  { %5026 = vmatprep.subr.bf16.mxu0 %v9877_v27  ;;  %5542 = vmatprep.subr.bf16.mxu1 %v9880_v28  ;;  %v9959_v27 = vld [vmem:[#allocation2 + $0xbc0] ss:$16 sps:$4 sm:$0xff]   ;;  %v9962_v28 = vld [vmem:[#allocation2 + $0xbc8] ss:$16 sps:$4 sm:$0xff]  }
 0x1ac   :  { %5016 = vmatmul.mubr.bf16.vlgmr.msra.gmra.mrb[0].mxu0 %v165_v33  ;;  %5532 = vmatmul.mubr.bf16.vlgmr.msra.gmra.mrb[0].mxu1 %v165_v33  ;;  %v9973_v33 = vld [vmem:[#allocation2 + $0xc04] ss:$16 sps:$4 sm:$0xff]  }
 0x1ad   :  { %5027 = vmatpush1.bf16.msra.mxu0 %v9875_v34  ;;  %5543 = vmatpush1.bf16.msra.mxu1 %v9878_v35  ;;  %v9976_v34 = vld [vmem:[#allocation2 + $0xc0c] ss:$16 sps:$4 sm:$0xff]   ;;  %v119_v35 = vld [vmem:[%s11519_s0 + $0x50] sm:$0xff] }
 0x1ae   :  { %5028 = vmatprep.subr.bf16.mxu0 %v9883_v36  ;;  %5544 = vmatprep.subr.bf16.mxu1 %v9886_v37  ;;  %v143_v36 = vld [vmem:[%s11519_s0 + $0x110] sm:$0xff]  ;;  %v122_v37 = vld [vmem:[%s11519_s0 + $0x68] sm:$0xff] }
 0x1af   :  { %5058 = vmatprep.mubr.bf16.mxu0 %v168_v38  ;;  %5574 = vmatprep.mubr.bf16.mxu1 %v168_v38  ;;  %v146_v38 = vld [vmem:[%s11519_s0 + $0x128] sm:$0xff] }
 0x1b1   :  { %5029 = vmatpush1.bf16.msra.mxu0 %v9881_v39  ;;  %5545 = vmatpush1.bf16.msra.mxu1 %v9884_v40  ;;  %v167_v39 = vpack.c.bf16 %v143_v36, %v119_v35  ;;  %v9971_v40 = vld [vmem:[#allocation2 + $0xc00] ss:$16 sps:$4 sm:$0xff]   ;;  %v10063_v35 = vld [vmem:[#allocation2 + $0xde4] ss:$16 sps:$4 sm:$0xff]   ;;  %v10066_v36 = vld [vmem:[#allocation2 + $0xdec] ss:$16 sps:$4 sm:$0xff]  }
 0x1b2   :  { %5030 = vmatprep.subr.bf16.mxu0 %v9889_v41  ;;  %5546 = vmatprep.subr.bf16.mxu1 %v9892_v42  ;;  %v9974_v41 = vld [vmem:[#allocation2 + $0xc08] ss:$16 sps:$4 sm:$0xff]   ;;  %v9979_v42 = vld [vmem:[#allocation2 + $0xc24] ss:$16 sps:$4 sm:$0xff]  }
 0x1b5   :  { %5031 = vmatpush1.bf16.msra.mxu0 %v9887_v43  ;;  %5547 = vmatpush1.bf16.msra.mxu1 %v9890_v44  ;;  %v9982_v43 = vld [vmem:[#allocation2 + $0xc2c] ss:$16 sps:$4 sm:$0xff]   ;;  %v170_v44 = vpack.c.bf16 %v146_v38, %v122_v37  ;;  %v10061_v37 = vld [vmem:[#allocation2 + $0xde0] ss:$16 sps:$4 sm:$0xff]   ;;  %v10064_v38 = vld [vmem:[#allocation2 + $0xde8] ss:$16 sps:$4 sm:$0xff]  }
 0x1b6   :  { %5032 = vmatprep.subr.bf16.mxu0 %v9895_v45  ;;  %5548 = vmatprep.subr.bf16.mxu1 %v9898_v46  ;;  %v9977_v45 = vld [vmem:[#allocation2 + $0xc20] ss:$16 sps:$4 sm:$0xff]   ;;  %v9980_v46 = vld [vmem:[#allocation2 + $0xc28] ss:$16 sps:$4 sm:$0xff]  }
 0x1b9   :  { %5033 = vmatpush1.bf16.msra.mxu0 %v9893_v47  ;;  %5549 = vmatpush1.bf16.msra.mxu1 %v9896_v48  ;;  %v9985_v47 = vld [vmem:[#allocation2 + $0xc44] ss:$16 sps:$4 sm:$0xff]   ;;  %v9988_v48 = vld [vmem:[#allocation2 + $0xc4c] ss:$16 sps:$4 sm:$0xff]  }
 0x1ba   :  { %5034 = vmatprep.subr.bf16.mxu0 %v9901_v49  ;;  %5550 = vmatprep.subr.bf16.mxu1 %v9904_v50  ;;  %v9983_v49 = vld [vmem:[#allocation2 + $0xc40] ss:$16 sps:$4 sm:$0xff]   ;;  %v9986_v50 = vld [vmem:[#allocation2 + $0xc48] ss:$16 sps:$4 sm:$0xff]  }
 0x1bd   :  { %5035 = vmatpush1.bf16.msra.mxu0 %v9899_v51  ;;  %5551 = vmatpush1.bf16.msra.mxu1 %v9902_v52  ;;  %v9991_v51 = vld [vmem:[#allocation2 + $0xc64] ss:$16 sps:$4 sm:$0xff]   ;;  %v9994_v52 = vld [vmem:[#allocation2 + $0xc6c] ss:$16 sps:$4 sm:$0xff]  }
 0x1be   :  { %5036 = vmatprep.subr.bf16.mxu0 %v9907_v53  ;;  %5552 = vmatprep.subr.bf16.mxu1 %v9910_v54  ;;  %v9989_v53 = vld [vmem:[#allocation2 + $0xc60] ss:$16 sps:$4 sm:$0xff]   ;;  %v9992_v54 = vld [vmem:[#allocation2 + $0xc68] ss:$16 sps:$4 sm:$0xff]  }
 0x1c1   :  { %5037 = vmatpush1.bf16.msra.mxu0 %v9905_v55  ;;  %5553 = vmatpush1.bf16.msra.mxu1 %v9908_v56  ;;  %v9997_v55 = vld [vmem:[#allocation2 + $0xc84] ss:$16 sps:$4 sm:$0xff]   ;;  %v10000_v56 = vld [vmem:[#allocation2 + $0xc8c] ss:$16 sps:$4 sm:$0xff]  }
 0x1c2   :  { %5038 = vmatprep.subr.bf16.mxu0 %v9913_v57  ;;  %5554 = vmatprep.subr.bf16.mxu1 %v9916_v58  ;;  %v9995_v57 = vld [vmem:[#allocation2 + $0xc80] ss:$16 sps:$4 sm:$0xff]   ;;  %v9998_v58 = vld [vmem:[#allocation2 + $0xc88] ss:$16 sps:$4 sm:$0xff]  }
 0x1c5   :  { %5039 = vmatpush1.bf16.msra.mxu0 %v9911_v59  ;;  %5555 = vmatpush1.bf16.msra.mxu1 %v9914_v60  ;;  %v10003_v59 = vld [vmem:[#allocation2 + $0xca4] ss:$16 sps:$4 sm:$0xff]   ;;  %v10006_v60 = vld [vmem:[#allocation2 + $0xcac] ss:$16 sps:$4 sm:$0xff]  }
 0x1c6   :  { %5040 = vmatprep.subr.bf16.mxu0 %v9919_v61  ;;  %5556 = vmatprep.subr.bf16.mxu1 %v9922_v62  ;;  %v10001_v61 = vld [vmem:[#allocation2 + $0xca0] ss:$16 sps:$4 sm:$0xff]   ;;  %v10004_v62 = vld [vmem:[#allocation2 + $0xca8] ss:$16 sps:$4 sm:$0xff]  }
 0x1c9   :  { %5041 = vmatpush1.bf16.msra.mxu0 %v9917_v63  ;;  %5557 = vmatpush1.bf16.msra.mxu1 %v9920_v0  ;;  %v10009_v63 = vld [vmem:[#allocation2 + $0xcc4] ss:$16 sps:$4 sm:$0xff]   ;;  %v10012_v0 = vld [vmem:[#allocation2 + $0xccc] ss:$16 sps:$4 sm:$0xff]  }
 0x1ca   :  { %5042 = vmatprep.subr.bf16.mxu0 %v9925_v1  ;;  %5558 = vmatprep.subr.bf16.mxu1 %v9928_v2  ;;  %v10007_v1 = vld [vmem:[#allocation2 + $0xcc0] ss:$16 sps:$4 sm:$0xff]   ;;  %v10010_v2 = vld [vmem:[#allocation2 + $0xcc8] ss:$16 sps:$4 sm:$0xff]  }
 0x1cd   :  { %5043 = vmatpush1.bf16.msra.mxu0 %v9923_v3  ;;  %5559 = vmatpush1.bf16.msra.mxu1 %v9926_v4  ;;  %v10015_v3 = vld [vmem:[#allocation2 + $0xce4] ss:$16 sps:$4 sm:$0xff]   ;;  %v10018_v4 = vld [vmem:[#allocation2 + $0xcec] ss:$16 sps:$4 sm:$0xff]  }
 0x1ce   :  { %5044 = vmatprep.subr.bf16.mxu0 %v9931_v5  ;;  %5560 = vmatprep.subr.bf16.mxu1 %v9934_v6  ;;  %v10013_v5 = vld [vmem:[#allocation2 + $0xce0] ss:$16 sps:$4 sm:$0xff]   ;;  %v10016_v6 = vld [vmem:[#allocation2 + $0xce8] ss:$16 sps:$4 sm:$0xff]  }
 0x1d1   :  { %5045 = vmatpush1.bf16.msra.mxu0 %v9929_v7  ;;  %5561 = vmatpush1.bf16.msra.mxu1 %v9932_v8  ;;  %v10021_v7 = vld [vmem:[#allocation2 + $0xd04] ss:$16 sps:$4 sm:$0xff]   ;;  %v10024_v8 = vld [vmem:[#allocation2 + $0xd0c] ss:$16 sps:$4 sm:$0xff]  }
 0x1d2   :  { %5046 = vmatprep.subr.bf16.mxu0 %v9937_v9  ;;  %5562 = vmatprep.subr.bf16.mxu1 %v9940_v10  ;;  %v10019_v9 = vld [vmem:[#allocation2 + $0xd00] ss:$16 sps:$4 sm:$0xff]   ;;  %v10022_v10 = vld [vmem:[#allocation2 + $0xd08] ss:$16 sps:$4 sm:$0xff]  }
 0x1d5   :  { %5047 = vmatpush1.bf16.msra.mxu0 %v9935_v11  ;;  %5563 = vmatpush1.bf16.msra.mxu1 %v9938_v12  ;;  %v10027_v11 = vld [vmem:[#allocation2 + $0xd24] ss:$16 sps:$4 sm:$0xff]   ;;  %v10030_v12 = vld [vmem:[#allocation2 + $0xd2c] ss:$16 sps:$4 sm:$0xff]  }
 0x1d6   :  { %5048 = vmatprep.subr.bf16.mxu0 %v9943_v13  ;;  %5564 = vmatprep.subr.bf16.mxu1 %v9946_v14  ;;  %v10025_v13 = vld [vmem:[#allocation2 + $0xd20] ss:$16 sps:$4 sm:$0xff]   ;;  %v10028_v14 = vld [vmem:[#allocation2 + $0xd28] ss:$16 sps:$4 sm:$0xff]  }
 0x1d9   :  { %5049 = vmatpush1.bf16.msra.mxu0 %v9941_v15  ;;  %5565 = vmatpush1.bf16.msra.mxu1 %v9944_v16  ;;  %v10033_v15 = vld [vmem:[#allocation2 + $0xd44] ss:$16 sps:$4 sm:$0xff]   ;;  %v10036_v16 = vld [vmem:[#allocation2 + $0xd4c] ss:$16 sps:$4 sm:$0xff]  }
 0x1da   :  { %5050 = vmatprep.subr.bf16.mxu0 %v9949_v17  ;;  %5566 = vmatprep.subr.bf16.mxu1 %v9952_v18  ;;  %v10031_v17 = vld [vmem:[#allocation2 + $0xd40] ss:$16 sps:$4 sm:$0xff]   ;;  %v10034_v18 = vld [vmem:[#allocation2 + $0xd48] ss:$16 sps:$4 sm:$0xff]  }
 0x1dd   :  { %5051 = vmatpush1.bf16.msra.mxu0 %v9947_v19  ;;  %5567 = vmatpush1.bf16.msra.mxu1 %v9950_v20  ;;  %v10039_v19 = vld [vmem:[#allocation2 + $0xd64] ss:$16 sps:$4 sm:$0xff]   ;;  %v10042_v20 = vld [vmem:[#allocation2 + $0xd6c] ss:$16 sps:$4 sm:$0xff]  }
 0x1de   :  { %5052 = vmatprep.subr.bf16.mxu0 %v9955_v21  ;;  %5568 = vmatprep.subr.bf16.mxu1 %v9958_v22  ;;  %v10037_v21 = vld [vmem:[#allocation2 + $0xd60] ss:$16 sps:$4 sm:$0xff]   ;;  %v10040_v22 = vld [vmem:[#allocation2 + $0xd68] ss:$16 sps:$4 sm:$0xff]  }
 0x1e1   :  { %5053 = vmatpush1.bf16.msra.mxu0 %v9953_v23  ;;  %5569 = vmatpush1.bf16.msra.mxu1 %v9956_v24  ;;  %v10045_v23 = vld [vmem:[#allocation2 + $0xd84] ss:$16 sps:$4 sm:$0xff]   ;;  %v10048_v24 = vld [vmem:[#allocation2 + $0xd8c] ss:$16 sps:$4 sm:$0xff]  }
 0x1e2   :  { %5054 = vmatprep.subr.bf16.mxu0 %v9961_v25  ;;  %5570 = vmatprep.subr.bf16.mxu1 %v9964_v26  ;;  %v10043_v25 = vld [vmem:[#allocation2 + $0xd80] ss:$16 sps:$4 sm:$0xff]   ;;  %v10046_v26 = vld [vmem:[#allocation2 + $0xd88] ss:$16 sps:$4 sm:$0xff]  }
 0x1e5   :  { %5055 = vmatpush1.bf16.msra.mxu0 %v9959_v27  ;;  %5571 = vmatpush1.bf16.msra.mxu1 %v9962_v28  ;;  %v10051_v27 = vld [vmem:[#allocation2 + $0xda4] ss:$16 sps:$4 sm:$0xff]   ;;  %v10054_v28 = vld [vmem:[#allocation2 + $0xdac] ss:$16 sps:$4 sm:$0xff]  }
 0x1e6   :  { %5056 = vmatprep.subr.bf16.mxu0 %v9967_v29  ;;  %5572 = vmatprep.subr.bf16.mxu1 %v9970_v30  ;;  %v10049_v29 = vld [vmem:[#allocation2 + $0xda0] ss:$16 sps:$4 sm:$0xff]   ;;  %v10052_v30 = vld [vmem:[#allocation2 + $0xda8] ss:$16 sps:$4 sm:$0xff]  }
 0x1e9   :  { %5057 = vmatpush1.bf16.msra.mxu0 %v9965_v31  ;;  %5573 = vmatpush1.bf16.msra.mxu1 %v9968_v32  ;;  %v10057_v31 = vld [vmem:[#allocation2 + $0xdc4] ss:$16 sps:$4 sm:$0xff]   ;;  %v10060_v32 = vld [vmem:[#allocation2 + $0xdcc] ss:$16 sps:$4 sm:$0xff]  }
 0x1ea   :  { %5069 = vmatprep.subr.bf16.mxu0 %v9973_v33  ;;  %5585 = vmatprep.subr.bf16.mxu1 %v9976_v34  ;;  %v10055_v33 = vld [vmem:[#allocation2 + $0xdc0] ss:$16 sps:$4 sm:$0xff]   ;;  %v10058_v34 = vld [vmem:[#allocation2 + $0xdc8] ss:$16 sps:$4 sm:$0xff]  }
 0x1ec   :  { %5059 = vmatmul.mubr.bf16.vlgmr.msra.gmra.mrb[0].mxu0 %v167_v39  ;;  %5575 = vmatmul.mubr.bf16.vlgmr.msra.gmra.mrb[0].mxu1 %v167_v39  ;;  %v10069_v39 = vld [vmem:[#allocation2 + $0xe04] ss:$16 sps:$4 sm:$0xff]  }
 0x1ed   :  { %5070 = vmatpush1.bf16.msra.mxu0 %v9971_v40  ;;  %5586 = vmatpush1.bf16.msra.mxu1 %v9974_v41  ;;  %v10072_v40 = vld [vmem:[#allocation2 + $0xe0c] ss:$16 sps:$4 sm:$0xff]   ;;  %v121_v41 = vld [vmem:[%s11519_s0 + $0x60] sm:$0xff] }
 0x1ee   :  { %5071 = vmatprep.subr.bf16.mxu0 %v9979_v42  ;;  %5587 = vmatprep.subr.bf16.mxu1 %v9982_v43  ;;  %v145_v42 = vld [vmem:[%s11519_s0 + $0x120] sm:$0xff]  ;;  %v124_v43 = vld [vmem:[%s11519_s0 + $0x78] sm:$0xff] }
 0x1ef   :  { %5101 = vmatprep.mubr.bf16.mxu0 %v170_v44  ;;  %5617 = vmatprep.mubr.bf16.mxu1 %v170_v44  ;;  %v148_v44 = vld [vmem:[%s11519_s0 + $0x138] sm:$0xff] }
 0x1f1   :  { %5072 = vmatpush1.bf16.msra.mxu0 %v9977_v45  ;;  %5588 = vmatpush1.bf16.msra.mxu1 %v9980_v46  ;;  %v169_v45 = vpack.c.bf16 %v145_v42, %v121_v41  ;;  %v10067_v46 = vld [vmem:[#allocation2 + $0xe00] ss:$16 sps:$4 sm:$0xff]   ;;  %v10159_v41 = vld [vmem:[#allocation2 + $0xfe4] ss:$16 sps:$4 sm:$0xff]   ;;  %v10162_v42 = vld [vmem:[#allocation2 + $0xfec] ss:$16 sps:$4 sm:$0xff]  }
 0x1f2   :  { %5073 = vmatprep.subr.bf16.mxu0 %v9985_v47  ;;  %5589 = vmatprep.subr.bf16.mxu1 %v9988_v48  ;;  %v10070_v47 = vld [vmem:[#allocation2 + $0xe08] ss:$16 sps:$4 sm:$0xff]   ;;  %v10075_v48 = vld [vmem:[#allocation2 + $0xe24] ss:$16 sps:$4 sm:$0xff]  }
 0x1f5   :  { %5074 = vmatpush1.bf16.msra.mxu0 %v9983_v49  ;;  %5590 = vmatpush1.bf16.msra.mxu1 %v9986_v50  ;;  %v10078_v49 = vld [vmem:[#allocation2 + $0xe2c] ss:$16 sps:$4 sm:$0xff]   ;;  %v172_v50 = vpack.c.bf16 %v148_v44, %v124_v43  ;;  %v10157_v43 = vld [vmem:[#allocation2 + $0xfe0] ss:$16 sps:$4 sm:$0xff]   ;;  %v10160_v44 = vld [vmem:[#allocation2 + $0xfe8] ss:$16 sps:$4 sm:$0xff]  }
 0x1f6   :  { %5075 = vmatprep.subr.bf16.mxu0 %v9991_v51  ;;  %5591 = vmatprep.subr.bf16.mxu1 %v9994_v52  ;;  %v10073_v51 = vld [vmem:[#allocation2 + $0xe20] ss:$16 sps:$4 sm:$0xff]   ;;  %v10076_v52 = vld [vmem:[#allocation2 + $0xe28] ss:$16 sps:$4 sm:$0xff]  }
 0x1f9   :  { %5076 = vmatpush1.bf16.msra.mxu0 %v9989_v53  ;;  %5592 = vmatpush1.bf16.msra.mxu1 %v9992_v54  ;;  %v10081_v53 = vld [vmem:[#allocation2 + $0xe44] ss:$16 sps:$4 sm:$0xff]   ;;  %v10084_v54 = vld [vmem:[#allocation2 + $0xe4c] ss:$16 sps:$4 sm:$0xff]  }
 0x1fa   :  { %5077 = vmatprep.subr.bf16.mxu0 %v9997_v55  ;;  %5593 = vmatprep.subr.bf16.mxu1 %v10000_v56  ;;  %v10079_v55 = vld [vmem:[#allocation2 + $0xe40] ss:$16 sps:$4 sm:$0xff]   ;;  %v10082_v56 = vld [vmem:[#allocation2 + $0xe48] ss:$16 sps:$4 sm:$0xff]  }
 0x1fd   :  { %5078 = vmatpush1.bf16.msra.mxu0 %v9995_v57  ;;  %5594 = vmatpush1.bf16.msra.mxu1 %v9998_v58  ;;  %v10087_v57 = vld [vmem:[#allocation2 + $0xe64] ss:$16 sps:$4 sm:$0xff]   ;;  %v10090_v58 = vld [vmem:[#allocation2 + $0xe6c] ss:$16 sps:$4 sm:$0xff]  }
 0x1fe   :  { %5079 = vmatprep.subr.bf16.mxu0 %v10003_v59  ;;  %5595 = vmatprep.subr.bf16.mxu1 %v10006_v60  ;;  %v10085_v59 = vld [vmem:[#allocation2 + $0xe60] ss:$16 sps:$4 sm:$0xff]   ;;  %v10088_v60 = vld [vmem:[#allocation2 + $0xe68] ss:$16 sps:$4 sm:$0xff]  }
 0x201   :  { %5080 = vmatpush1.bf16.msra.mxu0 %v10001_v61  ;;  %5596 = vmatpush1.bf16.msra.mxu1 %v10004_v62  ;;  %v10093_v61 = vld [vmem:[#allocation2 + $0xe84] ss:$16 sps:$4 sm:$0xff]   ;;  %v10096_v62 = vld [vmem:[#allocation2 + $0xe8c] ss:$16 sps:$4 sm:$0xff]  }
 0x202   :  { %5081 = vmatprep.subr.bf16.mxu0 %v10009_v63  ;;  %5597 = vmatprep.subr.bf16.mxu1 %v10012_v0  ;;  %v10091_v63 = vld [vmem:[#allocation2 + $0xe80] ss:$16 sps:$4 sm:$0xff]   ;;  %v10094_v0 = vld [vmem:[#allocation2 + $0xe88] ss:$16 sps:$4 sm:$0xff]  }
 0x205   :  { %5082 = vmatpush1.bf16.msra.mxu0 %v10007_v1  ;;  %5598 = vmatpush1.bf16.msra.mxu1 %v10010_v2  ;;  %v10099_v1 = vld [vmem:[#allocation2 + $0xea4] ss:$16 sps:$4 sm:$0xff]   ;;  %v10102_v2 = vld [vmem:[#allocation2 + $0xeac] ss:$16 sps:$4 sm:$0xff]  }
 0x206   :  { %5083 = vmatprep.subr.bf16.mxu0 %v10015_v3  ;;  %5599 = vmatprep.subr.bf16.mxu1 %v10018_v4  ;;  %v10097_v3 = vld [vmem:[#allocation2 + $0xea0] ss:$16 sps:$4 sm:$0xff]   ;;  %v10100_v4 = vld [vmem:[#allocation2 + $0xea8] ss:$16 sps:$4 sm:$0xff]  }
 0x209   :  { %5084 = vmatpush1.bf16.msra.mxu0 %v10013_v5  ;;  %5600 = vmatpush1.bf16.msra.mxu1 %v10016_v6  ;;  %v10105_v5 = vld [vmem:[#allocation2 + $0xec4] ss:$16 sps:$4 sm:$0xff]   ;;  %v10108_v6 = vld [vmem:[#allocation2 + $0xecc] ss:$16 sps:$4 sm:$0xff]  }
 0x20a   :  { %5085 = vmatprep.subr.bf16.mxu0 %v10021_v7  ;;  %5601 = vmatprep.subr.bf16.mxu1 %v10024_v8  ;;  %v10103_v7 = vld [vmem:[#allocation2 + $0xec0] ss:$16 sps:$4 sm:$0xff]   ;;  %v10106_v8 = vld [vmem:[#allocation2 + $0xec8] ss:$16 sps:$4 sm:$0xff]  }
 0x20d   :  { %5086 = vmatpush1.bf16.msra.mxu0 %v10019_v9  ;;  %5602 = vmatpush1.bf16.msra.mxu1 %v10022_v10  ;;  %v10111_v9 = vld [vmem:[#allocation2 + $0xee4] ss:$16 sps:$4 sm:$0xff]   ;;  %v10114_v10 = vld [vmem:[#allocation2 + $0xeec] ss:$16 sps:$4 sm:$0xff]  }
 0x20e   :  { %5087 = vmatprep.subr.bf16.mxu0 %v10027_v11  ;;  %5603 = vmatprep.subr.bf16.mxu1 %v10030_v12  ;;  %v10109_v11 = vld [vmem:[#allocation2 + $0xee0] ss:$16 sps:$4 sm:$0xff]   ;;  %v10112_v12 = vld [vmem:[#allocation2 + $0xee8] ss:$16 sps:$4 sm:$0xff]  }
 0x211   :  { %5088 = vmatpush1.bf16.msra.mxu0 %v10025_v13  ;;  %5604 = vmatpush1.bf16.msra.mxu1 %v10028_v14  ;;  %v10117_v13 = vld [vmem:[#allocation2 + $0xf04] ss:$16 sps:$4 sm:$0xff]   ;;  %v10120_v14 = vld [vmem:[#allocation2 + $0xf0c] ss:$16 sps:$4 sm:$0xff]  }
 0x212   :  { %5089 = vmatprep.subr.bf16.mxu0 %v10033_v15  ;;  %5605 = vmatprep.subr.bf16.mxu1 %v10036_v16  ;;  %v10115_v15 = vld [vmem:[#allocation2 + $0xf00] ss:$16 sps:$4 sm:$0xff]   ;;  %v10118_v16 = vld [vmem:[#allocation2 + $0xf08] ss:$16 sps:$4 sm:$0xff]  }
 0x215   :  { %5090 = vmatpush1.bf16.msra.mxu0 %v10031_v17  ;;  %5606 = vmatpush1.bf16.msra.mxu1 %v10034_v18  ;;  %v10123_v17 = vld [vmem:[#allocation2 + $0xf24] ss:$16 sps:$4 sm:$0xff]   ;;  %v10126_v18 = vld [vmem:[#allocation2 + $0xf2c] ss:$16 sps:$4 sm:$0xff]  }
 0x216   :  { %5091 = vmatprep.subr.bf16.mxu0 %v10039_v19  ;;  %5607 = vmatprep.subr.bf16.mxu1 %v10042_v20  ;;  %v10121_v19 = vld [vmem:[#allocation2 + $0xf20] ss:$16 sps:$4 sm:$0xff]   ;;  %v10124_v20 = vld [vmem:[#allocation2 + $0xf28] ss:$16 sps:$4 sm:$0xff]  }
 0x219   :  { %5092 = vmatpush1.bf16.msra.mxu0 %v10037_v21  ;;  %5608 = vmatpush1.bf16.msra.mxu1 %v10040_v22  ;;  %v10129_v21 = vld [vmem:[#allocation2 + $0xf44] ss:$16 sps:$4 sm:$0xff]   ;;  %v10132_v22 = vld [vmem:[#allocation2 + $0xf4c] ss:$16 sps:$4 sm:$0xff]  }
 0x21a   :  { %5093 = vmatprep.subr.bf16.mxu0 %v10045_v23  ;;  %5609 = vmatprep.subr.bf16.mxu1 %v10048_v24  ;;  %v10127_v23 = vld [vmem:[#allocation2 + $0xf40] ss:$16 sps:$4 sm:$0xff]   ;;  %v10130_v24 = vld [vmem:[#allocation2 + $0xf48] ss:$16 sps:$4 sm:$0xff]  }
 0x21d   :  { %5094 = vmatpush1.bf16.msra.mxu0 %v10043_v25  ;;  %5610 = vmatpush1.bf16.msra.mxu1 %v10046_v26  ;;  %v10135_v25 = vld [vmem:[#allocation2 + $0xf64] ss:$16 sps:$4 sm:$0xff]   ;;  %v10138_v26 = vld [vmem:[#allocation2 + $0xf6c] ss:$16 sps:$4 sm:$0xff]  }
 0x21e   :  { %5095 = vmatprep.subr.bf16.mxu0 %v10051_v27  ;;  %5611 = vmatprep.subr.bf16.mxu1 %v10054_v28  ;;  %v10133_v27 = vld [vmem:[#allocation2 + $0xf60] ss:$16 sps:$4 sm:$0xff]   ;;  %v10136_v28 = vld [vmem:[#allocation2 + $0xf68] ss:$16 sps:$4 sm:$0xff]  }
 0x221   :  { %5096 = vmatpush1.bf16.msra.mxu0 %v10049_v29  ;;  %5612 = vmatpush1.bf16.msra.mxu1 %v10052_v30  ;;  %v10141_v29 = vld [vmem:[#allocation2 + $0xf84] ss:$16 sps:$4 sm:$0xff]   ;;  %v10144_v30 = vld [vmem:[#allocation2 + $0xf8c] ss:$16 sps:$4 sm:$0xff]  }
 0x222   :  { %5097 = vmatprep.subr.bf16.mxu0 %v10057_v31  ;;  %5613 = vmatprep.subr.bf16.mxu1 %v10060_v32  ;;  %v10139_v31 = vld [vmem:[#allocation2 + $0xf80] ss:$16 sps:$4 sm:$0xff]   ;;  %v10142_v32 = vld [vmem:[#allocation2 + $0xf88] ss:$16 sps:$4 sm:$0xff]  }
 0x225   :  { %5098 = vmatpush1.bf16.msra.mxu0 %v10055_v33  ;;  %5614 = vmatpush1.bf16.msra.mxu1 %v10058_v34  ;;  %v10147_v33 = vld [vmem:[#allocation2 + $0xfa4] ss:$16 sps:$4 sm:$0xff]   ;;  %v10150_v34 = vld [vmem:[#allocation2 + $0xfac] ss:$16 sps:$4 sm:$0xff]  }
 0x226   :  { %5099 = vmatprep.subr.bf16.mxu0 %v10063_v35  ;;  %5615 = vmatprep.subr.bf16.mxu1 %v10066_v36  ;;  %v10145_v35 = vld [vmem:[#allocation2 + $0xfa0] ss:$16 sps:$4 sm:$0xff]   ;;  %v10148_v36 = vld [vmem:[#allocation2 + $0xfa8] ss:$16 sps:$4 sm:$0xff]  }
 0x229   :  { %5100 = vmatpush1.bf16.msra.mxu0 %v10061_v37  ;;  %5616 = vmatpush1.bf16.msra.mxu1 %v10064_v38  ;;  %v10153_v37 = vld [vmem:[#allocation2 + $0xfc4] ss:$16 sps:$4 sm:$0xff]   ;;  %v10156_v38 = vld [vmem:[#allocation2 + $0xfcc] ss:$16 sps:$4 sm:$0xff]  }
 0x22a   :  { %5112 = vmatprep.subr.bf16.mxu0 %v10069_v39  ;;  %5628 = vmatprep.subr.bf16.mxu1 %v10072_v40  ;;  %v10151_v39 = vld [vmem:[#allocation2 + $0xfc0] ss:$16 sps:$4 sm:$0xff]   ;;  %v10154_v40 = vld [vmem:[#allocation2 + $0xfc8] ss:$16 sps:$4 sm:$0xff]  }
 0x22c   :  { %5102 = vmatmul.mubr.bf16.vlgmr.msra.gmra.mrb[0].mxu0 %v169_v45  ;;  %5618 = vmatmul.mubr.bf16.vlgmr.msra.gmra.mrb[0].mxu1 %v169_v45  ;;  %v10165_v45 = vld [vmem:[#allocation2 + $0x1004] ss:$16 sps:$4 sm:$0xff]  }
 0x22d   :  { %5113 = vmatpush1.bf16.msra.mxu0 %v10067_v46  ;;  %5629 = vmatpush1.bf16.msra.mxu1 %v10070_v47  ;;  %v10168_v46 = vld [vmem:[#allocation2 + $0x100c] ss:$16 sps:$4 sm:$0xff]   ;;  %v123_v47 = vld [vmem:[%s11519_s0 + $0x70] sm:$0xff] }
 0x22e   :  { %5114 = vmatprep.subr.bf16.mxu0 %v10075_v48  ;;  %5630 = vmatprep.subr.bf16.mxu1 %v10078_v49  ;;  %v147_v48 = vld [vmem:[%s11519_s0 + $0x130] sm:$0xff]  ;;  %v126_v49 = vld [vmem:[%s11519_s0 + $0x88] sm:$0xff] }
 0x22f   :  { %5144 = vmatprep.mubr.bf16.mxu0 %v172_v50  ;;  %5660 = vmatprep.mubr.bf16.mxu1 %v172_v50  ;;  %v150_v50 = vld [vmem:[%s11519_s0 + $0x148] sm:$0xff] }
 0x231   :  { %5115 = vmatpush1.bf16.msra.mxu0 %v10073_v51  ;;  %5631 = vmatpush1.bf16.msra.mxu1 %v10076_v52  ;;  %v171_v51 = vpack.c.bf16 %v147_v48, %v123_v47  ;;  %v10163_v52 = vld [vmem:[#allocation2 + $0x1000] ss:$16 sps:$4 sm:$0xff]   ;;  %v10255_v47 = vld [vmem:[#allocation2 + $0x11e4] ss:$16 sps:$4 sm:$0xff]   ;;  %v10258_v48 = vld [vmem:[#allocation2 + $0x11ec] ss:$16 sps:$4 sm:$0xff]  }
 0x232   :  { %5116 = vmatprep.subr.bf16.mxu0 %v10081_v53  ;;  %5632 = vmatprep.subr.bf16.mxu1 %v10084_v54  ;;  %v10166_v53 = vld [vmem:[#allocation2 + $0x1008] ss:$16 sps:$4 sm:$0xff]   ;;  %v10171_v54 = vld [vmem:[#allocation2 + $0x1024] ss:$16 sps:$4 sm:$0xff]  }
 0x235   :  { %5117 = vmatpush1.bf16.msra.mxu0 %v10079_v55  ;;  %5633 = vmatpush1.bf16.msra.mxu1 %v10082_v56  ;;  %v10174_v55 = vld [vmem:[#allocation2 + $0x102c] ss:$16 sps:$4 sm:$0xff]   ;;  %v174_v56 = vpack.c.bf16 %v150_v50, %v126_v49  ;;  %v10253_v49 = vld [vmem:[#allocation2 + $0x11e0] ss:$16 sps:$4 sm:$0xff]   ;;  %v10256_v50 = vld [vmem:[#allocation2 + $0x11e8] ss:$16 sps:$4 sm:$0xff]  }
 0x236   :  { %5118 = vmatprep.subr.bf16.mxu0 %v10087_v57  ;;  %5634 = vmatprep.subr.bf16.mxu1 %v10090_v58  ;;  %v10169_v57 = vld [vmem:[#allocation2 + $0x1020] ss:$16 sps:$4 sm:$0xff]   ;;  %v10172_v58 = vld [vmem:[#allocation2 + $0x1028] ss:$16 sps:$4 sm:$0xff]  }
 0x239   :  { %5119 = vmatpush1.bf16.msra.mxu0 %v10085_v59  ;;  %5635 = vmatpush1.bf16.msra.mxu1 %v10088_v60  ;;  %v10177_v59 = vld [vmem:[#allocation2 + $0x1044] ss:$16 sps:$4 sm:$0xff]   ;;  %v10180_v60 = vld [vmem:[#allocation2 + $0x104c] ss:$16 sps:$4 sm:$0xff]  }
 0x23a   :  { %5120 = vmatprep.subr.bf16.mxu0 %v10093_v61  ;;  %5636 = vmatprep.subr.bf16.mxu1 %v10096_v62  ;;  %v10175_v61 = vld [vmem:[#allocation2 + $0x1040] ss:$16 sps:$4 sm:$0xff]   ;;  %v10178_v62 = vld [vmem:[#allocation2 + $0x1048] ss:$16 sps:$4 sm:$0xff]  }
 0x23d   :  { %5121 = vmatpush1.bf16.msra.mxu0 %v10091_v63  ;;  %5637 = vmatpush1.bf16.msra.mxu1 %v10094_v0  ;;  %v10183_v63 = vld [vmem:[#allocation2 + $0x1064] ss:$16 sps:$4 sm:$0xff]   ;;  %v10186_v0 = vld [vmem:[#allocation2 + $0x106c] ss:$16 sps:$4 sm:$0xff]  }
 0x23e   :  { %5122 = vmatprep.subr.bf16.mxu0 %v10099_v1  ;;  %5638 = vmatprep.subr.bf16.mxu1 %v10102_v2  ;;  %v10181_v1 = vld [vmem:[#allocation2 + $0x1060] ss:$16 sps:$4 sm:$0xff]   ;;  %v10184_v2 = vld [vmem:[#allocation2 + $0x1068] ss:$16 sps:$4 sm:$0xff]  }
 0x241   :  { %5123 = vmatpush1.bf16.msra.mxu0 %v10097_v3  ;;  %5639 = vmatpush1.bf16.msra.mxu1 %v10100_v4  ;;  %v10189_v3 = vld [vmem:[#allocation2 + $0x1084] ss:$16 sps:$4 sm:$0xff]   ;;  %v10192_v4 = vld [vmem:[#allocation2 + $0x108c] ss:$16 sps:$4 sm:$0xff]  }
 0x242   :  { %5124 = vmatprep.subr.bf16.mxu0 %v10105_v5  ;;  %5640 = vmatprep.subr.bf16.mxu1 %v10108_v6  ;;  %v10187_v5 = vld [vmem:[#allocation2 + $0x1080] ss:$16 sps:$4 sm:$0xff]   ;;  %v10190_v6 = vld [vmem:[#allocation2 + $0x1088] ss:$16 sps:$4 sm:$0xff]  }
 0x245   :  { %5125 = vmatpush1.bf16.msra.mxu0 %v10103_v7  ;;  %5641 = vmatpush1.bf16.msra.mxu1 %v10106_v8  ;;  %v10195_v7 = vld [vmem:[#allocation2 + $0x10a4] ss:$16 sps:$4 sm:$0xff]   ;;  %v10198_v8 = vld [vmem:[#allocation2 + $0x10ac] ss:$16 sps:$4 sm:$0xff]  }
 0x246   :  { %5126 = vmatprep.subr.bf16.mxu0 %v10111_v9  ;;  %5642 = vmatprep.subr.bf16.mxu1 %v10114_v10  ;;  %v10193_v9 = vld [vmem:[#allocation2 + $0x10a0] ss:$16 sps:$4 sm:$0xff]   ;;  %v10196_v10 = vld [vmem:[#allocation2 + $0x10a8] ss:$16 sps:$4 sm:$0xff]  }
 0x249   :  { %5127 = vmatpush1.bf16.msra.mxu0 %v10109_v11  ;;  %5643 = vmatpush1.bf16.msra.mxu1 %v10112_v12  ;;  %v10201_v11 = vld [vmem:[#allocation2 + $0x10c4] ss:$16 sps:$4 sm:$0xff]   ;;  %v10204_v12 = vld [vmem:[#allocation2 + $0x10cc] ss:$16 sps:$4 sm:$0xff]  }
 0x24a   :  { %5128 = vmatprep.subr.bf16.mxu0 %v10117_v13  ;;  %5644 = vmatprep.subr.bf16.mxu1 %v10120_v14  ;;  %v10199_v13 = vld [vmem:[#allocation2 + $0x10c0] ss:$16 sps:$4 sm:$0xff]   ;;  %v10202_v14 = vld [vmem:[#allocation2 + $0x10c8] ss:$16 sps:$4 sm:$0xff]  }
 0x24d   :  { %5129 = vmatpush1.bf16.msra.mxu0 %v10115_v15  ;;  %5645 = vmatpush1.bf16.msra.mxu1 %v10118_v16  ;;  %v10207_v15 = vld [vmem:[#allocation2 + $0x10e4] ss:$16 sps:$4 sm:$0xff]   ;;  %v10210_v16 = vld [vmem:[#allocation2 + $0x10ec] ss:$16 sps:$4 sm:$0xff]  }
 0x24e   :  { %5130 = vmatprep.subr.bf16.mxu0 %v10123_v17  ;;  %5646 = vmatprep.subr.bf16.mxu1 %v10126_v18  ;;  %v10205_v17 = vld [vmem:[#allocation2 + $0x10e0] ss:$16 sps:$4 sm:$0xff]   ;;  %v10208_v18 = vld [vmem:[#allocation2 + $0x10e8] ss:$16 sps:$4 sm:$0xff]  }
 0x251   :  { %5131 = vmatpush1.bf16.msra.mxu0 %v10121_v19  ;;  %5647 = vmatpush1.bf16.msra.mxu1 %v10124_v20  ;;  %v10213_v19 = vld [vmem:[#allocation2 + $0x1104] ss:$16 sps:$4 sm:$0xff]   ;;  %v10216_v20 = vld [vmem:[#allocation2 + $0x110c] ss:$16 sps:$4 sm:$0xff]  }
 0x252   :  { %5132 = vmatprep.subr.bf16.mxu0 %v10129_v21  ;;  %5648 = vmatprep.subr.bf16.mxu1 %v10132_v22  ;;  %v10211_v21 = vld [vmem:[#allocation2 + $0x1100] ss:$16 sps:$4 sm:$0xff]   ;;  %v10214_v22 = vld [vmem:[#allocation2 + $0x1108] ss:$16 sps:$4 sm:$0xff]  }
 0x255   :  { %5133 = vmatpush1.bf16.msra.mxu0 %v10127_v23  ;;  %5649 = vmatpush1.bf16.msra.mxu1 %v10130_v24  ;;  %v10219_v23 = vld [vmem:[#allocation2 + $0x1124] ss:$16 sps:$4 sm:$0xff]   ;;  %v10222_v24 = vld [vmem:[#allocation2 + $0x112c] ss:$16 sps:$4 sm:$0xff]  }
 0x256   :  { %5134 = vmatprep.subr.bf16.mxu0 %v10135_v25  ;;  %5650 = vmatprep.subr.bf16.mxu1 %v10138_v26  ;;  %v10217_v25 = vld [vmem:[#allocation2 + $0x1120] ss:$16 sps:$4 sm:$0xff]   ;;  %v10220_v26 = vld [vmem:[#allocation2 + $0x1128] ss:$16 sps:$4 sm:$0xff]  }
 0x259   :  { %5135 = vmatpush1.bf16.msra.mxu0 %v10133_v27  ;;  %5651 = vmatpush1.bf16.msra.mxu1 %v10136_v28  ;;  %v10225_v27 = vld [vmem:[#allocation2 + $0x1144] ss:$16 sps:$4 sm:$0xff]   ;;  %v10228_v28 = vld [vmem:[#allocation2 + $0x114c] ss:$16 sps:$4 sm:$0xff]  }
 0x25a   :  { %5136 = vmatprep.subr.bf16.mxu0 %v10141_v29  ;;  %5652 = vmatprep.subr.bf16.mxu1 %v10144_v30  ;;  %v10223_v29 = vld [vmem:[#allocation2 + $0x1140] ss:$16 sps:$4 sm:$0xff]   ;;  %v10226_v30 = vld [vmem:[#allocation2 + $0x1148] ss:$16 sps:$4 sm:$0xff]  }
 0x25d   :  { %5137 = vmatpush1.bf16.msra.mxu0 %v10139_v31  ;;  %5653 = vmatpush1.bf16.msra.mxu1 %v10142_v32  ;;  %v10231_v31 = vld [vmem:[#allocation2 + $0x1164] ss:$16 sps:$4 sm:$0xff]   ;;  %v10234_v32 = vld [vmem:[#allocation2 + $0x116c] ss:$16 sps:$4 sm:$0xff]  }
 0x25e   :  { %5138 = vmatprep.subr.bf16.mxu0 %v10147_v33  ;;  %5654 = vmatprep.subr.bf16.mxu1 %v10150_v34  ;;  %v10229_v33 = vld [vmem:[#allocation2 + $0x1160] ss:$16 sps:$4 sm:$0xff]   ;;  %v10232_v34 = vld [vmem:[#allocation2 + $0x1168] ss:$16 sps:$4 sm:$0xff]  }
 0x261   :  { %5139 = vmatpush1.bf16.msra.mxu0 %v10145_v35  ;;  %5655 = vmatpush1.bf16.msra.mxu1 %v10148_v36  ;;  %v10237_v35 = vld [vmem:[#allocation2 + $0x1184] ss:$16 sps:$4 sm:$0xff]   ;;  %v10240_v36 = vld [vmem:[#allocation2 + $0x118c] ss:$16 sps:$4 sm:$0xff]  }
 0x262   :  { %5140 = vmatprep.subr.bf16.mxu0 %v10153_v37  ;;  %5656 = vmatprep.subr.bf16.mxu1 %v10156_v38  ;;  %v10235_v37 = vld [vmem:[#allocation2 + $0x1180] ss:$16 sps:$4 sm:$0xff]   ;;  %v10238_v38 = vld [vmem:[#allocation2 + $0x1188] ss:$16 sps:$4 sm:$0xff]  }
 0x265   :  { %5141 = vmatpush1.bf16.msra.mxu0 %v10151_v39  ;;  %5657 = vmatpush1.bf16.msra.mxu1 %v10154_v40  ;;  %v10243_v39 = vld [vmem:[#allocation2 + $0x11a4] ss:$16 sps:$4 sm:$0xff]   ;;  %v10246_v40 = vld [vmem:[#allocation2 + $0x11ac] ss:$16 sps:$4 sm:$0xff]  }
 0x266   :  { %5142 = vmatprep.subr.bf16.mxu0 %v10159_v41  ;;  %5658 = vmatprep.subr.bf16.mxu1 %v10162_v42  ;;  %v10241_v41 = vld [vmem:[#allocation2 + $0x11a0] ss:$16 sps:$4 sm:$0xff]   ;;  %v10244_v42 = vld [vmem:[#allocation2 + $0x11a8] ss:$16 sps:$4 sm:$0xff]  }
 0x269   :  { %5143 = vmatpush1.bf16.msra.mxu0 %v10157_v43  ;;  %5659 = vmatpush1.bf16.msra.mxu1 %v10160_v44  ;;  %v10249_v43 = vld [vmem:[#allocation2 + $0x11c4] ss:$16 sps:$4 sm:$0xff]   ;;  %v10252_v44 = vld [vmem:[#allocation2 + $0x11cc] ss:$16 sps:$4 sm:$0xff]  }
 0x26a   :  { %5155 = vmatprep.subr.bf16.mxu0 %v10165_v45  ;;  %5671 = vmatprep.subr.bf16.mxu1 %v10168_v46  ;;  %v10247_v45 = vld [vmem:[#allocation2 + $0x11c0] ss:$16 sps:$4 sm:$0xff]   ;;  %v10250_v46 = vld [vmem:[#allocation2 + $0x11c8] ss:$16 sps:$4 sm:$0xff]  }
 0x26c   :  { %5145 = vmatmul.mubr.bf16.vlgmr.msra.gmra.mrb[0].mxu0 %v171_v51  ;;  %5661 = vmatmul.mubr.bf16.vlgmr.msra.gmra.mrb[0].mxu1 %v171_v51  ;;  %v10261_v51 = vld [vmem:[#allocation2 + $0x1204] ss:$16 sps:$4 sm:$0xff]  }
 0x26d   :  { %5156 = vmatpush1.bf16.msra.mxu0 %v10163_v52  ;;  %5672 = vmatpush1.bf16.msra.mxu1 %v10166_v53  ;;  %v10264_v52 = vld [vmem:[#allocation2 + $0x120c] ss:$16 sps:$4 sm:$0xff]   ;;  %v125_v53 = vld [vmem:[%s11519_s0 + $0x80] sm:$0xff] }
 0x26e   :  { %5157 = vmatprep.subr.bf16.mxu0 %v10171_v54  ;;  %5673 = vmatprep.subr.bf16.mxu1 %v10174_v55  ;;  %v149_v54 = vld [vmem:[%s11519_s0 + $0x140] sm:$0xff]  ;;  %v128_v55 = vld [vmem:[%s11519_s0 + $0x98] sm:$0xff] }
 0x26f   :  { %5187 = vmatprep.mubr.bf16.mxu0 %v174_v56  ;;  %5703 = vmatprep.mubr.bf16.mxu1 %v174_v56  ;;  %v152_v56 = vld [vmem:[%s11519_s0 + $0x158] sm:$0xff] }
 0x271   :  { %5158 = vmatpush1.bf16.msra.mxu0 %v10169_v57  ;;  %5674 = vmatpush1.bf16.msra.mxu1 %v10172_v58  ;;  %v173_v57 = vpack.c.bf16 %v149_v54, %v125_v53  ;;  %v10259_v58 = vld [vmem:[#allocation2 + $0x1200] ss:$16 sps:$4 sm:$0xff]   ;;  %v10351_v53 = vld [vmem:[#allocation2 + $0x13e4] ss:$16 sps:$4 sm:$0xff]   ;;  %v10354_v54 = vld [vmem:[#allocation2 + $0x13ec] ss:$16 sps:$4 sm:$0xff]  }
 0x272   :  { %5159 = vmatprep.subr.bf16.mxu0 %v10177_v59  ;;  %5675 = vmatprep.subr.bf16.mxu1 %v10180_v60  ;;  %v10262_v59 = vld [vmem:[#allocation2 + $0x1208] ss:$16 sps:$4 sm:$0xff]   ;;  %v10267_v60 = vld [vmem:[#allocation2 + $0x1224] ss:$16 sps:$4 sm:$0xff]  }
 0x275   :  { %5160 = vmatpush1.bf16.msra.mxu0 %v10175_v61  ;;  %5676 = vmatpush1.bf16.msra.mxu1 %v10178_v62  ;;  %v10270_v61 = vld [vmem:[#allocation2 + $0x122c] ss:$16 sps:$4 sm:$0xff]   ;;  %v176_v62 = vpack.c.bf16 %v152_v56, %v128_v55  ;;  %v10349_v55 = vld [vmem:[#allocation2 + $0x13e0] ss:$16 sps:$4 sm:$0xff]   ;;  %v10352_v56 = vld [vmem:[#allocation2 + $0x13e8] ss:$16 sps:$4 sm:$0xff]  }
 0x276   :  { %5161 = vmatprep.subr.bf16.mxu0 %v10183_v63  ;;  %5677 = vmatprep.subr.bf16.mxu1 %v10186_v0  ;;  %v10265_v63 = vld [vmem:[#allocation2 + $0x1220] ss:$16 sps:$4 sm:$0xff]   ;;  %v10268_v0 = vld [vmem:[#allocation2 + $0x1228] ss:$16 sps:$4 sm:$0xff]  }
 0x279   :  { %5162 = vmatpush1.bf16.msra.mxu0 %v10181_v1  ;;  %5678 = vmatpush1.bf16.msra.mxu1 %v10184_v2  ;;  %v10273_v1 = vld [vmem:[#allocation2 + $0x1244] ss:$16 sps:$4 sm:$0xff]   ;;  %v10276_v2 = vld [vmem:[#allocation2 + $0x124c] ss:$16 sps:$4 sm:$0xff]  }
 0x27a   :  { %5163 = vmatprep.subr.bf16.mxu0 %v10189_v3  ;;  %5679 = vmatprep.subr.bf16.mxu1 %v10192_v4  ;;  %v10271_v3 = vld [vmem:[#allocation2 + $0x1240] ss:$16 sps:$4 sm:$0xff]   ;;  %v10274_v4 = vld [vmem:[#allocation2 + $0x1248] ss:$16 sps:$4 sm:$0xff]  }
 0x27d   :  { %5164 = vmatpush1.bf16.msra.mxu0 %v10187_v5  ;;  %5680 = vmatpush1.bf16.msra.mxu1 %v10190_v6  ;;  %v10279_v5 = vld [vmem:[#allocation2 + $0x1264] ss:$16 sps:$4 sm:$0xff]   ;;  %v10282_v6 = vld [vmem:[#allocation2 + $0x126c] ss:$16 sps:$4 sm:$0xff]  }
 0x27e   :  { %5165 = vmatprep.subr.bf16.mxu0 %v10195_v7  ;;  %5681 = vmatprep.subr.bf16.mxu1 %v10198_v8  ;;  %v10277_v7 = vld [vmem:[#allocation2 + $0x1260] ss:$16 sps:$4 sm:$0xff]   ;;  %v10280_v8 = vld [vmem:[#allocation2 + $0x1268] ss:$16 sps:$4 sm:$0xff]  }
 0x281   :  { %5166 = vmatpush1.bf16.msra.mxu0 %v10193_v9  ;;  %5682 = vmatpush1.bf16.msra.mxu1 %v10196_v10  ;;  %v10285_v9 = vld [vmem:[#allocation2 + $0x1284] ss:$16 sps:$4 sm:$0xff]   ;;  %v10288_v10 = vld [vmem:[#allocation2 + $0x128c] ss:$16 sps:$4 sm:$0xff]  }
 0x282   :  { %5167 = vmatprep.subr.bf16.mxu0 %v10201_v11  ;;  %5683 = vmatprep.subr.bf16.mxu1 %v10204_v12  ;;  %v10283_v11 = vld [vmem:[#allocation2 + $0x1280] ss:$16 sps:$4 sm:$0xff]   ;;  %v10286_v12 = vld [vmem:[#allocation2 + $0x1288] ss:$16 sps:$4 sm:$0xff]  }
 0x285   :  { %5168 = vmatpush1.bf16.msra.mxu0 %v10199_v13  ;;  %5684 = vmatpush1.bf16.msra.mxu1 %v10202_v14  ;;  %v10291_v13 = vld [vmem:[#allocation2 + $0x12a4] ss:$16 sps:$4 sm:$0xff]   ;;  %v10294_v14 = vld [vmem:[#allocation2 + $0x12ac] ss:$16 sps:$4 sm:$0xff]  }
 0x286   :  { %5169 = vmatprep.subr.bf16.mxu0 %v10207_v15  ;;  %5685 = vmatprep.subr.bf16.mxu1 %v10210_v16  ;;  %v10289_v15 = vld [vmem:[#allocation2 + $0x12a0] ss:$16 sps:$4 sm:$0xff]   ;;  %v10292_v16 = vld [vmem:[#allocation2 + $0x12a8] ss:$16 sps:$4 sm:$0xff]  }
 0x289   :  { %5170 = vmatpush1.bf16.msra.mxu0 %v10205_v17  ;;  %5686 = vmatpush1.bf16.msra.mxu1 %v10208_v18  ;;  %v10297_v17 = vld [vmem:[#allocation2 + $0x12c4] ss:$16 sps:$4 sm:$0xff]   ;;  %v10300_v18 = vld [vmem:[#allocation2 + $0x12cc] ss:$16 sps:$4 sm:$0xff]  }
 0x28a   :  { %5171 = vmatprep.subr.bf16.mxu0 %v10213_v19  ;;  %5687 = vmatprep.subr.bf16.mxu1 %v10216_v20  ;;  %v10295_v19 = vld [vmem:[#allocation2 + $0x12c0] ss:$16 sps:$4 sm:$0xff]   ;;  %v10298_v20 = vld [vmem:[#allocation2 + $0x12c8] ss:$16 sps:$4 sm:$0xff]  }
 0x28d   :  { %5172 = vmatpush1.bf16.msra.mxu0 %v10211_v21  ;;  %5688 = vmatpush1.bf16.msra.mxu1 %v10214_v22  ;;  %v10303_v21 = vld [vmem:[#allocation2 + $0x12e4] ss:$16 sps:$4 sm:$0xff]   ;;  %v10306_v22 = vld [vmem:[#allocation2 + $0x12ec] ss:$16 sps:$4 sm:$0xff]  }
 0x28e   :  { %5173 = vmatprep.subr.bf16.mxu0 %v10219_v23  ;;  %5689 = vmatprep.subr.bf16.mxu1 %v10222_v24  ;;  %v10301_v23 = vld [vmem:[#allocation2 + $0x12e0] ss:$16 sps:$4 sm:$0xff]   ;;  %v10304_v24 = vld [vmem:[#allocation2 + $0x12e8] ss:$16 sps:$4 sm:$0xff]  }
 0x291   :  { %5174 = vmatpush1.bf16.msra.mxu0 %v10217_v25  ;;  %5690 = vmatpush1.bf16.msra.mxu1 %v10220_v26  ;;  %v10309_v25 = vld [vmem:[#allocation2 + $0x1304] ss:$16 sps:$4 sm:$0xff]   ;;  %v10312_v26 = vld [vmem:[#allocation2 + $0x130c] ss:$16 sps:$4 sm:$0xff]  }
 0x292   :  { %5175 = vmatprep.subr.bf16.mxu0 %v10225_v27  ;;  %5691 = vmatprep.subr.bf16.mxu1 %v10228_v28  ;;  %v10307_v27 = vld [vmem:[#allocation2 + $0x1300] ss:$16 sps:$4 sm:$0xff]   ;;  %v10310_v28 = vld [vmem:[#allocation2 + $0x1308] ss:$16 sps:$4 sm:$0xff]  }
 0x295   :  { %5176 = vmatpush1.bf16.msra.mxu0 %v10223_v29  ;;  %5692 = vmatpush1.bf16.msra.mxu1 %v10226_v30  ;;  %v10315_v29 = vld [vmem:[#allocation2 + $0x1324] ss:$16 sps:$4 sm:$0xff]   ;;  %v10318_v30 = vld [vmem:[#allocation2 + $0x132c] ss:$16 sps:$4 sm:$0xff]  }
 0x296   :  { %5177 = vmatprep.subr.bf16.mxu0 %v10231_v31  ;;  %5693 = vmatprep.subr.bf16.mxu1 %v10234_v32  ;;  %v10313_v31 = vld [vmem:[#allocation2 + $0x1320] ss:$16 sps:$4 sm:$0xff]   ;;  %v10316_v32 = vld [vmem:[#allocation2 + $0x1328] ss:$16 sps:$4 sm:$0xff]  }
 0x299   :  { %5178 = vmatpush1.bf16.msra.mxu0 %v10229_v33  ;;  %5694 = vmatpush1.bf16.msra.mxu1 %v10232_v34  ;;  %v10321_v33 = vld [vmem:[#allocation2 + $0x1344] ss:$16 sps:$4 sm:$0xff]   ;;  %v10324_v34 = vld [vmem:[#allocation2 + $0x134c] ss:$16 sps:$4 sm:$0xff]  }
 0x29a   :  { %5179 = vmatprep.subr.bf16.mxu0 %v10237_v35  ;;  %5695 = vmatprep.subr.bf16.mxu1 %v10240_v36  ;;  %v10319_v35 = vld [vmem:[#allocation2 + $0x1340] ss:$16 sps:$4 sm:$0xff]   ;;  %v10322_v36 = vld [vmem:[#allocation2 + $0x1348] ss:$16 sps:$4 sm:$0xff]  }
 0x29d   :  { %5180 = vmatpush1.bf16.msra.mxu0 %v10235_v37  ;;  %5696 = vmatpush1.bf16.msra.mxu1 %v10238_v38  ;;  %v10327_v37 = vld [vmem:[#allocation2 + $0x1364] ss:$16 sps:$4 sm:$0xff]   ;;  %v10330_v38 = vld [vmem:[#allocation2 + $0x136c] ss:$16 sps:$4 sm:$0xff]  }
 0x29e   :  { %5181 = vmatprep.subr.bf16.mxu0 %v10243_v39  ;;  %5697 = vmatprep.subr.bf16.mxu1 %v10246_v40  ;;  %v10325_v39 = vld [vmem:[#allocation2 + $0x1360] ss:$16 sps:$4 sm:$0xff]   ;;  %v10328_v40 = vld [vmem:[#allocation2 + $0x1368] ss:$16 sps:$4 sm:$0xff]  }
 0x2a1   :  { %5182 = vmatpush1.bf16.msra.mxu0 %v10241_v41  ;;  %5698 = vmatpush1.bf16.msra.mxu1 %v10244_v42  ;;  %v10333_v41 = vld [vmem:[#allocation2 + $0x1384] ss:$16 sps:$4 sm:$0xff]   ;;  %v10336_v42 = vld [vmem:[#allocation2 + $0x138c] ss:$16 sps:$4 sm:$0xff]  }
 0x2a2   :  { %5183 = vmatprep.subr.bf16.mxu0 %v10249_v43  ;;  %5699 = vmatprep.subr.bf16.mxu1 %v10252_v44  ;;  %v10331_v43 = vld [vmem:[#allocation2 + $0x1380] ss:$16 sps:$4 sm:$0xff]   ;;  %v10334_v44 = vld [vmem:[#allocation2 + $0x1388] ss:$16 sps:$4 sm:$0xff]  }
 0x2a5   :  { %5184 = vmatpush1.bf16.msra.mxu0 %v10247_v45  ;;  %5700 = vmatpush1.bf16.msra.mxu1 %v10250_v46  ;;  %v10339_v45 = vld [vmem:[#allocation2 + $0x13a4] ss:$16 sps:$4 sm:$0xff]   ;;  %v10342_v46 = vld [vmem:[#allocation2 + $0x13ac] ss:$16 sps:$4 sm:$0xff]  }
 0x2a6   :  { %5185 = vmatprep.subr.bf16.mxu0 %v10255_v47  ;;  %5701 = vmatprep.subr.bf16.mxu1 %v10258_v48  ;;  %v10337_v47 = vld [vmem:[#allocation2 + $0x13a0] ss:$16 sps:$4 sm:$0xff]   ;;  %v10340_v48 = vld [vmem:[#allocation2 + $0x13a8] ss:$16 sps:$4 sm:$0xff]  }
 0x2a9   :  { %5186 = vmatpush1.bf16.msra.mxu0 %v10253_v49  ;;  %5702 = vmatpush1.bf16.msra.mxu1 %v10256_v50  ;;  %v10345_v49 = vld [vmem:[#allocation2 + $0x13c4] ss:$16 sps:$4 sm:$0xff]   ;;  %v10348_v50 = vld [vmem:[#allocation2 + $0x13cc] ss:$16 sps:$4 sm:$0xff]  }
 0x2aa   :  { %5198 = vmatprep.subr.bf16.mxu0 %v10261_v51  ;;  %5714 = vmatprep.subr.bf16.mxu1 %v10264_v52  ;;  %v10343_v51 = vld [vmem:[#allocation2 + $0x13c0] ss:$16 sps:$4 sm:$0xff]   ;;  %v10346_v52 = vld [vmem:[#allocation2 + $0x13c8] ss:$16 sps:$4 sm:$0xff]  }
 0x2ac   :  { %5188 = vmatmul.mubr.bf16.vlgmr.msra.gmra.mrb[0].mxu0 %v173_v57  ;;  %5704 = vmatmul.mubr.bf16.vlgmr.msra.gmra.mrb[0].mxu1 %v173_v57  ;;  %v127_v57 = vld [vmem:[%s11519_s0 + $0x90] sm:$0xff] }
 0x2ad   :  { %5199 = vmatpush1.bf16.msra.mxu0 %v10259_v58  ;;  %5715 = vmatpush1.bf16.msra.mxu1 %v10262_v59  ;;  %v151_v58 = vld [vmem:[%s11519_s0 + $0x150] sm:$0xff] }
 0x2ae   :  { %5200 = vmatprep.subr.bf16.mxu0 %v10267_v60  ;;  %5716 = vmatprep.subr.bf16.mxu1 %v10270_v61  ;;  %v10357_v59 = vld [vmem:[#allocation2 + $0x1404] ss:$16 sps:$4 sm:$0xff]   ;;  %v10360_v60 = vld [vmem:[#allocation2 + $0x140c] ss:$16 sps:$4 sm:$0xff]   ;;  %v175_v61 = vpack.c.bf16 %v151_v58, %v127_v57  ;;  %v10439_v57 = vld [vmem:[#allocation2 + $0x15c0] ss:$16 sps:$4 sm:$0xff]  }
 0x2af   :  { %5230 = vmatprep.mubr.bf16.mxu0 %v176_v62  ;;  %5746 = vmatprep.mubr.bf16.mxu1 %v176_v62  ;;  %v130_v62 = vld [vmem:[%s11519_s0 + $0xa8] sm:$0xff] }
 0x2b0   :  { %v10442_v58 = vld [vmem:[#allocation2 + $0x15c8] ss:$16 sps:$4 sm:$0xff]  }
 0x2b1   :  { %5201 = vmatpush1.bf16.msra.mxu0 %v10265_v63  ;;  %5717 = vmatpush1.bf16.msra.mxu1 %v10268_v0  ;;  %v154_v63 = vld [vmem:[%s11519_s0 + $0x168] sm:$0xff]  ;;  %v10355_v0 = vld [vmem:[#allocation2 + $0x1400] ss:$16 sps:$4 sm:$0xff]  }
 0x2b2   :  { %5202 = vmatprep.subr.bf16.mxu0 %v10273_v1  ;;  %5718 = vmatprep.subr.bf16.mxu1 %v10276_v2  ;;  %v10358_v1 = vld [vmem:[#allocation2 + $0x1408] ss:$16 sps:$4 sm:$0xff]   ;;  %v10363_v2 = vld [vmem:[#allocation2 + $0x1424] ss:$16 sps:$4 sm:$0xff]  }
 0x2b5   :  { %5203 = vmatpush1.bf16.msra.mxu0 %v10271_v3  ;;  %5719 = vmatpush1.bf16.msra.mxu1 %v10274_v4  ;;  %v10366_v3 = vld [vmem:[#allocation2 + $0x142c] ss:$16 sps:$4 sm:$0xff]   ;;  %v178_v4 = vpack.c.bf16 %v154_v63, %v130_v62  ;;  %v10448_v62 = vld [vmem:[#allocation2 + $0x15e8] ss:$16 sps:$4 sm:$0xff]   ;;  %v129_v63 = vld [vmem:[%s11519_s0 + $0xa0] sm:$0xff] }
 0x2b6   :  { %5204 = vmatprep.subr.bf16.mxu0 %v10279_v5  ;;  %5720 = vmatprep.subr.bf16.mxu1 %v10282_v6  ;;  %v10361_v5 = vld [vmem:[#allocation2 + $0x1420] ss:$16 sps:$4 sm:$0xff]   ;;  %v10364_v6 = vld [vmem:[#allocation2 + $0x1428] ss:$16 sps:$4 sm:$0xff]  }
 0x2b9   :  { %5205 = vmatpush1.bf16.msra.mxu0 %v10277_v7  ;;  %5721 = vmatpush1.bf16.msra.mxu1 %v10280_v8  ;;  %v10369_v7 = vld [vmem:[#allocation2 + $0x1444] ss:$16 sps:$4 sm:$0xff]   ;;  %v10372_v8 = vld [vmem:[#allocation2 + $0x144c] ss:$16 sps:$4 sm:$0xff]  }
 0x2ba   :  { %5206 = vmatprep.subr.bf16.mxu0 %v10285_v9  ;;  %5722 = vmatprep.subr.bf16.mxu1 %v10288_v10  ;;  %v10367_v9 = vld [vmem:[#allocation2 + $0x1440] ss:$16 sps:$4 sm:$0xff]   ;;  %v10370_v10 = vld [vmem:[#allocation2 + $0x1448] ss:$16 sps:$4 sm:$0xff]  }
 0x2bd   :  { %5207 = vmatpush1.bf16.msra.mxu0 %v10283_v11  ;;  %5723 = vmatpush1.bf16.msra.mxu1 %v10286_v12  ;;  %v10375_v11 = vld [vmem:[#allocation2 + $0x1464] ss:$16 sps:$4 sm:$0xff]   ;;  %v10378_v12 = vld [vmem:[#allocation2 + $0x146c] ss:$16 sps:$4 sm:$0xff]  }
 0x2be   :  { %5208 = vmatprep.subr.bf16.mxu0 %v10291_v13  ;;  %5724 = vmatprep.subr.bf16.mxu1 %v10294_v14  ;;  %v10373_v13 = vld [vmem:[#allocation2 + $0x1460] ss:$16 sps:$4 sm:$0xff]   ;;  %v10376_v14 = vld [vmem:[#allocation2 + $0x1468] ss:$16 sps:$4 sm:$0xff]  }
 0x2c1   :  { %5209 = vmatpush1.bf16.msra.mxu0 %v10289_v15  ;;  %5725 = vmatpush1.bf16.msra.mxu1 %v10292_v16  ;;  %v10381_v15 = vld [vmem:[#allocation2 + $0x1484] ss:$16 sps:$4 sm:$0xff]   ;;  %v10384_v16 = vld [vmem:[#allocation2 + $0x148c] ss:$16 sps:$4 sm:$0xff]  }
 0x2c2   :  { %5210 = vmatprep.subr.bf16.mxu0 %v10297_v17  ;;  %5726 = vmatprep.subr.bf16.mxu1 %v10300_v18  ;;  %v10379_v17 = vld [vmem:[#allocation2 + $0x1480] ss:$16 sps:$4 sm:$0xff]   ;;  %v10382_v18 = vld [vmem:[#allocation2 + $0x1488] ss:$16 sps:$4 sm:$0xff]  }
 0x2c5   :  { %5211 = vmatpush1.bf16.msra.mxu0 %v10295_v19  ;;  %5727 = vmatpush1.bf16.msra.mxu1 %v10298_v20  ;;  %v10387_v19 = vld [vmem:[#allocation2 + $0x14a4] ss:$16 sps:$4 sm:$0xff]   ;;  %v10390_v20 = vld [vmem:[#allocation2 + $0x14ac] ss:$16 sps:$4 sm:$0xff]  }
 0x2c6   :  { %5212 = vmatprep.subr.bf16.mxu0 %v10303_v21  ;;  %5728 = vmatprep.subr.bf16.mxu1 %v10306_v22  ;;  %v10385_v21 = vld [vmem:[#allocation2 + $0x14a0] ss:$16 sps:$4 sm:$0xff]   ;;  %v10388_v22 = vld [vmem:[#allocation2 + $0x14a8] ss:$16 sps:$4 sm:$0xff]  }
 0x2c9   :  { %5213 = vmatpush1.bf16.msra.mxu0 %v10301_v23  ;;  %5729 = vmatpush1.bf16.msra.mxu1 %v10304_v24  ;;  %v10393_v23 = vld [vmem:[#allocation2 + $0x14c4] ss:$16 sps:$4 sm:$0xff]   ;;  %v10396_v24 = vld [vmem:[#allocation2 + $0x14cc] ss:$16 sps:$4 sm:$0xff]  }
 0x2ca   :  { %5214 = vmatprep.subr.bf16.mxu0 %v10309_v25  ;;  %5730 = vmatprep.subr.bf16.mxu1 %v10312_v26  ;;  %v10391_v25 = vld [vmem:[#allocation2 + $0x14c0] ss:$16 sps:$4 sm:$0xff]   ;;  %v10394_v26 = vld [vmem:[#allocation2 + $0x14c8] ss:$16 sps:$4 sm:$0xff]  }
 0x2cd   :  { %5215 = vmatpush1.bf16.msra.mxu0 %v10307_v27  ;;  %5731 = vmatpush1.bf16.msra.mxu1 %v10310_v28  ;;  %v10399_v27 = vld [vmem:[#allocation2 + $0x14e4] ss:$16 sps:$4 sm:$0xff]   ;;  %v10402_v28 = vld [vmem:[#allocation2 + $0x14ec] ss:$16 sps:$4 sm:$0xff]  }
 0x2ce   :  { %5216 = vmatprep.subr.bf16.mxu0 %v10315_v29  ;;  %5732 = vmatprep.subr.bf16.mxu1 %v10318_v30  ;;  %v10397_v29 = vld [vmem:[#allocation2 + $0x14e0] ss:$16 sps:$4 sm:$0xff]   ;;  %v10400_v30 = vld [vmem:[#allocation2 + $0x14e8] ss:$16 sps:$4 sm:$0xff]  }
 0x2d1   :  { %5217 = vmatpush1.bf16.msra.mxu0 %v10313_v31  ;;  %5733 = vmatpush1.bf16.msra.mxu1 %v10316_v32  ;;  %v10405_v31 = vld [vmem:[#allocation2 + $0x1504] ss:$16 sps:$4 sm:$0xff]   ;;  %v10408_v32 = vld [vmem:[#allocation2 + $0x150c] ss:$16 sps:$4 sm:$0xff]  }
 0x2d2   :  { %5218 = vmatprep.subr.bf16.mxu0 %v10321_v33  ;;  %5734 = vmatprep.subr.bf16.mxu1 %v10324_v34  ;;  %v10403_v33 = vld [vmem:[#allocation2 + $0x1500] ss:$16 sps:$4 sm:$0xff]   ;;  %v10406_v34 = vld [vmem:[#allocation2 + $0x1508] ss:$16 sps:$4 sm:$0xff]  }
 0x2d5   :  { %5219 = vmatpush1.bf16.msra.mxu0 %v10319_v35  ;;  %5735 = vmatpush1.bf16.msra.mxu1 %v10322_v36  ;;  %v10411_v35 = vld [vmem:[#allocation2 + $0x1524] ss:$16 sps:$4 sm:$0xff]   ;;  %v10414_v36 = vld [vmem:[#allocation2 + $0x152c] ss:$16 sps:$4 sm:$0xff]  }
 0x2d6   :  { %5220 = vmatprep.subr.bf16.mxu0 %v10327_v37  ;;  %5736 = vmatprep.subr.bf16.mxu1 %v10330_v38  ;;  %v10409_v37 = vld [vmem:[#allocation2 + $0x1520] ss:$16 sps:$4 sm:$0xff]   ;;  %v10412_v38 = vld [vmem:[#allocation2 + $0x1528] ss:$16 sps:$4 sm:$0xff]  }
 0x2d9   :  { %5221 = vmatpush1.bf16.msra.mxu0 %v10325_v39  ;;  %5737 = vmatpush1.bf16.msra.mxu1 %v10328_v40  ;;  %v10417_v39 = vld [vmem:[#allocation2 + $0x1544] ss:$16 sps:$4 sm:$0xff]   ;;  %v10420_v40 = vld [vmem:[#allocation2 + $0x154c] ss:$16 sps:$4 sm:$0xff]  }
 0x2da   :  { %5222 = vmatprep.subr.bf16.mxu0 %v10333_v41  ;;  %5738 = vmatprep.subr.bf16.mxu1 %v10336_v42  ;;  %v10415_v41 = vld [vmem:[#allocation2 + $0x1540] ss:$16 sps:$4 sm:$0xff]   ;;  %v10418_v42 = vld [vmem:[#allocation2 + $0x1548] ss:$16 sps:$4 sm:$0xff]  }
 0x2dd   :  { %5223 = vmatpush1.bf16.msra.mxu0 %v10331_v43  ;;  %5739 = vmatpush1.bf16.msra.mxu1 %v10334_v44  ;;  %v10423_v43 = vld [vmem:[#allocation2 + $0x1564] ss:$16 sps:$4 sm:$0xff]   ;;  %v10426_v44 = vld [vmem:[#allocation2 + $0x156c] ss:$16 sps:$4 sm:$0xff]  }
 0x2de   :  { %5224 = vmatprep.subr.bf16.mxu0 %v10339_v45  ;;  %5740 = vmatprep.subr.bf16.mxu1 %v10342_v46  ;;  %v10421_v45 = vld [vmem:[#allocation2 + $0x1560] ss:$16 sps:$4 sm:$0xff]   ;;  %v10424_v46 = vld [vmem:[#allocation2 + $0x1568] ss:$16 sps:$4 sm:$0xff]  }
 0x2e1   :  { %5225 = vmatpush1.bf16.msra.mxu0 %v10337_v47  ;;  %5741 = vmatpush1.bf16.msra.mxu1 %v10340_v48  ;;  %v10429_v47 = vld [vmem:[#allocation2 + $0x1584] ss:$16 sps:$4 sm:$0xff]   ;;  %v10432_v48 = vld [vmem:[#allocation2 + $0x158c] ss:$16 sps:$4 sm:$0xff]  }
 0x2e2   :  { %5226 = vmatprep.subr.bf16.mxu0 %v10345_v49  ;;  %5742 = vmatprep.subr.bf16.mxu1 %v10348_v50  ;;  %v10427_v49 = vld [vmem:[#allocation2 + $0x1580] ss:$16 sps:$4 sm:$0xff]   ;;  %v10430_v50 = vld [vmem:[#allocation2 + $0x1588] ss:$16 sps:$4 sm:$0xff]  }
 0x2e5   :  { %5227 = vmatpush1.bf16.msra.mxu0 %v10343_v51  ;;  %5743 = vmatpush1.bf16.msra.mxu1 %v10346_v52  ;;  %v10435_v51 = vld [vmem:[#allocation2 + $0x15a4] ss:$16 sps:$4 sm:$0xff]   ;;  %v10438_v52 = vld [vmem:[#allocation2 + $0x15ac] ss:$16 sps:$4 sm:$0xff]  }
 0x2e6   :  { %5228 = vmatprep.subr.bf16.mxu0 %v10351_v53  ;;  %5744 = vmatprep.subr.bf16.mxu1 %v10354_v54  ;;  %v10433_v53 = vld [vmem:[#allocation2 + $0x15a0] ss:$16 sps:$4 sm:$0xff]   ;;  %v10436_v54 = vld [vmem:[#allocation2 + $0x15a8] ss:$16 sps:$4 sm:$0xff]  }
 0x2e9   :  { %5229 = vmatpush1.bf16.msra.mxu0 %v10349_v55  ;;  %5745 = vmatpush1.bf16.msra.mxu1 %v10352_v56  ;;  %v10441_v55 = vld [vmem:[#allocation2 + $0x15c4] ss:$16 sps:$4 sm:$0xff]   ;;  %v10444_v56 = vld [vmem:[#allocation2 + $0x15cc] ss:$16 sps:$4 sm:$0xff]  }
 0x2ea   :  { %5241 = vmatprep.subr.bf16.mxu0 %v10357_v59  ;;  %5757 = vmatprep.subr.bf16.mxu1 %v10360_v60  ;;  %v10447_v59 = vld [vmem:[#allocation2 + $0x15e4] ss:$16 sps:$4 sm:$0xff]   ;;  %v10450_v60 = vld [vmem:[#allocation2 + $0x15ec] ss:$16 sps:$4 sm:$0xff]  }
 0x2ec   :  { %5231 = vmatmul.mubr.bf16.vlgmr.msra.gmra.mrb[0].mxu0 %v175_v61  ;;  %5747 = vmatmul.mubr.bf16.vlgmr.msra.gmra.mrb[0].mxu1 %v175_v61  ;;  %v10445_v61 = vld [vmem:[#allocation2 + $0x15e0] ss:$16 sps:$4 sm:$0xff]  }
 0x2ed   :  { %5242 = vmatpush1.bf16.msra.mxu0 %v10355_v0  ;;  %5758 = vmatpush1.bf16.msra.mxu1 %v10358_v1  ;;  %v153_v0 = vld [vmem:[%s11519_s0 + $0x160] sm:$0xff] }
 0x2ee   :  { %5243 = vmatprep.subr.bf16.mxu0 %v10363_v2  ;;  %5759 = vmatprep.subr.bf16.mxu1 %v10366_v3  ;;  %v10453_v1 = vld [vmem:[#allocation2 + $0x1604] ss:$16 sps:$4 sm:$0xff]   ;;  %v10456_v2 = vld [vmem:[#allocation2 + $0x160c] ss:$16 sps:$4 sm:$0xff]   ;;  %v177_v3 = vpack.c.bf16 %v153_v0, %v129_v63  ;;  %v10535_v63 = vld [vmem:[#allocation2 + $0x17c0] ss:$16 sps:$4 sm:$0xff]  }
 0x2ef   :  { %5273 = vmatprep.mubr.bf16.mxu0 %v178_v4  ;;  %5789 = vmatprep.mubr.bf16.mxu1 %v178_v4  ;;  %v132_v4 = vld [vmem:[%s11519_s0 + $0xb8] sm:$0xff] }
 0x2f0   :  { %v10538_v0 = vld [vmem:[#allocation2 + $0x17c8] ss:$16 sps:$4 sm:$0xff]  }
 0x2f1   :  { %5244 = vmatpush1.bf16.msra.mxu0 %v10361_v5  ;;  %5760 = vmatpush1.bf16.msra.mxu1 %v10364_v6  ;;  %v156_v5 = vld [vmem:[%s11519_s0 + $0x178] sm:$0xff]  ;;  %v10451_v6 = vld [vmem:[#allocation2 + $0x1600] ss:$16 sps:$4 sm:$0xff]  }
 0x2f2   :  { %5245 = vmatprep.subr.bf16.mxu0 %v10369_v7  ;;  %5761 = vmatprep.subr.bf16.mxu1 %v10372_v8  ;;  %v10454_v7 = vld [vmem:[#allocation2 + $0x1608] ss:$16 sps:$4 sm:$0xff]   ;;  %v10459_v8 = vld [vmem:[#allocation2 + $0x1624] ss:$16 sps:$4 sm:$0xff]  }
 0x2f5   :  { %5246 = vmatpush1.bf16.msra.mxu0 %v10367_v9  ;;  %5762 = vmatpush1.bf16.msra.mxu1 %v10370_v10  ;;  %v10462_v9 = vld [vmem:[#allocation2 + $0x162c] ss:$16 sps:$4 sm:$0xff]   ;;  %v180_v10 = vpack.c.bf16 %v156_v5, %v132_v4  ;;  %v10544_v4 = vld [vmem:[#allocation2 + $0x17e8] ss:$16 sps:$4 sm:$0xff]   ;;  %v131_v5 = vld [vmem:[%s11519_s0 + $0xb0] sm:$0xff] }
 0x2f6   :  { %5247 = vmatprep.subr.bf16.mxu0 %v10375_v11  ;;  %5763 = vmatprep.subr.bf16.mxu1 %v10378_v12  ;;  %v10457_v11 = vld [vmem:[#allocation2 + $0x1620] ss:$16 sps:$4 sm:$0xff]   ;;  %v10460_v12 = vld [vmem:[#allocation2 + $0x1628] ss:$16 sps:$4 sm:$0xff]  }
 0x2f9   :  { %5248 = vmatpush1.bf16.msra.mxu0 %v10373_v13  ;;  %5764 = vmatpush1.bf16.msra.mxu1 %v10376_v14  ;;  %v10465_v13 = vld [vmem:[#allocation2 + $0x1644] ss:$16 sps:$4 sm:$0xff]   ;;  %v10468_v14 = vld [vmem:[#allocation2 + $0x164c] ss:$16 sps:$4 sm:$0xff]  }
 0x2fa   :  { %5249 = vmatprep.subr.bf16.mxu0 %v10381_v15  ;;  %5765 = vmatprep.subr.bf16.mxu1 %v10384_v16  ;;  %v10463_v15 = vld [vmem:[#allocation2 + $0x1640] ss:$16 sps:$4 sm:$0xff]   ;;  %v10466_v16 = vld [vmem:[#allocation2 + $0x1648] ss:$16 sps:$4 sm:$0xff]  }
 0x2fd   :  { %5250 = vmatpush1.bf16.msra.mxu0 %v10379_v17  ;;  %5766 = vmatpush1.bf16.msra.mxu1 %v10382_v18  ;;  %v10471_v17 = vld [vmem:[#allocation2 + $0x1664] ss:$16 sps:$4 sm:$0xff]   ;;  %v10474_v18 = vld [vmem:[#allocation2 + $0x166c] ss:$16 sps:$4 sm:$0xff]  }
 0x2fe   :  { %5251 = vmatprep.subr.bf16.mxu0 %v10387_v19  ;;  %5767 = vmatprep.subr.bf16.mxu1 %v10390_v20  ;;  %v10469_v19 = vld [vmem:[#allocation2 + $0x1660] ss:$16 sps:$4 sm:$0xff]   ;;  %v10472_v20 = vld [vmem:[#allocation2 + $0x1668] ss:$16 sps:$4 sm:$0xff]  }
 0x301   :  { %5252 = vmatpush1.bf16.msra.mxu0 %v10385_v21  ;;  %5768 = vmatpush1.bf16.msra.mxu1 %v10388_v22  ;;  %v10477_v21 = vld [vmem:[#allocation2 + $0x1684] ss:$16 sps:$4 sm:$0xff]   ;;  %v10480_v22 = vld [vmem:[#allocation2 + $0x168c] ss:$16 sps:$4 sm:$0xff]  }
 0x302   :  { %5253 = vmatprep.subr.bf16.mxu0 %v10393_v23  ;;  %5769 = vmatprep.subr.bf16.mxu1 %v10396_v24  ;;  %v10475_v23 = vld [vmem:[#allocation2 + $0x1680] ss:$16 sps:$4 sm:$0xff]   ;;  %v10478_v24 = vld [vmem:[#allocation2 + $0x1688] ss:$16 sps:$4 sm:$0xff]  }
 0x305   :  { %5254 = vmatpush1.bf16.msra.mxu0 %v10391_v25  ;;  %5770 = vmatpush1.bf16.msra.mxu1 %v10394_v26  ;;  %v10483_v25 = vld [vmem:[#allocation2 + $0x16a4] ss:$16 sps:$4 sm:$0xff]   ;;  %v10486_v26 = vld [vmem:[#allocation2 + $0x16ac] ss:$16 sps:$4 sm:$0xff]  }
 0x306   :  { %5255 = vmatprep.subr.bf16.mxu0 %v10399_v27  ;;  %5771 = vmatprep.subr.bf16.mxu1 %v10402_v28  ;;  %v10481_v27 = vld [vmem:[#allocation2 + $0x16a0] ss:$16 sps:$4 sm:$0xff]   ;;  %v10484_v28 = vld [vmem:[#allocation2 + $0x16a8] ss:$16 sps:$4 sm:$0xff]  }
 0x309   :  { %5256 = vmatpush1.bf16.msra.mxu0 %v10397_v29  ;;  %5772 = vmatpush1.bf16.msra.mxu1 %v10400_v30  ;;  %v10489_v29 = vld [vmem:[#allocation2 + $0x16c4] ss:$16 sps:$4 sm:$0xff]   ;;  %v10492_v30 = vld [vmem:[#allocation2 + $0x16cc] ss:$16 sps:$4 sm:$0xff]  }
 0x30a   :  { %5257 = vmatprep.subr.bf16.mxu0 %v10405_v31  ;;  %5773 = vmatprep.subr.bf16.mxu1 %v10408_v32  ;;  %v10487_v31 = vld [vmem:[#allocation2 + $0x16c0] ss:$16 sps:$4 sm:$0xff]   ;;  %v10490_v32 = vld [vmem:[#allocation2 + $0x16c8] ss:$16 sps:$4 sm:$0xff]  }
 0x30d   :  { %5258 = vmatpush1.bf16.msra.mxu0 %v10403_v33  ;;  %5774 = vmatpush1.bf16.msra.mxu1 %v10406_v34  ;;  %v10495_v33 = vld [vmem:[#allocation2 + $0x16e4] ss:$16 sps:$4 sm:$0xff]   ;;  %v10498_v34 = vld [vmem:[#allocation2 + $0x16ec] ss:$16 sps:$4 sm:$0xff]  }
 0x30e   :  { %5259 = vmatprep.subr.bf16.mxu0 %v10411_v35  ;;  %5775 = vmatprep.subr.bf16.mxu1 %v10414_v36  ;;  %v10493_v35 = vld [vmem:[#allocation2 + $0x16e0] ss:$16 sps:$4 sm:$0xff]   ;;  %v10496_v36 = vld [vmem:[#allocation2 + $0x16e8] ss:$16 sps:$4 sm:$0xff]  }
 0x311   :  { %5260 = vmatpush1.bf16.msra.mxu0 %v10409_v37  ;;  %5776 = vmatpush1.bf16.msra.mxu1 %v10412_v38  ;;  %v10501_v37 = vld [vmem:[#allocation2 + $0x1704] ss:$16 sps:$4 sm:$0xff]   ;;  %v10504_v38 = vld [vmem:[#allocation2 + $0x170c] ss:$16 sps:$4 sm:$0xff]  }
 0x312   :  { %5261 = vmatprep.subr.bf16.mxu0 %v10417_v39  ;;  %5777 = vmatprep.subr.bf16.mxu1 %v10420_v40  ;;  %v10499_v39 = vld [vmem:[#allocation2 + $0x1700] ss:$16 sps:$4 sm:$0xff]   ;;  %v10502_v40 = vld [vmem:[#allocation2 + $0x1708] ss:$16 sps:$4 sm:$0xff]  }
 0x315   :  { %5262 = vmatpush1.bf16.msra.mxu0 %v10415_v41  ;;  %5778 = vmatpush1.bf16.msra.mxu1 %v10418_v42  ;;  %v10507_v41 = vld [vmem:[#allocation2 + $0x1724] ss:$16 sps:$4 sm:$0xff]   ;;  %v10510_v42 = vld [vmem:[#allocation2 + $0x172c] ss:$16 sps:$4 sm:$0xff]  }
 0x316   :  { %5263 = vmatprep.subr.bf16.mxu0 %v10423_v43  ;;  %5779 = vmatprep.subr.bf16.mxu1 %v10426_v44  ;;  %v10505_v43 = vld [vmem:[#allocation2 + $0x1720] ss:$16 sps:$4 sm:$0xff]   ;;  %v10508_v44 = vld [vmem:[#allocation2 + $0x1728] ss:$16 sps:$4 sm:$0xff]  }
 0x319   :  { %5264 = vmatpush1.bf16.msra.mxu0 %v10421_v45  ;;  %5780 = vmatpush1.bf16.msra.mxu1 %v10424_v46  ;;  %v10513_v45 = vld [vmem:[#allocation2 + $0x1744] ss:$16 sps:$4 sm:$0xff]   ;;  %v10516_v46 = vld [vmem:[#allocation2 + $0x174c] ss:$16 sps:$4 sm:$0xff]  }
 0x31a   :  { %5265 = vmatprep.subr.bf16.mxu0 %v10429_v47  ;;  %5781 = vmatprep.subr.bf16.mxu1 %v10432_v48  ;;  %v10511_v47 = vld [vmem:[#allocation2 + $0x1740] ss:$16 sps:$4 sm:$0xff]   ;;  %v10514_v48 = vld [vmem:[#allocation2 + $0x1748] ss:$16 sps:$4 sm:$0xff]  }
 0x31d   :  { %5266 = vmatpush1.bf16.msra.mxu0 %v10427_v49  ;;  %5782 = vmatpush1.bf16.msra.mxu1 %v10430_v50  ;;  %v10519_v49 = vld [vmem:[#allocation2 + $0x1764] ss:$16 sps:$4 sm:$0xff]   ;;  %v10522_v50 = vld [vmem:[#allocation2 + $0x176c] ss:$16 sps:$4 sm:$0xff]  }
 0x31e   :  { %5267 = vmatprep.subr.bf16.mxu0 %v10435_v51  ;;  %5783 = vmatprep.subr.bf16.mxu1 %v10438_v52  ;;  %v10517_v51 = vld [vmem:[#allocation2 + $0x1760] ss:$16 sps:$4 sm:$0xff]   ;;  %v10520_v52 = vld [vmem:[#allocation2 + $0x1768] ss:$16 sps:$4 sm:$0xff]  }
 0x321   :  { %5268 = vmatpush1.bf16.msra.mxu0 %v10433_v53  ;;  %5784 = vmatpush1.bf16.msra.mxu1 %v10436_v54  ;;  %v10525_v53 = vld [vmem:[#allocation2 + $0x1784] ss:$16 sps:$4 sm:$0xff]   ;;  %v10528_v54 = vld [vmem:[#allocation2 + $0x178c] ss:$16 sps:$4 sm:$0xff]  }
 0x322   :  { %5269 = vmatprep.subr.bf16.mxu0 %v10441_v55  ;;  %5785 = vmatprep.subr.bf16.mxu1 %v10444_v56  ;;  %v10523_v55 = vld [vmem:[#allocation2 + $0x1780] ss:$16 sps:$4 sm:$0xff]   ;;  %v10526_v56 = vld [vmem:[#allocation2 + $0x1788] ss:$16 sps:$4 sm:$0xff]  }
 0x325   :  { %5270 = vmatpush1.bf16.msra.mxu0 %v10439_v57  ;;  %5786 = vmatpush1.bf16.msra.mxu1 %v10442_v58  ;;  %v10531_v57 = vld [vmem:[#allocation2 + $0x17a4] ss:$16 sps:$4 sm:$0xff]   ;;  %v10534_v58 = vld [vmem:[#allocation2 + $0x17ac] ss:$16 sps:$4 sm:$0xff]  }
 0x326   :  { %5271 = vmatprep.subr.bf16.mxu0 %v10447_v59  ;;  %5787 = vmatprep.subr.bf16.mxu1 %v10450_v60  ;;  %v10529_v59 = vld [vmem:[#allocation2 + $0x17a0] ss:$16 sps:$4 sm:$0xff]   ;;  %v10532_v60 = vld [vmem:[#allocation2 + $0x17a8] ss:$16 sps:$4 sm:$0xff]  }
 0x329   :  { %5272 = vmatpush1.bf16.msra.mxu0 %v10445_v61  ;;  %5788 = vmatpush1.bf16.msra.mxu1 %v10448_v62  ;;  %v10537_v61 = vld [vmem:[#allocation2 + $0x17c4] ss:$16 sps:$4 sm:$0xff]   ;;  %v10540_v62 = vld [vmem:[#allocation2 + $0x17cc] ss:$16 sps:$4 sm:$0xff]  }
 0x32a   :  { %5284 = vmatprep.subr.bf16.mxu0 %v10453_v1  ;;  %5800 = vmatprep.subr.bf16.mxu1 %v10456_v2  ;;  %v10543_v1 = vld [vmem:[#allocation2 + $0x17e4] ss:$16 sps:$4 sm:$0xff]   ;;  %v10546_v2 = vld [vmem:[#allocation2 + $0x17ec] ss:$16 sps:$4 sm:$0xff]  }
 0x32c   :  { %5274 = vmatmul.mubr.bf16.vlgmr.msra.gmra.mrb[0].mxu0 %v177_v3  ;;  %5790 = vmatmul.mubr.bf16.vlgmr.msra.gmra.mrb[0].mxu1 %v177_v3  ;;  %v10541_v3 = vld [vmem:[#allocation2 + $0x17e0] ss:$16 sps:$4 sm:$0xff]  }
 0x32d   :  { %5285 = vmatpush1.bf16.msra.mxu0 %v10451_v6  ;;  %5801 = vmatpush1.bf16.msra.mxu1 %v10454_v7  ;;  %v155_v6 = vld [vmem:[%s11519_s0 + $0x170] sm:$0xff]  ;;  %v10549_v7 = vld [vmem:[#allocation6 + $0x4] ss:$16 sps:$4 sm:$0xff]  }
 0x32e   :  { %5286 = vmatprep.subr.bf16.mxu0 %v10459_v8  ;;  %5802 = vmatprep.subr.bf16.mxu1 %v10462_v9  ;;  %v10552_v8 = vld [vmem:[#allocation6 + $0xc] ss:$16 sps:$4 sm:$0xff]   ;;  %v179_v9 = vpack.c.bf16 %v155_v6, %v131_v5  ;;  %v10637_v6 = vld [vmem:[#allocation6 + $0x1e0] ss:$16 sps:$4 sm:$0xff]  }
 0x32f   :  { %5316 = vmatprep.mubr.bf16.mxu0 %v180_v10  ;;  %5832 = vmatprep.mubr.bf16.mxu1 %v180_v10  ;;  %v10547_v10 = vld [vmem:[#allocation6] ss:$16 sps:$4 sm:$0xff]   ;;  %v10642_v5 = vld [vmem:[#allocation6 + $0x1ec] ss:$16 sps:$4 sm:$0xff]  }
 0x331   :  { %5287 = vmatpush1.bf16.msra.mxu0 %v10457_v11  ;;  %5803 = vmatpush1.bf16.msra.mxu1 %v10460_v12  ;;  %v10550_v11 = vld [vmem:[#allocation6 + $0x8] ss:$16 sps:$4 sm:$0xff]   ;;  %v10555_v12 = vld [vmem:[#allocation6 + $0x24] ss:$16 sps:$4 sm:$0xff]  }
 0x332   :  { %5288 = vmatprep.subr.bf16.mxu0 %v10465_v13  ;;  %5804 = vmatprep.subr.bf16.mxu1 %v10468_v14  ;;  %v10558_v13 = vld [vmem:[#allocation6 + $0x2c] ss:$16 sps:$4 sm:$0xff]   ;;  %v10553_v14 = vld [vmem:[#allocation6 + $0x20] ss:$16 sps:$4 sm:$0xff]  }
 0x335   :  { %5289 = vmatpush1.bf16.msra.mxu0 %v10463_v15  ;;  %5805 = vmatpush1.bf16.msra.mxu1 %v10466_v16  ;;  %v10556_v15 = vld [vmem:[#allocation6 + $0x28] ss:$16 sps:$4 sm:$0xff]   ;;  %v10561_v16 = vld [vmem:[#allocation6 + $0x44] ss:$16 sps:$4 sm:$0xff]  }
 0x336   :  { %5290 = vmatprep.subr.bf16.mxu0 %v10471_v17  ;;  %5806 = vmatprep.subr.bf16.mxu1 %v10474_v18  ;;  %v10564_v17 = vld [vmem:[#allocation6 + $0x4c] ss:$16 sps:$4 sm:$0xff]   ;;  %v10559_v18 = vld [vmem:[#allocation6 + $0x40] ss:$16 sps:$4 sm:$0xff]  }
 0x339   :  { %5291 = vmatpush1.bf16.msra.mxu0 %v10469_v19  ;;  %5807 = vmatpush1.bf16.msra.mxu1 %v10472_v20  ;;  %v10562_v19 = vld [vmem:[#allocation6 + $0x48] ss:$16 sps:$4 sm:$0xff]   ;;  %v10567_v20 = vld [vmem:[#allocation6 + $0x64] ss:$16 sps:$4 sm:$0xff]  }
 0x33a   :  { %5292 = vmatprep.subr.bf16.mxu0 %v10477_v21  ;;  %5808 = vmatprep.subr.bf16.mxu1 %v10480_v22  ;;  %v10570_v21 = vld [vmem:[#allocation6 + $0x6c] ss:$16 sps:$4 sm:$0xff]   ;;  %v10565_v22 = vld [vmem:[#allocation6 + $0x60] ss:$16 sps:$4 sm:$0xff]  }
 0x33d   :  { %5293 = vmatpush1.bf16.msra.mxu0 %v10475_v23  ;;  %5809 = vmatpush1.bf16.msra.mxu1 %v10478_v24  ;;  %v10568_v23 = vld [vmem:[#allocation6 + $0x68] ss:$16 sps:$4 sm:$0xff]   ;;  %v10573_v24 = vld [vmem:[#allocation6 + $0x84] ss:$16 sps:$4 sm:$0xff]  }
 0x33e   :  { %5294 = vmatprep.subr.bf16.mxu0 %v10483_v25  ;;  %5810 = vmatprep.subr.bf16.mxu1 %v10486_v26  ;;  %v10576_v25 = vld [vmem:[#allocation6 + $0x8c] ss:$16 sps:$4 sm:$0xff]   ;;  %v10571_v26 = vld [vmem:[#allocation6 + $0x80] ss:$16 sps:$4 sm:$0xff]  }
 0x341   :  { %5295 = vmatpush1.bf16.msra.mxu0 %v10481_v27  ;;  %5811 = vmatpush1.bf16.msra.mxu1 %v10484_v28  ;;  %v10574_v27 = vld [vmem:[#allocation6 + $0x88] ss:$16 sps:$4 sm:$0xff]   ;;  %v10579_v28 = vld [vmem:[#allocation6 + $0xa4] ss:$16 sps:$4 sm:$0xff]  }
 0x342   :  { %5296 = vmatprep.subr.bf16.mxu0 %v10489_v29  ;;  %5812 = vmatprep.subr.bf16.mxu1 %v10492_v30  ;;  %v10582_v29 = vld [vmem:[#allocation6 + $0xac] ss:$16 sps:$4 sm:$0xff]   ;;  %v10577_v30 = vld [vmem:[#allocation6 + $0xa0] ss:$16 sps:$4 sm:$0xff]  }
 0x345   :  { %5297 = vmatpush1.bf16.msra.mxu0 %v10487_v31  ;;  %5813 = vmatpush1.bf16.msra.mxu1 %v10490_v32  ;;  %v10580_v31 = vld [vmem:[#allocation6 + $0xa8] ss:$16 sps:$4 sm:$0xff]   ;;  %v10585_v32 = vld [vmem:[#allocation6 + $0xc4] ss:$16 sps:$4 sm:$0xff]  }
 0x346   :  { %5298 = vmatprep.subr.bf16.mxu0 %v10495_v33  ;;  %5814 = vmatprep.subr.bf16.mxu1 %v10498_v34  ;;  %v10588_v33 = vld [vmem:[#allocation6 + $0xcc] ss:$16 sps:$4 sm:$0xff]   ;;  %v10583_v34 = vld [vmem:[#allocation6 + $0xc0] ss:$16 sps:$4 sm:$0xff]  }
 0x349   :  { %5299 = vmatpush1.bf16.msra.mxu0 %v10493_v35  ;;  %5815 = vmatpush1.bf16.msra.mxu1 %v10496_v36  ;;  %v10586_v35 = vld [vmem:[#allocation6 + $0xc8] ss:$16 sps:$4 sm:$0xff]   ;;  %v10591_v36 = vld [vmem:[#allocation6 + $0xe4] ss:$16 sps:$4 sm:$0xff]  }
 0x34a   :  { %5300 = vmatprep.subr.bf16.mxu0 %v10501_v37  ;;  %5816 = vmatprep.subr.bf16.mxu1 %v10504_v38  ;;  %v10594_v37 = vld [vmem:[#allocation6 + $0xec] ss:$16 sps:$4 sm:$0xff]   ;;  %v10589_v38 = vld [vmem:[#allocation6 + $0xe0] ss:$16 sps:$4 sm:$0xff]  }
 0x34d   :  { %5301 = vmatpush1.bf16.msra.mxu0 %v10499_v39  ;;  %5817 = vmatpush1.bf16.msra.mxu1 %v10502_v40  ;;  %v10592_v39 = vld [vmem:[#allocation6 + $0xe8] ss:$16 sps:$4 sm:$0xff]   ;;  %v10597_v40 = vld [vmem:[#allocation6 + $0x104] ss:$16 sps:$4 sm:$0xff]  }
 0x34e   :  { %5302 = vmatprep.subr.bf16.mxu0 %v10507_v41  ;;  %5818 = vmatprep.subr.bf16.mxu1 %v10510_v42  ;;  %v10600_v41 = vld [vmem:[#allocation6 + $0x10c] ss:$16 sps:$4 sm:$0xff]   ;;  %v10595_v42 = vld [vmem:[#allocation6 + $0x100] ss:$16 sps:$4 sm:$0xff]  }
 0x351   :  { %5303 = vmatpush1.bf16.msra.mxu0 %v10505_v43  ;;  %5819 = vmatpush1.bf16.msra.mxu1 %v10508_v44  ;;  %v10598_v43 = vld [vmem:[#allocation6 + $0x108] ss:$16 sps:$4 sm:$0xff]   ;;  %v10603_v44 = vld [vmem:[#allocation6 + $0x124] ss:$16 sps:$4 sm:$0xff]  }
 0x352   :  { %5304 = vmatprep.subr.bf16.mxu0 %v10513_v45  ;;  %5820 = vmatprep.subr.bf16.mxu1 %v10516_v46  ;;  %v10606_v45 = vld [vmem:[#allocation6 + $0x12c] ss:$16 sps:$4 sm:$0xff]   ;;  %v10601_v46 = vld [vmem:[#allocation6 + $0x120] ss:$16 sps:$4 sm:$0xff]  }
 0x355   :  { %5305 = vmatpush1.bf16.msra.mxu0 %v10511_v47  ;;  %5821 = vmatpush1.bf16.msra.mxu1 %v10514_v48  ;;  %v10604_v47 = vld [vmem:[#allocation6 + $0x128] ss:$16 sps:$4 sm:$0xff]   ;;  %v10609_v48 = vld [vmem:[#allocation6 + $0x144] ss:$16 sps:$4 sm:$0xff]  }
 0x356   :  { %5306 = vmatprep.subr.bf16.mxu0 %v10519_v49  ;;  %5822 = vmatprep.subr.bf16.mxu1 %v10522_v50  ;;  %v10612_v49 = vld [vmem:[#allocation6 + $0x14c] ss:$16 sps:$4 sm:$0xff]   ;;  %v10607_v50 = vld [vmem:[#allocation6 + $0x140] ss:$16 sps:$4 sm:$0xff]  }
 0x359   :  { %5307 = vmatpush1.bf16.msra.mxu0 %v10517_v51  ;;  %5823 = vmatpush1.bf16.msra.mxu1 %v10520_v52  ;;  %v10610_v51 = vld [vmem:[#allocation6 + $0x148] ss:$16 sps:$4 sm:$0xff]   ;;  %v10615_v52 = vld [vmem:[#allocation6 + $0x164] ss:$16 sps:$4 sm:$0xff]  }
 0x35a   :  { %5308 = vmatprep.subr.bf16.mxu0 %v10525_v53  ;;  %5824 = vmatprep.subr.bf16.mxu1 %v10528_v54  ;;  %v10618_v53 = vld [vmem:[#allocation6 + $0x16c] ss:$16 sps:$4 sm:$0xff]   ;;  %v10613_v54 = vld [vmem:[#allocation6 + $0x160] ss:$16 sps:$4 sm:$0xff]  }
 0x35d   :  { %5309 = vmatpush1.bf16.msra.mxu0 %v10523_v55  ;;  %5825 = vmatpush1.bf16.msra.mxu1 %v10526_v56  ;;  %v10616_v55 = vld [vmem:[#allocation6 + $0x168] ss:$16 sps:$4 sm:$0xff]   ;;  %v10621_v56 = vld [vmem:[#allocation6 + $0x184] ss:$16 sps:$4 sm:$0xff]  }
 0x35e   :  { %5310 = vmatprep.subr.bf16.mxu0 %v10531_v57  ;;  %5826 = vmatprep.subr.bf16.mxu1 %v10534_v58  ;;  %v10624_v57 = vld [vmem:[#allocation6 + $0x18c] ss:$16 sps:$4 sm:$0xff]   ;;  %v10619_v58 = vld [vmem:[#allocation6 + $0x180] ss:$16 sps:$4 sm:$0xff]  }
 0x361   :  { %5311 = vmatpush1.bf16.msra.mxu0 %v10529_v59  ;;  %5827 = vmatpush1.bf16.msra.mxu1 %v10532_v60  ;;  %v10622_v59 = vld [vmem:[#allocation6 + $0x188] ss:$16 sps:$4 sm:$0xff]   ;;  %v10627_v60 = vld [vmem:[#allocation6 + $0x1a4] ss:$16 sps:$4 sm:$0xff]  }
 0x362   :  { %5312 = vmatprep.subr.bf16.mxu0 %v10537_v61  ;;  %5828 = vmatprep.subr.bf16.mxu1 %v10540_v62  ;;  %v10630_v61 = vld [vmem:[#allocation6 + $0x1ac] ss:$16 sps:$4 sm:$0xff]   ;;  %v10625_v62 = vld [vmem:[#allocation6 + $0x1a0] ss:$16 sps:$4 sm:$0xff]  }
 0x365   :  { %5313 = vmatpush1.bf16.msra.mxu0 %v10535_v63  ;;  %5829 = vmatpush1.bf16.msra.mxu1 %v10538_v0  ;;  %v10628_v63 = vld [vmem:[#allocation6 + $0x1a8] ss:$16 sps:$4 sm:$0xff]   ;;  %v10633_v0 = vld [vmem:[#allocation6 + $0x1c4] ss:$16 sps:$4 sm:$0xff]  }
 0x366   :  { %5314 = vmatprep.subr.bf16.mxu0 %v10543_v1  ;;  %5830 = vmatprep.subr.bf16.mxu1 %v10546_v2  ;;  %v10636_v1 = vld [vmem:[#allocation6 + $0x1cc] ss:$16 sps:$4 sm:$0xff]   ;;  %v10631_v2 = vld [vmem:[#allocation6 + $0x1c0] ss:$16 sps:$4 sm:$0xff]  }
 0x369   :  { %5315 = vmatpush1.bf16.msra.mxu0 %v10541_v3  ;;  %5831 = vmatpush1.bf16.msra.mxu1 %v10544_v4  ;;  %v10634_v3 = vld [vmem:[#allocation6 + $0x1c8] ss:$16 sps:$4 sm:$0xff]   ;;  %v10639_v4 = vld [vmem:[#allocation6 + $0x1e4] ss:$16 sps:$4 sm:$0xff]  }
 0x36a   :  { %6645 = vmatprep.subr.bf16.mxu0 %v10549_v7  ;;  %6731 = vmatprep.subr.bf16.mxu1 %v10552_v8  ;;  %v10640_v7 = vld [vmem:[#allocation6 + $0x1e8] ss:$16 sps:$4 sm:$0xff]   ;;  %v10645_v8 = vld [vmem:[#allocation6 + $0x204] ss:$16 sps:$4 sm:$0xff]  }
 0x36c   :  { %5317 = vmatmul.mubr.bf16.vlgmr.msra.gmra.mrb[0].mxu0 %v179_v9  ;;  %5833 = vmatmul.mubr.bf16.vlgmr.msra.gmra.mrb[0].mxu1 %v179_v9  ;;  %v10648_v9 = vld [vmem:[#allocation6 + $0x20c] ss:$16 sps:$4 sm:$0xff]  }
 0x36d   :  { %6646 = vmatpush1.bf16.msra.mxu0 %v10547_v10  ;;  %6732 = vmatpush1.bf16.msra.mxu1 %v10550_v11  ;;  %v951_v10 = vlaneseq }
 0x36e   :  { %6647 = vmatprep.subr.bf16.mxu0 %v10555_v12  ;;  %6733 = vmatprep.subr.bf16.mxu1 %v10558_v13 }
 0x36f   :  { %v952_v11 = vshrl.u32 %v951_v10, 7  ;;  %v10682_v10 = vld [vmem:[#allocation6 + $0x2c8] ss:$16 sps:$4 sm:$0xff]  }
 0x371   :  { %6648 = vmatpush1.bf16.msra.mxu0 %v10553_v14  ;;  %6734 = vmatpush1.bf16.msra.mxu1 %v10556_v15  ;;  %v11386_v12 = vsub.s32 0, %v952_v11  ;;  %v11388_v13 = vsub.s32 2, %v952_v11  ;;  %v949_v14 = vld [vmem:[#allocation4] sm:$0xf]  ;;  %v11390_v15 = vsub.s32 1, %v952_v11 }
 0x372   :  { %6649 = vmatprep.subr.bf16.mxu0 %v10561_v16  ;;  %6735 = vmatprep.subr.bf16.mxu1 %v10564_v17  ;;  %v11392_v16 = vsub.s32 3, %v952_v11  ;;  %v10687_v11 = vld [vmem:[#allocation6 + $0x2e4] ss:$16 sps:$4 sm:$0xff]  }
 0x373   :  { %v954_v17 = vrot.slane %v949_v14, %v11386_v12 }
 0x375   :  { %6650 = vmatpush1.bf16.msra.mxu0 %v10559_v18  ;;  %6736 = vmatpush1.bf16.msra.mxu1 %v10562_v19  ;;  %v962_v18 = vrot.slane %v949_v14, %v11388_v13  ;;  %v958_v19 = vrot.slane %v949_v14, %v11390_v15 }
 0x376   :  { %6651 = vmatprep.subr.bf16.mxu0 %v10567_v20  ;;  %6737 = vmatprep.subr.bf16.mxu1 %v10570_v21  ;;  %v966_v20 = vrot.slane %v949_v14, %v11392_v16  ;;  %v10690_v14 = vld [vmem:[#allocation6 + $0x2ec] ss:$16 sps:$4 sm:$0xff]  }
 0x379   :  { %6652 = vmatpush1.bf16.msra.mxu0 %v10565_v22  ;;  %6738 = vmatpush1.bf16.msra.mxu1 %v10568_v23 }
 0x37a   :  { %6653 = vmatprep.subr.bf16.mxu0 %v10573_v24  ;;  %6739 = vmatprep.subr.bf16.mxu1 %v10576_v25 }
 0x37d   :  { %6654 = vmatpush1.bf16.msra.mxu0 %v10571_v26  ;;  %6740 = vmatpush1.bf16.msra.mxu1 %v10574_v27 }
 0x37e   :  { %6655 = vmatprep.subr.bf16.mxu0 %v10579_v28  ;;  %6741 = vmatprep.subr.bf16.mxu1 %v10582_v29 }
 0x381   :  { %6656 = vmatpush1.bf16.msra.mxu0 %v10577_v30  ;;  %6742 = vmatpush1.bf16.msra.mxu1 %v10580_v31 }
 0x382   :  { %6657 = vmatprep.subr.bf16.mxu0 %v10585_v32  ;;  %6743 = vmatprep.subr.bf16.mxu1 %v10588_v33 }
 0x385   :  { %6658 = vmatpush1.bf16.msra.mxu0 %v10583_v34  ;;  %6744 = vmatpush1.bf16.msra.mxu1 %v10586_v35 }
 0x386   :  { %6659 = vmatprep.subr.bf16.mxu0 %v10591_v36  ;;  %6745 = vmatprep.subr.bf16.mxu1 %v10594_v37 }
 0x389   :  { %6660 = vmatpush1.bf16.msra.mxu0 %v10589_v38  ;;  %6746 = vmatpush1.bf16.msra.mxu1 %v10592_v39 }
 0x38a   :  { %6661 = vmatprep.subr.bf16.mxu0 %v10597_v40  ;;  %6747 = vmatprep.subr.bf16.mxu1 %v10600_v41 }
 0x38d   :  { %6662 = vmatpush1.bf16.msra.mxu0 %v10595_v42  ;;  %6748 = vmatpush1.bf16.msra.mxu1 %v10598_v43 }
 0x38e   :  { %6663 = vmatprep.subr.bf16.mxu0 %v10603_v44  ;;  %6749 = vmatprep.subr.bf16.mxu1 %v10606_v45 }
 0x391   :  { %6664 = vmatpush1.bf16.msra.mxu0 %v10601_v46  ;;  %6750 = vmatpush1.bf16.msra.mxu1 %v10604_v47 }
 0x392   :  { %6665 = vmatprep.subr.bf16.mxu0 %v10609_v48  ;;  %6751 = vmatprep.subr.bf16.mxu1 %v10612_v49  ;;  %v10643_v49 = vld [vmem:[#allocation6 + $0x200] ss:$16 sps:$4 sm:$0xff]  }
 0x395   :  { %6666 = vmatpush1.bf16.msra.mxu0 %v10607_v50  ;;  %6752 = vmatpush1.bf16.msra.mxu1 %v10610_v51  ;;  %v10646_v50 = vld [vmem:[#allocation6 + $0x208] ss:$16 sps:$4 sm:$0xff]   ;;  %v10651_v51 = vld [vmem:[#allocation6 + $0x224] ss:$16 sps:$4 sm:$0xff]  }
 0x396   :  { %6667 = vmatprep.subr.bf16.mxu0 %v10615_v52  ;;  %6753 = vmatprep.subr.bf16.mxu1 %v10618_v53  ;;  %v10654_v52 = vld [vmem:[#allocation6 + $0x22c] ss:$16 sps:$4 sm:$0xff]   ;;  %v10649_v53 = vld [vmem:[#allocation6 + $0x220] ss:$16 sps:$4 sm:$0xff]  }
 0x399   :  { %6668 = vmatpush1.bf16.msra.mxu0 %v10613_v54  ;;  %6754 = vmatpush1.bf16.msra.mxu1 %v10616_v55  ;;  %v10652_v54 = vld [vmem:[#allocation6 + $0x228] ss:$16 sps:$4 sm:$0xff]   ;;  %v10657_v55 = vld [vmem:[#allocation6 + $0x244] ss:$16 sps:$4 sm:$0xff]  }
 0x39a   :  { %6669 = vmatprep.subr.bf16.mxu0 %v10621_v56  ;;  %6755 = vmatprep.subr.bf16.mxu1 %v10624_v57  ;;  %v10660_v56 = vld [vmem:[#allocation6 + $0x24c] ss:$16 sps:$4 sm:$0xff]   ;;  %v10655_v57 = vld [vmem:[#allocation6 + $0x240] ss:$16 sps:$4 sm:$0xff]  }
 0x39d   :  { %6670 = vmatpush1.bf16.msra.mxu0 %v10619_v58  ;;  %6756 = vmatpush1.bf16.msra.mxu1 %v10622_v59  ;;  %v10658_v58 = vld [vmem:[#allocation6 + $0x248] ss:$16 sps:$4 sm:$0xff]   ;;  %v10663_v59 = vld [vmem:[#allocation6 + $0x264] ss:$16 sps:$4 sm:$0xff]  }
 0x39e   :  { %6671 = vmatprep.subr.bf16.mxu0 %v10627_v60  ;;  %6757 = vmatprep.subr.bf16.mxu1 %v10630_v61  ;;  %v10666_v60 = vld [vmem:[#allocation6 + $0x26c] ss:$16 sps:$4 sm:$0xff]   ;;  %v10661_v61 = vld [vmem:[#allocation6 + $0x260] ss:$16 sps:$4 sm:$0xff]  }
 0x3a1   :  { %6672 = vmatpush1.bf16.msra.mxu0 %v10625_v62  ;;  %6758 = vmatpush1.bf16.msra.mxu1 %v10628_v63  ;;  %v10664_v62 = vld [vmem:[#allocation6 + $0x268] ss:$16 sps:$4 sm:$0xff]   ;;  %v10669_v63 = vld [vmem:[#allocation6 + $0x284] ss:$16 sps:$4 sm:$0xff]  }
 0x3a2   :  { %6673 = vmatprep.subr.bf16.mxu0 %v10633_v0  ;;  %6759 = vmatprep.subr.bf16.mxu1 %v10636_v1  ;;  %v10672_v0 = vld [vmem:[#allocation6 + $0x28c] ss:$16 sps:$4 sm:$0xff]   ;;  %v10667_v1 = vld [vmem:[#allocation6 + $0x280] ss:$16 sps:$4 sm:$0xff]  }
 0x3a5   :  { %6674 = vmatpush1.bf16.msra.mxu0 %v10631_v2  ;;  %6760 = vmatpush1.bf16.msra.mxu1 %v10634_v3  ;;  %v10670_v2 = vld [vmem:[#allocation6 + $0x288] ss:$16 sps:$4 sm:$0xff]   ;;  %v10675_v3 = vld [vmem:[#allocation6 + $0x2a4] ss:$16 sps:$4 sm:$0xff]  }
 0x3a6   :  { %6675 = vmatprep.subr.bf16.mxu0 %v10639_v4  ;;  %6761 = vmatprep.subr.bf16.mxu1 %v10642_v5  ;;  %v10678_v4 = vld [vmem:[#allocation6 + $0x2ac] ss:$16 sps:$4 sm:$0xff]   ;;  %v10673_v5 = vld [vmem:[#allocation6 + $0x2a0] ss:$16 sps:$4 sm:$0xff]  }
 0x3a9   :  { %6676 = vmatpush1.bf16.msra.mxu0 %v10637_v6  ;;  %6762 = vmatpush1.bf16.msra.mxu1 %v10640_v7  ;;  %v10676_v6 = vld [vmem:[#allocation6 + $0x2a8] ss:$16 sps:$4 sm:$0xff]   ;;  %v10681_v7 = vld [vmem:[#allocation6 + $0x2c4] ss:$16 sps:$4 sm:$0xff]  }
 0x3aa   :  { %6688 = vmatprep.subr.bf16.mxu0 %v10645_v8  ;;  %6774 = vmatprep.subr.bf16.mxu1 %v10648_v9  ;;  %v10684_v8 = vld [vmem:[#allocation6 + $0x2cc] ss:$16 sps:$4 sm:$0xff]   ;;  %v10679_v9 = vld [vmem:[#allocation6 + $0x2c0] ss:$16 sps:$4 sm:$0xff]  }
 0x43f   :  { %v5318_v21 = vpop.f32.mrb[0].mxu0  ;;  %v5834_v22 = vpop.f32.mrb[0].mxu1 }
 0x440   :  { %v9259_v23 = vadd.f32 %v5318_v21, %v954_v17  ;;  %v9263_v24 = vadd.f32 %v5834_v22, %v962_v18  ;;  %v5320_v25 = vpop.f32.mrb[1].mxu0  ;;  %v5836_v26 = vpop.f32.mrb[1].mxu1  ;;  %v10691_v21 = vld [vmem:[#allocation6 + $0x300] ss:$16 sps:$4 sm:$0xff]   ;;  %v10694_v22 = vld [vmem:[#allocation6 + $0x308] ss:$16 sps:$4 sm:$0xff]  }
 0x441   :  { %v9260_v27 = vadd.f32 %v5320_v25, %v958_v19  ;;  %v9264_v28 = vadd.f32 %v5836_v26, %v966_v20  ;;  %v5322_v29 = vpop.f32.mrb[2].mxu0  ;;  %v5838_v30 = vpop.f32.mrb[2].mxu1  ;;  %v10697_v25 = vld [vmem:[#allocation6 + $0x320] ss:$16 sps:$4 sm:$0xff]   ;;  %v10700_v26 = vld [vmem:[#allocation6 + $0x328] ss:$16 sps:$4 sm:$0xff]  }
 0x442   :  { %v9261_v31 = vadd.f32 %v5322_v29, %v954_v17  ;;  %v9265_v32 = vadd.f32 %v5838_v30, %v962_v18  ;;  %v5324_v33 = vpop.f32.mrb[3].mxu0  ;;  %v5840_v34 = vpop.f32.mrb[3].mxu1  ;;  %v5843_v37 = vmax.f32 %v9259_v23, 0.0  ;;  %v5845_v38 = vmax.f32 %v9263_v24, 0.0  ;;  %v10685_v17 = vld [vmem:[#allocation6 + $0x2e0] ss:$16 sps:$4 sm:$0xff]  }
 0x443   :  { %v9262_v35 = vadd.f32 %v5324_v33, %v958_v19  ;;  %v9266_v36 = vadd.f32 %v5840_v34, %v966_v20  ;;  %v5844_v41 = vmax.f32 %v9260_v27, 0.0  ;;  %v5846_v42 = vmax.f32 %v9264_v28, 0.0  ;;  %v10688_v18 = vld [vmem:[#allocation6 + $0x2e8] ss:$16 sps:$4 sm:$0xff]   ;;  %v10693_v19 = vld [vmem:[#allocation6 + $0x304] ss:$16 sps:$4 sm:$0xff]  }
 0x444   :  { %v5847_v39 = vmax.f32 %v9261_v31, 0.0  ;;  %v5849_v40 = vmax.f32 %v9265_v32, 0.0  ;;  %v10696_v20 = vld [vmem:[#allocation6 + $0x30c] ss:$16 sps:$4 sm:$0xff]   ;;  %v10699_v23 = vld [vmem:[#allocation6 + $0x324] ss:$16 sps:$4 sm:$0xff]  }
 0x445   :  { %v5848_v43 = vmax.f32 %v9262_v35, 0.0  ;;  %v5850_v44 = vmax.f32 %v9266_v36, 0.0  ;;  %v10702_v24 = vld [vmem:[#allocation6 + $0x32c] ss:$16 sps:$4 sm:$0xff]   ;;  %v10705_v27 = vld [vmem:[#allocation6 + $0x344] ss:$16 sps:$4 sm:$0xff]  }
 0x446   :  { %v5851_v45 = vpack.c.bf16 %v5847_v39, %v5843_v37  ;;  %v11398_v46 = vpack.c.bf16 %v5849_v40, %v5845_v38  ;;  %v10708_v28 = vld [vmem:[#allocation6 + $0x34c] ss:$16 sps:$4 sm:$0xff]   ;;  %v10703_v29 = vld [vmem:[#allocation6 + $0x340] ss:$16 sps:$4 sm:$0xff]   ;;  %v10706_v30 = vld [vmem:[#allocation6 + $0x348] ss:$16 sps:$4 sm:$0xff]  }
 0x447   :  { %v5852_v47 = vpack.c.bf16 %v5848_v43, %v5844_v41  ;;  %v5854_v48 = vpack.c.bf16 %v5850_v44, %v5846_v42  ;;  %v10711_v31 = vld [vmem:[#allocation6 + $0x364] ss:$16 sps:$4 sm:$0xff]   ;;  %v10714_v32 = vld [vmem:[#allocation6 + $0x36c] ss:$16 sps:$4 sm:$0xff]   ;;  %v10709_v33 = vld [vmem:[#allocation6 + $0x360] ss:$16 sps:$4 sm:$0xff]  }
 0x448   :  { %v10712_v34 = vld [vmem:[#allocation6 + $0x368] ss:$16 sps:$4 sm:$0xff]   ;;  %v10717_v35 = vld [vmem:[#allocation6 + $0x384] ss:$16 sps:$4 sm:$0xff]   ;;  %v10720_v36 = vld [vmem:[#allocation6 + $0x38c] ss:$16 sps:$4 sm:$0xff]  }
 0x449   :  { %6677 = vmatprep.mubr.bf16.mxu0 %v5852_v47  ;;  %6763 = vmatprep.mubr.bf16.mxu1 %v5852_v47  ;;  %v10715_v37 = vld [vmem:[#allocation6 + $0x380] ss:$16 sps:$4 sm:$0xff]   ;;  %v10718_v38 = vld [vmem:[#allocation6 + $0x388] ss:$16 sps:$4 sm:$0xff]   ;;  %v10723_v39 = vld [vmem:[#allocation6 + $0x3a4] ss:$16 sps:$4 sm:$0xff]  }
 0x44a   :  { %6678 = vmatmul.mubr.bf16.vlgmr.msra.gmra.mrb[4].mxu0 %v5851_v45  ;;  %6764 = vmatmul.mubr.bf16.vlgmr.msra.gmra.mrb[4].mxu1 %v5851_v45  ;;  %v10726_v40 = vld [vmem:[#allocation6 + $0x3ac] ss:$16 sps:$4 sm:$0xff]   ;;  %v10721_v41 = vld [vmem:[#allocation6 + $0x3a0] ss:$16 sps:$4 sm:$0xff]   ;;  %v10724_v42 = vld [vmem:[#allocation6 + $0x3a8] ss:$16 sps:$4 sm:$0xff]  }
 0x44b   :  { %6689 = vmatpush1.bf16.msra.mxu0 %v10643_v49  ;;  %6775 = vmatpush1.bf16.msra.mxu1 %v10646_v50  ;;  %v10729_v43 = vld [vmem:[#allocation6 + $0x3c4] ss:$16 sps:$4 sm:$0xff]   ;;  %v10732_v44 = vld [vmem:[#allocation6 + $0x3cc] ss:$16 sps:$4 sm:$0xff]   ;;  %v10727_v45 = vld [vmem:[#allocation6 + $0x3c0] ss:$16 sps:$4 sm:$0xff]  }
 0x44c   :  { %6720 = vmatprep.mubr.bf16.mxu0 %v5854_v48  ;;  %6806 = vmatprep.mubr.bf16.mxu1 %v5854_v48  ;;  %v10730_v47 = vld [vmem:[#allocation6 + $0x3c8] ss:$16 sps:$4 sm:$0xff]   ;;  %v10735_v48 = vld [vmem:[#allocation6 + $0x3e4] ss:$16 sps:$4 sm:$0xff]   ;;  %v10738_v49 = vld [vmem:[#allocation6 + $0x3ec] ss:$16 sps:$4 sm:$0xff]  }
 0x44d   :  { %6690 = vmatprep.subr.bf16.mxu0 %v10651_v51  ;;  %6776 = vmatprep.subr.bf16.mxu1 %v10654_v52  ;;  %v10733_v50 = vld [vmem:[#allocation6 + $0x3e0] ss:$16 sps:$4 sm:$0xff]   ;;  %v10736_v51 = vld [vmem:[#allocation6 + $0x3e8] ss:$16 sps:$4 sm:$0xff]  }
 0x44e   :  { %v10741_v52 = vld [vmem:[#allocation9 + $0x4] ss:$16 sps:$4 sm:$0xff]  }
 0x44f   :  { %6691 = vmatpush1.bf16.msra.mxu0 %v10649_v53  ;;  %6777 = vmatpush1.bf16.msra.mxu1 %v10652_v54  ;;  %v10744_v53 = vld [vmem:[#allocation9 + $0xc] ss:$16 sps:$4 sm:$0xff]   ;;  %v10739_v54 = vld [vmem:[#allocation9] ss:$16 sps:$4 sm:$0xff]  }
 0x450   :  { %6692 = vmatprep.subr.bf16.mxu0 %v10657_v55  ;;  %6778 = vmatprep.subr.bf16.mxu1 %v10660_v56  ;;  %v10742_v55 = vld [vmem:[#allocation9 + $0x8] ss:$16 sps:$4 sm:$0xff]   ;;  %v10747_v56 = vld [vmem:[#allocation9 + $0x24] ss:$16 sps:$4 sm:$0xff]  }
 0x453   :  { %6693 = vmatpush1.bf16.msra.mxu0 %v10655_v57  ;;  %6779 = vmatpush1.bf16.msra.mxu1 %v10658_v58  ;;  %v10750_v57 = vld [vmem:[#allocation9 + $0x2c] ss:$16 sps:$4 sm:$0xff]   ;;  %v10745_v58 = vld [vmem:[#allocation9 + $0x20] ss:$16 sps:$4 sm:$0xff]  }
 0x454   :  { %6694 = vmatprep.subr.bf16.mxu0 %v10663_v59  ;;  %6780 = vmatprep.subr.bf16.mxu1 %v10666_v60  ;;  %v10748_v59 = vld [vmem:[#allocation9 + $0x28] ss:$16 sps:$4 sm:$0xff]   ;;  %v10753_v60 = vld [vmem:[#allocation9 + $0x44] ss:$16 sps:$4 sm:$0xff]  }
 0x457   :  { %6695 = vmatpush1.bf16.msra.mxu0 %v10661_v61  ;;  %6781 = vmatpush1.bf16.msra.mxu1 %v10664_v62  ;;  %v10756_v61 = vld [vmem:[#allocation9 + $0x4c] ss:$16 sps:$4 sm:$0xff]   ;;  %v10751_v62 = vld [vmem:[#allocation9 + $0x40] ss:$16 sps:$4 sm:$0xff]  }
 0x458   :  { %6696 = vmatprep.subr.bf16.mxu0 %v10669_v63  ;;  %6782 = vmatprep.subr.bf16.mxu1 %v10672_v0  ;;  %v10754_v63 = vld [vmem:[#allocation9 + $0x48] ss:$16 sps:$4 sm:$0xff]   ;;  %v10759_v0 = vld [vmem:[#allocation9 + $0x64] ss:$16 sps:$4 sm:$0xff]  }
 0x45b   :  { %6697 = vmatpush1.bf16.msra.mxu0 %v10667_v1  ;;  %6783 = vmatpush1.bf16.msra.mxu1 %v10670_v2  ;;  %v10762_v1 = vld [vmem:[#allocation9 + $0x6c] ss:$16 sps:$4 sm:$0xff]   ;;  %v10757_v2 = vld [vmem:[#allocation9 + $0x60] ss:$16 sps:$4 sm:$0xff]  }
 0x45c   :  { %6698 = vmatprep.subr.bf16.mxu0 %v10675_v3  ;;  %6784 = vmatprep.subr.bf16.mxu1 %v10678_v4  ;;  %v10765_v3 = vld [vmem:[#allocation9 + $0x84] ss:$16 sps:$4 sm:$0xff]   ;;  %v10768_v4 = vld [vmem:[#allocation9 + $0x8c] ss:$16 sps:$4 sm:$0xff]  }
 0x45f   :  { %6699 = vmatpush1.bf16.msra.mxu0 %v10673_v5  ;;  %6785 = vmatpush1.bf16.msra.mxu1 %v10676_v6  ;;  %v10763_v5 = vld [vmem:[#allocation9 + $0x80] ss:$16 sps:$4 sm:$0xff]   ;;  %v10766_v6 = vld [vmem:[#allocation9 + $0x88] ss:$16 sps:$4 sm:$0xff]  }
 0x460   :  { %6700 = vmatprep.subr.bf16.mxu0 %v10681_v7  ;;  %6786 = vmatprep.subr.bf16.mxu1 %v10684_v8  ;;  %v10771_v7 = vld [vmem:[#allocation9 + $0xa4] ss:$16 sps:$4 sm:$0xff]   ;;  %v10774_v8 = vld [vmem:[#allocation9 + $0xac] ss:$16 sps:$4 sm:$0xff]  }
 0x463   :  { %6701 = vmatpush1.bf16.msra.mxu0 %v10679_v9  ;;  %6787 = vmatpush1.bf16.msra.mxu1 %v10682_v10  ;;  %v10769_v9 = vld [vmem:[#allocation9 + $0xa0] ss:$16 sps:$4 sm:$0xff]   ;;  %v10772_v10 = vld [vmem:[#allocation9 + $0xa8] ss:$16 sps:$4 sm:$0xff]  }
 0x464   :  { %6702 = vmatprep.subr.bf16.mxu0 %v10687_v11  ;;  %6788 = vmatprep.subr.bf16.mxu1 %v10690_v14  ;;  %v10777_v11 = vld [vmem:[#allocation9 + $0xc4] ss:$16 sps:$4 sm:$0xff]   ;;  %v10780_v14 = vld [vmem:[#allocation9 + $0xcc] ss:$16 sps:$4 sm:$0xff]  }
 0x467   :  { %6703 = vmatpush1.bf16.msra.mxu0 %v10685_v17  ;;  %6789 = vmatpush1.bf16.msra.mxu1 %v10688_v18  ;;  %v10775_v17 = vld [vmem:[#allocation9 + $0xc0] ss:$16 sps:$4 sm:$0xff]   ;;  %v10778_v18 = vld [vmem:[#allocation9 + $0xc8] ss:$16 sps:$4 sm:$0xff]  }
 0x468   :  { %6704 = vmatprep.subr.bf16.mxu0 %v10693_v19  ;;  %6790 = vmatprep.subr.bf16.mxu1 %v10696_v20  ;;  %v10783_v19 = vld [vmem:[#allocation9 + $0xe4] ss:$16 sps:$4 sm:$0xff]   ;;  %v10786_v20 = vld [vmem:[#allocation9 + $0xec] ss:$16 sps:$4 sm:$0xff]  }
 0x46b   :  { %6705 = vmatpush1.bf16.msra.mxu0 %v10691_v21  ;;  %6791 = vmatpush1.bf16.msra.mxu1 %v10694_v22  ;;  %v10781_v21 = vld [vmem:[#allocation9 + $0xe0] ss:$16 sps:$4 sm:$0xff]   ;;  %v10784_v22 = vld [vmem:[#allocation9 + $0xe8] ss:$16 sps:$4 sm:$0xff]  }
 0x46c   :  { %6706 = vmatprep.subr.bf16.mxu0 %v10699_v23  ;;  %6792 = vmatprep.subr.bf16.mxu1 %v10702_v24  ;;  %v10789_v23 = vld [vmem:[#allocation9 + $0x104] ss:$16 sps:$4 sm:$0xff]   ;;  %v10792_v24 = vld [vmem:[#allocation9 + $0x10c] ss:$16 sps:$4 sm:$0xff]  }
 0x46f   :  { %6707 = vmatpush1.bf16.msra.mxu0 %v10697_v25  ;;  %6793 = vmatpush1.bf16.msra.mxu1 %v10700_v26  ;;  %v10787_v25 = vld [vmem:[#allocation9 + $0x100] ss:$16 sps:$4 sm:$0xff]   ;;  %v10790_v26 = vld [vmem:[#allocation9 + $0x108] ss:$16 sps:$4 sm:$0xff]  }
 0x470   :  { %6708 = vmatprep.subr.bf16.mxu0 %v10705_v27  ;;  %6794 = vmatprep.subr.bf16.mxu1 %v10708_v28  ;;  %v10795_v27 = vld [vmem:[#allocation9 + $0x124] ss:$16 sps:$4 sm:$0xff]   ;;  %v10798_v28 = vld [vmem:[#allocation9 + $0x12c] ss:$16 sps:$4 sm:$0xff]  }
 0x473   :  { %6709 = vmatpush1.bf16.msra.mxu0 %v10703_v29  ;;  %6795 = vmatpush1.bf16.msra.mxu1 %v10706_v30  ;;  %v10793_v29 = vld [vmem:[#allocation9 + $0x120] ss:$16 sps:$4 sm:$0xff]   ;;  %v10796_v30 = vld [vmem:[#allocation9 + $0x128] ss:$16 sps:$4 sm:$0xff]  }
 0x474   :  { %6710 = vmatprep.subr.bf16.mxu0 %v10711_v31  ;;  %6796 = vmatprep.subr.bf16.mxu1 %v10714_v32  ;;  %v10801_v31 = vld [vmem:[#allocation9 + $0x144] ss:$16 sps:$4 sm:$0xff]   ;;  %v10804_v32 = vld [vmem:[#allocation9 + $0x14c] ss:$16 sps:$4 sm:$0xff]  }
 0x477   :  { %6711 = vmatpush1.bf16.msra.mxu0 %v10709_v33  ;;  %6797 = vmatpush1.bf16.msra.mxu1 %v10712_v34  ;;  %v10799_v33 = vld [vmem:[#allocation9 + $0x140] ss:$16 sps:$4 sm:$0xff]   ;;  %v10802_v34 = vld [vmem:[#allocation9 + $0x148] ss:$16 sps:$4 sm:$0xff]  }
 0x478   :  { %6712 = vmatprep.subr.bf16.mxu0 %v10717_v35  ;;  %6798 = vmatprep.subr.bf16.mxu1 %v10720_v36  ;;  %v10807_v35 = vld [vmem:[#allocation9 + $0x164] ss:$16 sps:$4 sm:$0xff]   ;;  %v10810_v36 = vld [vmem:[#allocation9 + $0x16c] ss:$16 sps:$4 sm:$0xff]  }
 0x47b   :  { %6713 = vmatpush1.bf16.msra.mxu0 %v10715_v37  ;;  %6799 = vmatpush1.bf16.msra.mxu1 %v10718_v38  ;;  %v10805_v37 = vld [vmem:[#allocation9 + $0x160] ss:$16 sps:$4 sm:$0xff]   ;;  %v10808_v38 = vld [vmem:[#allocation9 + $0x168] ss:$16 sps:$4 sm:$0xff]  }
 0x47c   :  { %6714 = vmatprep.subr.bf16.mxu0 %v10723_v39  ;;  %6800 = vmatprep.subr.bf16.mxu1 %v10726_v40  ;;  %v10813_v39 = vld [vmem:[#allocation9 + $0x184] ss:$16 sps:$4 sm:$0xff]   ;;  %v10816_v40 = vld [vmem:[#allocation9 + $0x18c] ss:$16 sps:$4 sm:$0xff]  }
 0x47f   :  { %6715 = vmatpush1.bf16.msra.mxu0 %v10721_v41  ;;  %6801 = vmatpush1.bf16.msra.mxu1 %v10724_v42  ;;  %v10811_v41 = vld [vmem:[#allocation9 + $0x180] ss:$16 sps:$4 sm:$0xff]   ;;  %v10814_v42 = vld [vmem:[#allocation9 + $0x188] ss:$16 sps:$4 sm:$0xff]  }
 0x480   :  { %6716 = vmatprep.subr.bf16.mxu0 %v10729_v43  ;;  %6802 = vmatprep.subr.bf16.mxu1 %v10732_v44  ;;  %v10819_v43 = vld [vmem:[#allocation9 + $0x1a4] ss:$16 sps:$4 sm:$0xff]   ;;  %v10822_v44 = vld [vmem:[#allocation9 + $0x1ac] ss:$16 sps:$4 sm:$0xff]  }
 0x483   :  { %6717 = vmatpush1.bf16.msra.mxu0 %v10727_v45  ;;  %6803 = vmatpush1.bf16.msra.mxu1 %v10730_v47  ;;  %v10817_v45 = vld [vmem:[#allocation9 + $0x1a0] ss:$16 sps:$4 sm:$0xff]   ;;  %v10820_v47 = vld [vmem:[#allocation9 + $0x1a8] ss:$16 sps:$4 sm:$0xff]  }
 0x484   :  { %6718 = vmatprep.subr.bf16.mxu0 %v10735_v48  ;;  %6804 = vmatprep.subr.bf16.mxu1 %v10738_v49  ;;  %v10825_v48 = vld [vmem:[#allocation9 + $0x1c4] ss:$16 sps:$4 sm:$0xff]   ;;  %v10828_v49 = vld [vmem:[#allocation9 + $0x1cc] ss:$16 sps:$4 sm:$0xff]  }
 0x487   :  { %6719 = vmatpush1.bf16.msra.mxu0 %v10733_v50  ;;  %6805 = vmatpush1.bf16.msra.mxu1 %v10736_v51  ;;  %v10823_v50 = vld [vmem:[#allocation9 + $0x1c0] ss:$16 sps:$4 sm:$0xff]   ;;  %v10826_v51 = vld [vmem:[#allocation9 + $0x1c8] ss:$16 sps:$4 sm:$0xff]  }
 0x488   :  { %7619 = vmatprep.subr.bf16.mxu0 %v10741_v52  ;;  %7705 = vmatprep.subr.bf16.mxu1 %v10744_v53  ;;  %v10831_v52 = vld [vmem:[#allocation9 + $0x1e4] ss:$16 sps:$4 sm:$0xff]   ;;  %v10834_v53 = vld [vmem:[#allocation9 + $0x1ec] ss:$16 sps:$4 sm:$0xff]  }
 0x48a   :  { %6721 = vmatmul.mubr.bf16.vlgmr.msra.gmra.mrb[4].mxu0 %v11398_v46  ;;  %6807 = vmatmul.mubr.bf16.vlgmr.msra.gmra.mrb[4].mxu1 %v11398_v46  ;;  %v10760_v46 = vld [vmem:[#allocation9 + $0x68] ss:$16 sps:$4 sm:$0xff]  }
 0x48b   :  { %7620 = vmatpush1.bf16.msra.mxu0 %v10739_v54  ;;  %7706 = vmatpush1.bf16.msra.mxu1 %v10742_v55  ;;  %v10829_v54 = vld [vmem:[#allocation9 + $0x1e0] ss:$16 sps:$4 sm:$0xff]   ;;  %v10832_v55 = vld [vmem:[#allocation9 + $0x1e8] ss:$16 sps:$4 sm:$0xff]  }
 0x48c   :  { %7621 = vmatprep.subr.bf16.mxu0 %v10747_v56  ;;  %7707 = vmatprep.subr.bf16.mxu1 %v10750_v57  ;;  %v10837_v56 = vld [vmem:[#allocation9 + $0x204] ss:$16 sps:$4 sm:$0xff]   ;;  %v10840_v57 = vld [vmem:[#allocation9 + $0x20c] ss:$16 sps:$4 sm:$0xff]  }
 0x48f   :  { %7622 = vmatpush1.bf16.msra.mxu0 %v10745_v58  ;;  %7708 = vmatpush1.bf16.msra.mxu1 %v10748_v59  ;;  %v5983_v58 = vld [vmem:[#allocation7] sm:$0xf] }
 0x490   :  { %7623 = vmatprep.subr.bf16.mxu0 %v10753_v60  ;;  %7709 = vmatprep.subr.bf16.mxu1 %v10756_v61  ;;  %v5988_v59 = vrot.slane %v5983_v58, %v11386_v12  ;;  %v5996_v60 = vrot.slane %v5983_v58, %v11388_v13  ;;  %v5992_v61 = vrot.slane %v5983_v58, %v11390_v15 }
 0x493   :  { %7624 = vmatpush1.bf16.msra.mxu0 %v10751_v62  ;;  %7710 = vmatpush1.bf16.msra.mxu1 %v10754_v63  ;;  %v6000_v62 = vrot.slane %v5983_v58, %v11392_v16  ;;  %v10882_v58 = vld [vmem:[#allocation9 + $0x2ec] ss:$16 sps:$4 sm:$0xff]  }
 0x494   :  { %7625 = vmatprep.subr.bf16.mxu0 %v10759_v0  ;;  %7711 = vmatprep.subr.bf16.mxu1 %v10762_v1 }
 0x497   :  { %7626 = vmatpush1.bf16.msra.mxu0 %v10757_v2  ;;  %7712 = vmatpush1.bf16.msra.mxu1 %v10760_v46 }
 0x498   :  { %7627 = vmatprep.subr.bf16.mxu0 %v10765_v3  ;;  %7713 = vmatprep.subr.bf16.mxu1 %v10768_v4 }
 0x49b   :  { %7628 = vmatpush1.bf16.msra.mxu0 %v10763_v5  ;;  %7714 = vmatpush1.bf16.msra.mxu1 %v10766_v6 }
 0x49c   :  { %7629 = vmatprep.subr.bf16.mxu0 %v10771_v7  ;;  %7715 = vmatprep.subr.bf16.mxu1 %v10774_v8 }
 0x49f   :  { %7630 = vmatpush1.bf16.msra.mxu0 %v10769_v9  ;;  %7716 = vmatpush1.bf16.msra.mxu1 %v10772_v10 }
 0x4a0   :  { %7631 = vmatprep.subr.bf16.mxu0 %v10777_v11  ;;  %7717 = vmatprep.subr.bf16.mxu1 %v10780_v14 }
 0x4a3   :  { %7632 = vmatpush1.bf16.msra.mxu0 %v10775_v17  ;;  %7718 = vmatpush1.bf16.msra.mxu1 %v10778_v18 }
 0x4a4   :  { %7633 = vmatprep.subr.bf16.mxu0 %v10783_v19  ;;  %7719 = vmatprep.subr.bf16.mxu1 %v10786_v20 }
 0x4a7   :  { %7634 = vmatpush1.bf16.msra.mxu0 %v10781_v21  ;;  %7720 = vmatpush1.bf16.msra.mxu1 %v10784_v22 }
 0x4a8   :  { %7635 = vmatprep.subr.bf16.mxu0 %v10789_v23  ;;  %7721 = vmatprep.subr.bf16.mxu1 %v10792_v24 }
 0x4ab   :  { %7636 = vmatpush1.bf16.msra.mxu0 %v10787_v25  ;;  %7722 = vmatpush1.bf16.msra.mxu1 %v10790_v26 }
 0x4ac   :  { %7637 = vmatprep.subr.bf16.mxu0 %v10795_v27  ;;  %7723 = vmatprep.subr.bf16.mxu1 %v10798_v28 }
 0x4af   :  { %7638 = vmatpush1.bf16.msra.mxu0 %v10793_v29  ;;  %7724 = vmatpush1.bf16.msra.mxu1 %v10796_v30  ;;  %v10835_v30 = vld [vmem:[#allocation9 + $0x200] ss:$16 sps:$4 sm:$0xff]  }
 0x4b0   :  { %7639 = vmatprep.subr.bf16.mxu0 %v10801_v31  ;;  %7725 = vmatprep.subr.bf16.mxu1 %v10804_v32  ;;  %v10838_v31 = vld [vmem:[#allocation9 + $0x208] ss:$16 sps:$4 sm:$0xff]   ;;  %v10843_v32 = vld [vmem:[#allocation9 + $0x224] ss:$16 sps:$4 sm:$0xff]  }
 0x4b3   :  { %7640 = vmatpush1.bf16.msra.mxu0 %v10799_v33  ;;  %7726 = vmatpush1.bf16.msra.mxu1 %v10802_v34  ;;  %v10846_v33 = vld [vmem:[#allocation9 + $0x22c] ss:$16 sps:$4 sm:$0xff]   ;;  %v10841_v34 = vld [vmem:[#allocation9 + $0x220] ss:$16 sps:$4 sm:$0xff]  }
 0x4b4   :  { %7641 = vmatprep.subr.bf16.mxu0 %v10807_v35  ;;  %7727 = vmatprep.subr.bf16.mxu1 %v10810_v36  ;;  %v10844_v35 = vld [vmem:[#allocation9 + $0x228] ss:$16 sps:$4 sm:$0xff]   ;;  %v10849_v36 = vld [vmem:[#allocation9 + $0x244] ss:$16 sps:$4 sm:$0xff]  }
 0x4b7   :  { %7642 = vmatpush1.bf16.msra.mxu0 %v10805_v37  ;;  %7728 = vmatpush1.bf16.msra.mxu1 %v10808_v38  ;;  %v10852_v37 = vld [vmem:[#allocation9 + $0x24c] ss:$16 sps:$4 sm:$0xff]   ;;  %v10847_v38 = vld [vmem:[#allocation9 + $0x240] ss:$16 sps:$4 sm:$0xff]  }
 0x4b8   :  { %7643 = vmatprep.subr.bf16.mxu0 %v10813_v39  ;;  %7729 = vmatprep.subr.bf16.mxu1 %v10816_v40  ;;  %v10850_v39 = vld [vmem:[#allocation9 + $0x248] ss:$16 sps:$4 sm:$0xff]   ;;  %v10855_v40 = vld [vmem:[#allocation9 + $0x264] ss:$16 sps:$4 sm:$0xff]  }
 0x4bb   :  { %7644 = vmatpush1.bf16.msra.mxu0 %v10811_v41  ;;  %7730 = vmatpush1.bf16.msra.mxu1 %v10814_v42  ;;  %v10858_v41 = vld [vmem:[#allocation9 + $0x26c] ss:$16 sps:$4 sm:$0xff]   ;;  %v10853_v42 = vld [vmem:[#allocation9 + $0x260] ss:$16 sps:$4 sm:$0xff]  }
 0x4bc   :  { %7645 = vmatprep.subr.bf16.mxu0 %v10819_v43  ;;  %7731 = vmatprep.subr.bf16.mxu1 %v10822_v44  ;;  %v10856_v43 = vld [vmem:[#allocation9 + $0x268] ss:$16 sps:$4 sm:$0xff]   ;;  %v10861_v44 = vld [vmem:[#allocation9 + $0x284] ss:$16 sps:$4 sm:$0xff]  }
 0x4bf   :  { %7646 = vmatpush1.bf16.msra.mxu0 %v10817_v45  ;;  %7732 = vmatpush1.bf16.msra.mxu1 %v10820_v47  ;;  %v10864_v45 = vld [vmem:[#allocation9 + $0x28c] ss:$16 sps:$4 sm:$0xff]   ;;  %v10859_v47 = vld [vmem:[#allocation9 + $0x280] ss:$16 sps:$4 sm:$0xff]  }
 0x4c0   :  { %7647 = vmatprep.subr.bf16.mxu0 %v10825_v48  ;;  %7733 = vmatprep.subr.bf16.mxu1 %v10828_v49  ;;  %v10862_v48 = vld [vmem:[#allocation9 + $0x288] ss:$16 sps:$4 sm:$0xff]   ;;  %v10867_v49 = vld [vmem:[#allocation9 + $0x2a4] ss:$16 sps:$4 sm:$0xff]  }
 0x4c3   :  { %7648 = vmatpush1.bf16.msra.mxu0 %v10823_v50  ;;  %7734 = vmatpush1.bf16.msra.mxu1 %v10826_v51  ;;  %v10870_v50 = vld [vmem:[#allocation9 + $0x2ac] ss:$16 sps:$4 sm:$0xff]   ;;  %v10865_v51 = vld [vmem:[#allocation9 + $0x2a0] ss:$16 sps:$4 sm:$0xff]  }
 0x4c4   :  { %7649 = vmatprep.subr.bf16.mxu0 %v10831_v52  ;;  %7735 = vmatprep.subr.bf16.mxu1 %v10834_v53  ;;  %v10868_v52 = vld [vmem:[#allocation9 + $0x2a8] ss:$16 sps:$4 sm:$0xff]   ;;  %v10873_v53 = vld [vmem:[#allocation9 + $0x2c4] ss:$16 sps:$4 sm:$0xff]  }
 0x4c7   :  { %7650 = vmatpush1.bf16.msra.mxu0 %v10829_v54  ;;  %7736 = vmatpush1.bf16.msra.mxu1 %v10832_v55  ;;  %v10876_v54 = vld [vmem:[#allocation9 + $0x2cc] ss:$16 sps:$4 sm:$0xff]   ;;  %v10871_v55 = vld [vmem:[#allocation9 + $0x2c0] ss:$16 sps:$4 sm:$0xff]  }
 0x4c8   :  { %7662 = vmatprep.subr.bf16.mxu0 %v10837_v56  ;;  %7748 = vmatprep.subr.bf16.mxu1 %v10840_v57  ;;  %v10874_v56 = vld [vmem:[#allocation9 + $0x2c8] ss:$16 sps:$4 sm:$0xff]   ;;  %v10879_v57 = vld [vmem:[#allocation9 + $0x2e4] ss:$16 sps:$4 sm:$0xff]  }
 0x55d   :  { %v6722_v63 = vpop.f32.mrb[4].mxu0  ;;  %v6808_v0 = vpop.f32.mrb[4].mxu1 }
 0x55e   :  { %v9267_v1 = vadd.f32 %v6722_v63, %v5988_v59  ;;  %v9271_v2 = vadd.f32 %v6808_v0, %v5996_v60  ;;  %v6724_v46 = vpop.f32.mrb[5].mxu0  ;;  %v6810_v3 = vpop.f32.mrb[5].mxu1  ;;  %v10883_v63 = vld [vmem:[#allocation9 + $0x300] ss:$16 sps:$4 sm:$0xff]   ;;  %v10886_v0 = vld [vmem:[#allocation9 + $0x308] ss:$16 sps:$4 sm:$0xff]  }
 0x55f   :  { %v9268_v4 = vadd.f32 %v6724_v46, %v5992_v61  ;;  %v9272_v5 = vadd.f32 %v6810_v3, %v6000_v62  ;;  %v6726_v6 = vpop.f32.mrb[6].mxu0  ;;  %v6812_v7 = vpop.f32.mrb[6].mxu1  ;;  %v10889_v46 = vld [vmem:[#allocation9 + $0x320] ss:$16 sps:$4 sm:$0xff]   ;;  %v10892_v3 = vld [vmem:[#allocation9 + $0x328] ss:$16 sps:$4 sm:$0xff]  }
 0x560   :  { %v9269_v8 = vadd.f32 %v6726_v6, %v5988_v59  ;;  %v9273_v9 = vadd.f32 %v6812_v7, %v5996_v60  ;;  %v6728_v10 = vpop.f32.mrb[7].mxu0  ;;  %v6814_v11 = vpop.f32.mrb[7].mxu1  ;;  %v6817_v18 = vmax.f32 %v9267_v1, 0.0  ;;  %v6819_v19 = vmax.f32 %v9271_v2, 0.0  ;;  %v10877_v59 = vld [vmem:[#allocation9 + $0x2e0] ss:$16 sps:$4 sm:$0xff]  }
 0x561   :  { %v9270_v14 = vadd.f32 %v6728_v10, %v5992_v61  ;;  %v9274_v17 = vadd.f32 %v6814_v11, %v6000_v62  ;;  %v6818_v22 = vmax.f32 %v9268_v4, 0.0  ;;  %v6820_v23 = vmax.f32 %v9272_v5, 0.0  ;;  %v10880_v60 = vld [vmem:[#allocation9 + $0x2e8] ss:$16 sps:$4 sm:$0xff]   ;;  %v10885_v61 = vld [vmem:[#allocation9 + $0x304] ss:$16 sps:$4 sm:$0xff]  }
 0x562   :  { %v6821_v20 = vmax.f32 %v9269_v8, 0.0  ;;  %v6823_v21 = vmax.f32 %v9273_v9, 0.0  ;;  %v10888_v62 = vld [vmem:[#allocation9 + $0x30c] ss:$16 sps:$4 sm:$0xff]   ;;  %v10891_v1 = vld [vmem:[#allocation9 + $0x324] ss:$16 sps:$4 sm:$0xff]  }
 0x563   :  { %v6822_v24 = vmax.f32 %v9270_v14, 0.0  ;;  %v6824_v25 = vmax.f32 %v9274_v17, 0.0  ;;  %v10894_v2 = vld [vmem:[#allocation9 + $0x32c] ss:$16 sps:$4 sm:$0xff]   ;;  %v10897_v4 = vld [vmem:[#allocation9 + $0x344] ss:$16 sps:$4 sm:$0xff]  }
 0x564   :  { %v6825_v26 = vpack.c.bf16 %v6821_v20, %v6817_v18  ;;  %v11406_v27 = vpack.c.bf16 %v6823_v21, %v6819_v19  ;;  %v10900_v5 = vld [vmem:[#allocation9 + $0x34c] ss:$16 sps:$4 sm:$0xff]   ;;  %v10895_v6 = vld [vmem:[#allocation9 + $0x340] ss:$16 sps:$4 sm:$0xff]   ;;  %v10898_v7 = vld [vmem:[#allocation9 + $0x348] ss:$16 sps:$4 sm:$0xff]  }
 0x565   :  { %v6826_v28 = vpack.c.bf16 %v6822_v24, %v6818_v22  ;;  %v6828_v29 = vpack.c.bf16 %v6824_v25, %v6820_v23  ;;  %v10903_v8 = vld [vmem:[#allocation9 + $0x364] ss:$16 sps:$4 sm:$0xff]   ;;  %v10906_v9 = vld [vmem:[#allocation9 + $0x36c] ss:$16 sps:$4 sm:$0xff]   ;;  %v10901_v10 = vld [vmem:[#allocation9 + $0x360] ss:$16 sps:$4 sm:$0xff]  }
 0x566   :  { %v10904_v11 = vld [vmem:[#allocation9 + $0x368] ss:$16 sps:$4 sm:$0xff]   ;;  %v10909_v14 = vld [vmem:[#allocation9 + $0x384] ss:$16 sps:$4 sm:$0xff]   ;;  %v10912_v17 = vld [vmem:[#allocation9 + $0x38c] ss:$16 sps:$4 sm:$0xff]  }
 0x567   :  { %7651 = vmatprep.mubr.bf16.mxu0 %v6826_v28  ;;  %7737 = vmatprep.mubr.bf16.mxu1 %v6826_v28  ;;  %v10907_v18 = vld [vmem:[#allocation9 + $0x380] ss:$16 sps:$4 sm:$0xff]   ;;  %v10910_v19 = vld [vmem:[#allocation9 + $0x388] ss:$16 sps:$4 sm:$0xff]   ;;  %v10915_v20 = vld [vmem:[#allocation9 + $0x3a4] ss:$16 sps:$4 sm:$0xff]  }
 0x568   :  { %7652 = vmatmul.mubr.bf16.vlgmr.msra.gmra.mrb[8].mxu0 %v6825_v26  ;;  %7738 = vmatmul.mubr.bf16.vlgmr.msra.gmra.mrb[8].mxu1 %v6825_v26  ;;  %v10918_v21 = vld [vmem:[#allocation9 + $0x3ac] ss:$16 sps:$4 sm:$0xff]   ;;  %v10913_v22 = vld [vmem:[#allocation9 + $0x3a0] ss:$16 sps:$4 sm:$0xff]   ;;  %v10916_v23 = vld [vmem:[#allocation9 + $0x3a8] ss:$16 sps:$4 sm:$0xff]  }
 0x569   :  { %7663 = vmatpush1.bf16.msra.mxu0 %v10835_v30  ;;  %7749 = vmatpush1.bf16.msra.mxu1 %v10838_v31  ;;  %v10921_v24 = vld [vmem:[#allocation9 + $0x3c4] ss:$16 sps:$4 sm:$0xff]   ;;  %v10924_v25 = vld [vmem:[#allocation9 + $0x3cc] ss:$16 sps:$4 sm:$0xff]   ;;  %v10919_v26 = vld [vmem:[#allocation9 + $0x3c0] ss:$16 sps:$4 sm:$0xff]  }
 0x56a   :  { %7694 = vmatprep.mubr.bf16.mxu0 %v6828_v29  ;;  %7780 = vmatprep.mubr.bf16.mxu1 %v6828_v29  ;;  %v10922_v28 = vld [vmem:[#allocation9 + $0x3c8] ss:$16 sps:$4 sm:$0xff]   ;;  %v10927_v29 = vld [vmem:[#allocation9 + $0x3e4] ss:$16 sps:$4 sm:$0xff]   ;;  %v10930_v30 = vld [vmem:[#allocation9 + $0x3ec] ss:$16 sps:$4 sm:$0xff]  }
 0x56b   :  { %7664 = vmatprep.subr.bf16.mxu0 %v10843_v32  ;;  %7750 = vmatprep.subr.bf16.mxu1 %v10846_v33  ;;  %v10925_v31 = vld [vmem:[#allocation9 + $0x3e0] ss:$16 sps:$4 sm:$0xff]   ;;  %v10928_v32 = vld [vmem:[#allocation9 + $0x3e8] ss:$16 sps:$4 sm:$0xff]  }
 0x56c   :  { %v10931_v33 = vld [vmem:[%s11526_s7 + $0x40] sm:$0xff]  }
 0x56d   :  { %7665 = vmatpush1.bf16.msra.mxu0 %v10841_v34  ;;  %7751 = vmatpush1.bf16.msra.mxu1 %v10844_v35  ;;  %v10932_v34 = vld [vmem:[%s11526_s7 + $0xc0] sm:$0xff]  }
 0x56e   :  { %7666 = vmatprep.subr.bf16.mxu0 %v10849_v36  ;;  %7752 = vmatprep.subr.bf16.mxu1 %v10852_v37  ;;  %v10933_v35 = vld [vmem:[%s11526_s7] sm:$0xff]   ;;  %v10935_v37 = vld [vmem:[%s11526_s7 + $0x48] sm:$0xff]  }
 0x56f   :  { %v10934_v36 = vld [vmem:[%s11526_s7 + $0x80] sm:$0xff]  }
 0x571   :  { %7667 = vmatpush1.bf16.msra.mxu0 %v10847_v38  ;;  %7753 = vmatpush1.bf16.msra.mxu1 %v10850_v39  ;;  %v10936_v38 = vld [vmem:[%s11526_s7 + $0xc8] sm:$0xff]  }
 0x572   :  { %7668 = vmatprep.subr.bf16.mxu0 %v10855_v40  ;;  %7754 = vmatprep.subr.bf16.mxu1 %v10858_v41  ;;  %v10937_v39 = vld [vmem:[%s11526_s7 + $0x8] sm:$0xff]   ;;  %v10939_v41 = vld [vmem:[%s11526_s7 + $0x50] sm:$0xff]  }
 0x573   :  { %v10938_v40 = vld [vmem:[%s11526_s7 + $0x88] sm:$0xff]  }
 0x575   :  { %7669 = vmatpush1.bf16.msra.mxu0 %v10853_v42  ;;  %7755 = vmatpush1.bf16.msra.mxu1 %v10856_v43  ;;  %v10941_v42 = vld [vmem:[%s11526_s7 + $0x10] sm:$0xff]  }
 0x576   :  { %7670 = vmatprep.subr.bf16.mxu0 %v10861_v44  ;;  %7756 = vmatprep.subr.bf16.mxu1 %v10864_v45  ;;  %v10942_v43 = vld [vmem:[%s11526_s7 + $0x90] sm:$0xff]   ;;  %v10943_v44 = vld [vmem:[%s11526_s7 + $0x58] sm:$0xff]  }
 0x577   :  { %v10944_v45 = vld [vmem:[%s11526_s7 + $0xd8] sm:$0xff]  }
 0x579   :  { %7671 = vmatpush1.bf16.msra.mxu0 %v10859_v47  ;;  %7757 = vmatpush1.bf16.msra.mxu1 %v10862_v48  ;;  %v10945_v47 = vld [vmem:[%s11526_s7 + $0x18] sm:$0xff]  }
 0x57a   :  { %7672 = vmatprep.subr.bf16.mxu0 %v10867_v49  ;;  %7758 = vmatprep.subr.bf16.mxu1 %v10870_v50  ;;  %v10946_v48 = vld [vmem:[%s11526_s7 + $0x98] sm:$0xff]   ;;  %v10947_v49 = vld [vmem:[%s11526_s7 + $0x60] sm:$0xff]  }
 0x57b   :  { %v10948_v50 = vld [vmem:[%s11526_s7 + $0xe0] sm:$0xff]  }
 0x57d   :  { %7673 = vmatpush1.bf16.msra.mxu0 %v10865_v51  ;;  %7759 = vmatpush1.bf16.msra.mxu1 %v10868_v52  ;;  %v10949_v51 = vld [vmem:[%s11526_s7 + $0x20] sm:$0xff]  }
 0x57e   :  { %7674 = vmatprep.subr.bf16.mxu0 %v10873_v53  ;;  %7760 = vmatprep.subr.bf16.mxu1 %v10876_v54  ;;  %v10950_v52 = vld [vmem:[%s11526_s7 + $0xa0] sm:$0xff]   ;;  %v10951_v53 = vld [vmem:[%s11526_s7 + $0x68] sm:$0xff]  }
 0x57f   :  { %v10952_v54 = vld [vmem:[%s11526_s7 + $0xe8] sm:$0xff]  }
 0x581   :  { %7675 = vmatpush1.bf16.msra.mxu0 %v10871_v55  ;;  %7761 = vmatpush1.bf16.msra.mxu1 %v10874_v56  ;;  %v10953_v55 = vld [vmem:[%s11526_s7 + $0x28] sm:$0xff]  }
 0x582   :  { %7676 = vmatprep.subr.bf16.mxu0 %v10879_v57  ;;  %7762 = vmatprep.subr.bf16.mxu1 %v10882_v58  ;;  %v10954_v56 = vld [vmem:[%s11526_s7 + $0xa8] sm:$0xff]   ;;  %v10955_v57 = vld [vmem:[%s11526_s7 + $0x70] sm:$0xff]  }
 0x583   :  { %v10956_v58 = vld [vmem:[%s11526_s7 + $0xf0] sm:$0xff]  }
 0x585   :  { %7677 = vmatpush1.bf16.msra.mxu0 %v10877_v59  ;;  %7763 = vmatpush1.bf16.msra.mxu1 %v10880_v60  ;;  %v10957_v59 = vld [vmem:[%s11526_s7 + $0x30] sm:$0xff]  }
 0x586   :  { %7678 = vmatprep.subr.bf16.mxu0 %v10885_v61  ;;  %7764 = vmatprep.subr.bf16.mxu1 %v10888_v62  ;;  %v10958_v60 = vld [vmem:[%s11526_s7 + $0xb0] sm:$0xff]   ;;  %v10959_v61 = vld [vmem:[%s11526_s7 + $0x78] sm:$0xff]  }
 0x587   :  { %v10960_v62 = vld [vmem:[%s11526_s7 + $0xf8] sm:$0xff]  }
 0x589   :  { %7679 = vmatpush1.bf16.msra.mxu0 %v10883_v63  ;;  %7765 = vmatpush1.bf16.msra.mxu1 %v10886_v0  ;;  %v10961_v63 = vld [vmem:[%s11526_s7 + $0x38] sm:$0xff]  }
 0x58a   :  { %7680 = vmatprep.subr.bf16.mxu0 %v10891_v1  ;;  %7766 = vmatprep.subr.bf16.mxu1 %v10894_v2  ;;  %v10962_v0 = vld [vmem:[%s11526_s7 + $0xb8] sm:$0xff]   ;;  %v6957_v1 = vld [vmem:[#allocation10] sm:$0xf] }
 0x58b   :  { %v6962_v2 = vrot.slane %v6957_v1, %v11386_v12 }
 0x58d   :  { %7681 = vmatpush1.bf16.msra.mxu0 %v10889_v46  ;;  %7767 = vmatpush1.bf16.msra.mxu1 %v10892_v3  ;;  %v6970_v46 = vrot.slane %v6957_v1, %v11388_v13  ;;  %v6966_v3 = vrot.slane %v6957_v1, %v11390_v15 }
 0x58e   :  { %7682 = vmatprep.subr.bf16.mxu0 %v10897_v4  ;;  %7768 = vmatprep.subr.bf16.mxu1 %v10900_v5  ;;  %v6974_v4 = vrot.slane %v6957_v1, %v11392_v16 }
 0x591   :  { %7683 = vmatpush1.bf16.msra.mxu0 %v10895_v6  ;;  %7769 = vmatpush1.bf16.msra.mxu1 %v10898_v7 }
 0x592   :  { %7684 = vmatprep.subr.bf16.mxu0 %v10903_v8  ;;  %7770 = vmatprep.subr.bf16.mxu1 %v10906_v9 }
 0x595   :  { %7685 = vmatpush1.bf16.msra.mxu0 %v10901_v10  ;;  %7771 = vmatpush1.bf16.msra.mxu1 %v10904_v11 }
 0x596   :  { %7686 = vmatprep.subr.bf16.mxu0 %v10909_v14  ;;  %7772 = vmatprep.subr.bf16.mxu1 %v10912_v17 }
 0x599   :  { %7687 = vmatpush1.bf16.msra.mxu0 %v10907_v18  ;;  %7773 = vmatpush1.bf16.msra.mxu1 %v10910_v19 }
 0x59a   :  { %7688 = vmatprep.subr.bf16.mxu0 %v10915_v20  ;;  %7774 = vmatprep.subr.bf16.mxu1 %v10918_v21 }
 0x59d   :  { %7689 = vmatpush1.bf16.msra.mxu0 %v10913_v22  ;;  %7775 = vmatpush1.bf16.msra.mxu1 %v10916_v23 }
 0x59e   :  { %7690 = vmatprep.subr.bf16.mxu0 %v10921_v24  ;;  %7776 = vmatprep.subr.bf16.mxu1 %v10924_v25 }
 0x5a1   :  { %7691 = vmatpush1.bf16.msra.mxu0 %v10919_v26  ;;  %7777 = vmatpush1.bf16.msra.mxu1 %v10922_v28 }
 0x5a2   :  { %7692 = vmatprep.subr.bf16.mxu0 %v10927_v29  ;;  %7778 = vmatprep.subr.bf16.mxu1 %v10930_v30 }
 0x5a5   :  { %7693 = vmatpush1.bf16.msra.mxu0 %v10925_v31  ;;  %7779 = vmatpush1.bf16.msra.mxu1 %v10928_v32 }
 0x5a6   :  { %9215 = vmatprep.subr.bf16.mxu0 %v10931_v33  ;;  %9237 = vmatprep.subr.bf16.mxu1 %v10932_v34 }
 0x5a8   :  { %7695 = vmatmul.mubr.bf16.vlgmr.msra.gmra.mrb[8].mxu0 %v11406_v27  ;;  %7781 = vmatmul.mubr.bf16.vlgmr.msra.gmra.mrb[8].mxu1 %v11406_v27  ;;  %v10940_v27 = vld [vmem:[%s11526_s7 + $0xd0] sm:$0xff]  }
 0x5a9   :  { %9216 = vmatpush3.bf16.msra.mxu0 %v10933_v35  ;;  %9238 = vmatpush3.bf16.msra.mxu1 %v10934_v36  ;;  %v9182_v36 = vld [vmem:[%s11527_s8] ss:$0 sm:$0xff] }
 0x5aa   :  { %9217 = vmatprep.subr.bf16.mxu0 %v10935_v37  ;;  %9239 = vmatprep.subr.bf16.mxu1 %v10936_v38 }
 0x5ad   :  { %9218 = vmatpush3.bf16.msra.mxu0 %v10937_v39  ;;  %9240 = vmatpush3.bf16.msra.mxu1 %v10938_v40 }
 0x5ae   :  { %9219 = vmatprep.subr.bf16.mxu0 %v10939_v41  ;;  %9241 = vmatprep.subr.bf16.mxu1 %v10940_v27 }
 0x5b1   :  { %9220 = vmatpush3.bf16.msra.mxu0 %v10941_v42  ;;  %9242 = vmatpush3.bf16.msra.mxu1 %v10942_v43 }
 0x5b2   :  { %9221 = vmatprep.subr.bf16.mxu0 %v10943_v44  ;;  %9243 = vmatprep.subr.bf16.mxu1 %v10944_v45 }
 0x5b5   :  { %9222 = vmatpush3.bf16.msra.mxu0 %v10945_v47  ;;  %9244 = vmatpush3.bf16.msra.mxu1 %v10946_v48 }
 0x5b6   :  { %9223 = vmatprep.subr.bf16.mxu0 %v10947_v49  ;;  %9245 = vmatprep.subr.bf16.mxu1 %v10948_v50 }
 0x5b9   :  { %9224 = vmatpush3.bf16.msra.mxu0 %v10949_v51  ;;  %9246 = vmatpush3.bf16.msra.mxu1 %v10950_v52 }
 0x5ba   :  { %9225 = vmatprep.subr.bf16.mxu0 %v10951_v53  ;;  %9247 = vmatprep.subr.bf16.mxu1 %v10952_v54 }
 0x5bd   :  { %9226 = vmatpush3.bf16.msra.mxu0 %v10953_v55  ;;  %9248 = vmatpush3.bf16.msra.mxu1 %v10954_v56 }
 0x5be   :  { %9227 = vmatprep.subr.bf16.mxu0 %v10955_v57  ;;  %9249 = vmatprep.subr.bf16.mxu1 %v10956_v58 }
 0x5c1   :  { %9228 = vmatpush3.bf16.msra.mxu0 %v10957_v59  ;;  %9250 = vmatpush3.bf16.msra.mxu1 %v10958_v60 }
 0x5c2   :  { %9229 = vmatprep.subr.bf16.mxu0 %v10959_v61  ;;  %9251 = vmatprep.subr.bf16.mxu1 %v10960_v62 }
 0x5c5   :  { %9230 = vmatpush3.bf16.msra.mxu0 %v10961_v63  ;;  %9252 = vmatpush3.bf16.msra.mxu1 %v10962_v0 }
 0x67b   :  { %v7696_v5 = vpop.f32.mrb[8].mxu0  ;;  %v7782_v6 = vpop.f32.mrb[8].mxu1 }
 0x67c   :  { %v9275_v7 = vadd.f32 %v7696_v5, %v6962_v2  ;;  %v9279_v8 = vadd.f32 %v7782_v6, %v6970_v46  ;;  %v7698_v9 = vpop.f32.mrb[9].mxu0  ;;  %v7784_v10 = vpop.f32.mrb[9].mxu1 }
 0x67d   :  { %v9276_v11 = vadd.f32 %v7698_v9, %v6966_v3  ;;  %v9280_v14 = vadd.f32 %v7784_v10, %v6974_v4  ;;  %v7700_v17 = vpop.f32.mrb[10].mxu0  ;;  %v7786_v18 = vpop.f32.mrb[10].mxu1 }
 0x67e   :  { %v9277_v19 = vadd.f32 %v7700_v17, %v6962_v2  ;;  %v9281_v20 = vadd.f32 %v7786_v18, %v6970_v46  ;;  %v7702_v21 = vpop.f32.mrb[11].mxu0  ;;  %v7788_v12 = vpop.f32.mrb[11].mxu1  ;;  %v7791_v23 = vmax.f32 %v9275_v7, 0.0  ;;  %v7793_v15 = vmax.f32 %v9279_v8, 0.0 }
 0x67f   :  { %v9278_v22 = vadd.f32 %v7702_v21, %v6966_v3  ;;  %v9282_v13 = vadd.f32 %v7788_v12, %v6974_v4  ;;  %v7792_v25 = vmax.f32 %v9276_v11, 0.0  ;;  %v7794_v26 = vmax.f32 %v9280_v14, 0.0 }
 0x680   :  { %v7795_v24 = vmax.f32 %v9277_v19, 0.0  ;;  %v7797_v16 = vmax.f32 %v9281_v20, 0.0 }
 0x681   :  { %v7796_v28 = vmax.f32 %v9278_v22, 0.0  ;;  %v7798_v29 = vmax.f32 %v9282_v13, 0.0 }
 0x682   :  { %v7799_v30 = vpack.c.bf16 %v7795_v24, %v7791_v23  ;;  %v7801_v31 = vpack.c.bf16 %v7797_v16, %v7793_v15 }
 0x683   :  { %v7800_v32 = vpack.c.bf16 %v7796_v28, %v7792_v25  ;;  %v7802_v33 = vpack.c.bf16 %v7798_v29, %v7794_v26 }
 0x685   :  { %8098 = vmatprep.mubr.bf16.mxu0 %v7800_v32  ;;  %8139 = vmatprep.mubr.bf16.mxu1 %v7802_v33 }
 0x686   :  { %8099 = vmatmul.mubr.bf16.vlgmr.msra.gmra.mrb[12].mxu0 %v7799_v30  ;;  %8140 = vmatmul.mubr.bf16.vlgmr.msra.gmra.mrb[12].mxu1 %v7801_v31 }
 0x759   :  { %v9231_v34 = vpop.f32.mrb[12].mxu0  ;;  %v9253_v35 = vpop.f32.mrb[12].mxu1 }
 0x75a   :  { %v9232_v37 = vpop.f32.mrb[13].mxu0  ;;  %v9254_v38 = vpop.f32.mrb[13].mxu1 }
 0x75b   :  { %v9233_v39 = vadd.f32 %v9232_v37, %v9231_v34  ;;  %v9255_v40 = vadd.f32 %v9254_v38, %v9253_v35  ;;  %v9234_v41 = vpop.f32.mrb[14].mxu0  ;;  %v9256_v27 = vpop.f32.mrb[14].mxu1 }
 0x75c   :  { %v9235_v42 = vpop.f32.mrb[15].mxu0  ;;  %v9257_v43 = vpop.f32.mrb[15].mxu1 }
 0x75d   :  { %v8101_v44 = vadd.f32 %v9233_v39, %v9182_v36  ;;  %v9236_v45 = vadd.f32 %v9235_v42, %v9234_v41  ;;  %v9258_v47 = vadd.f32 %v9257_v43, %v9256_v27 }
 0x75f   :  { %v8142_v48 = vadd.f32 %v9255_v40, %v8101_v44  ;;  %v8104_v49 = vadd.f32 %v9236_v45, %v9182_v36 }
 0x761   :  { %8148 = vst [vmem:[%s11528_s9] sm:$0xff] %v8142_v48  ;;  %v8145_v50 = vadd.f32 %v9258_v47, %v8104_v49 }
 0x763   :  { %8149 = vst [vmem:[%s11528_s9 + $0x8] sm:$0xff] %v8145_v50 }
 0x764   :  { %8154 = vsyncpa [#allocation3], 1 }
 0x765   :  { %8155 = vsyncpa [#allocation5], 1 }
 0x766   :  { %8156 = vsyncpa [#allocation8], 1 }
 0x767   :  { %8157 = vsyncpa [#allocation11], 1 }

</bundles_post_ra>
